<compile_context>
chip_gen: v6e
topology: v6e:2x2x1
jax: 0.10.0
libtpu: 0.0.40
codegen_flags: <defaults>
</compile_context>

<pallas_src>
import jax
import jax.numpy as jnp
from jax.experimental import pallas as pl
from jax.experimental.pallas import tpu as pltpu

L_IN = 100   # 100 -> conv(3) 98 -> pool(3) 32 -> conv(3) 30 -> pool(3) 10 -> conv(3) 8
C_IN = 2


def _round_up(x, m):
    return ((x + m - 1) // m) * m


# ---------------------------------------------------------------------------
# Kernel: five GEMMs + lane-slice max-pools, batch block folded into M.
# ---------------------------------------------------------------------------
def malware_kernel(x_ref, w1_ref, b1_ref, w2_ref, b2_ref, w3_ref, b3_ref,
                   wf1_ref, bf1_ref, wf2_ref, bf2_ref, o_ref):
    cdt = w1_ref.dtype          # matmul operand dtype (bf16)
    f32 = jnp.float32

    def dense(a, w_ref, b_ref):
        y = jnp.dot(a.astype(cdt), w_ref[...], preferred_element_type=f32)
        return y + b_ref[...]

    def pool3_lanes(h, group):
        # three pooling phases live in three contiguous, 128-aligned lane blocks
        return jnp.maximum(jnp.maximum(h[:, :group], h[:, group:2 * group]),
                           h[:, 2 * group:3 * group])

    x = x_ref[...]                                       # (B, 200) f32
    h = jnp.maximum(dense(x, w1_ref, b1_ref), 0.0)       # (B, 3072) = 3 x 32 x 32
    p = pool3_lanes(h, 1024)                             # (B, 1024) = 32 pos x 32 ch
    h = jnp.maximum(dense(p, w2_ref, b2_ref), 0.0)       # (B, 1152) = 3 x 12(pad) x 32
    p = pool3_lanes(h, 384)                              # (B, 384)  = 12(pad) pos x 32 ch
    h = jnp.maximum(dense(p, w3_ref, b3_ref), 0.0)       # (B, 256)  = 8 pos x 32 ch
    z = dense(h, wf1_ref, bf1_ref)                       # (B, 128)
    out = dense(z, wf2_ref, bf2_ref)                     # (B, 128): cols >=2 are zero pad
    o_ref[...] = out.astype(o_ref.dtype)


# ---------------------------------------------------------------------------
# Wrapper: grid over batch blocks; lane-dense (B, 128) output slab sliced to (N, 2).
# ---------------------------------------------------------------------------
def pytorch_malware_forward(x_ncl, packed_params, *, block_b=128):
    """x_ncl: (N, 2, 100) float32 in PyTorch NCL layout. Returns (N, 2) float32."""
    n = x_ncl.shape[0]
    assert x_ncl.shape[1:] == (C_IN, L_IN), x_ncl.shape
    x2 = x_ncl.reshape(n, C_IN * L_IN).astype(jnp.float32)   # row index = c*100 + t

    bb = min(_round_up(block_b, 8), _round_up(n, 8))          # batch block (mult of 8)
    n_pad = _round_up(n, bb)
    if n_pad != n:
        x2 = jnp.pad(x2, ((0, n_pad - n), (0, 0)))

    def full_spec(a):
        nd = a.ndim
        return pl.BlockSpec(a.shape, lambda i, _nd=nd: (0,) * _nd)

    in_specs = [pl.BlockSpec((bb, C_IN * L_IN), lambda i: (i, 0))]
    in_specs += [full_spec(p) for p in packed_params]

    out = pl.pallas_call(
        malware_kernel,
        out_shape=jax.ShapeDtypeStruct((n_pad, 128), jnp.float32),
        grid=(n_pad // bb,),
        in_specs=in_specs,
        out_specs=pl.BlockSpec((bb, 128), lambda i: (i, 0)),
        compiler_params=pltpu.CompilerParams(
            dimension_semantics=("parallel",),
            vmem_limit_bytes=32 * 1024 * 1024),
    )(x2, *packed_params)
    return out[:n, :2]


# ---------------------------------------------------------------------------
# Parameter packing (wrapper-side, plain XLA): conv -> structured GEMM weights.
# ---------------------------------------------------------------------------
def _conv_as_gemm(w, n_in, n_out, row_order):
    """w: (C_out, C_in, 3) torch Conv1d weight.
    Returns M of shape (n_in*C_in, n_out*C_out) with
      M[row(p, c), q*C_out + o] = w[o, c, p - q]  if 0 <= p - q < 3 else 0,
    where row(p, c) = p*C_in + c ('pc') or c*n_in + p ('cp')."""
    c_out, c_in, k = w.shape
    p = jnp.arange(n_in)[:, None]
    q = jnp.arange(n_out)[None, :]
    tap = p - q
    valid = ((tap >= 0) & (tap < k)).astype(w.dtype)
    w_kco = jnp.transpose(w, (2, 1, 0))                            # (K, C_in, C_out)
    t = w_kco[jnp.clip(tap, 0, k - 1)] * valid[..., None, None]    # (n_in, n_out, C_in, C_out)
    if row_order == "pc":
        t = jnp.transpose(t, (0, 2, 1, 3))                         # (n_in, C_in, n_out, C_out)
    else:  # 'cp'
        t = jnp.transpose(t, (2, 0, 1, 3))                         # (C_in, n_in, n_out, C_out)
    return t.reshape(n_in * c_in, n_out * c_out)


def _group_pool_phases(m, n_pool, c_out, n_pool_pad=None):
    """Regroup columns from (q=3*mp+j)*C_out + o  to  j*(n_pool_pad*C_out) + mp*C_out + o,
    optionally zero-padding the pooled-position axis to n_pool_pad (lane alignment)."""
    rows = m.shape[0]
    m = m.reshape(rows, n_pool, 3, c_out)
    m = jnp.transpose(m, (0, 2, 1, 3))                             # (rows, 3, n_pool, c_out)
    if n_pool_pad is not None and n_pool_pad > n_pool:
        m = jnp.pad(m, ((0, 0), (0, 0), (0, n_pool_pad - n_pool), (0, 0)))
        n_pool = n_pool_pad
    return m.reshape(rows, 3 * n_pool * c_out)


def pack_params(params, compute_dtype=jnp.bfloat16):
    (w1, b1, w2, b2, w3, b3, wf1, bf1, wf2, bf2) = params
    f32 = jnp.float32

    # Conv1 GEMM: (200, 3072); pool group = 32 pos * 32 ch = 1024 lanes (aligned).
    w1big = _group_pool_phases(_conv_as_gemm(w1, 100, 96, "cp"), 32, 32)
    b1big = jnp.tile(b1, 96)[None]                                          # (1, 3072)

    # Conv2 GEMM: pad pooled positions 10 -> 12 so each phase block is 384 = 3*128 lanes.
    w2big = _group_pool_phases(_conv_as_gemm(w2, 32, 30, "pc"), 10, 32, n_pool_pad=12)
    b2grp = jnp.concatenate([jnp.tile(b2, 10), jnp.zeros((2 * 32,), b2.dtype)])
    b2big = jnp.tile(b2grp, 3)[None]                                        # (1, 1152)

    # Conv3 GEMM: input rows padded 320 -> 384 (padded pooled columns hit zero rows).
    w3big = jnp.pad(_conv_as_gemm(w3, 10, 8, "pc"), ((0, 64), (0, 0)))      # (384, 256)
    b3big = jnp.tile(b3, 8)[None]                                           # (1, 256)

    # FC1: kernel feature order is l*32 + o; torch Flatten order is o*8 + l.
    wf1p = jnp.transpose(wf1.reshape(128, 32, 8), (2, 1, 0)).reshape(256, 128)
    # FC2 padded to 128 output lanes -> lane-dense, unmasked HBM store.
    wf2p = jnp.pad(wf2.T, ((0, 0), (0, 126)))                               # (128, 128)
    bf2p = jnp.pad(bf2, (0, 126))                                           # (128,)

    return (w1big.astype(compute_dtype), b1big.astype(f32),
            w2big.astype(compute_dtype), b2big.astype(f32),
            w3big.astype(compute_dtype), b3big.astype(f32),
            wf1p.astype(compute_dtype), bf1[None].astype(f32),
            wf2p.astype(compute_dtype), bf2p[None].astype(f32))


# ---------------------------------------------------------------------------
# PyTorch-default-style init (torch layouts) + plain-JAX reference.
# ---------------------------------------------------------------------------
def init_params(key):
    ks = jax.random.split(key, 10)

    def u(k, shape, fan_in):
        b = 1.0 / jnp.sqrt(jnp.float32(fan_in))
        return jax.random.uniform(k, shape, jnp.float32, -b, b)

    w1 = u(ks[0], (32, 2, 3), 6);     b1 = u(ks[1], (32,), 6)
    w2 = u(ks[2], (32, 32, 3), 96);   b2 = u(ks[3], (32,), 96)
    w3 = u(ks[4], (32, 32, 3), 96);   b3 = u(ks[5], (32,), 96)
    wf1 = u(ks[6], (128, 256), 256);  bf1 = u(ks[7], (128,), 256)
    wf2 = u(ks[8], (2, 128), 128);    bf2 = u(ks[9], (2,), 128)
    return (w1, b1, w2, b2, w3, b3, wf1, bf1, wf2, bf2)


def reference_forward(x_ncl, params):
    (w1, b1, w2, b2, w3, b3, wf1, bf1, wf2, bf2) = params

    def conv1d(a, w, b):
        k = w.shape[2]
        lo = a.shape[2] - k + 1
        y = sum(jnp.einsum('ncl,oc->nol', a[:, :, i:i + lo], w[:, :, i])
                for i in range(k))
        return y + b[None, :, None]

    def pool3(a):
        lo = a.shape[2] // 3
        return jnp.max(a[:, :, :3 * lo].reshape(a.shape[0], a.shape[1], lo, 3), axis=3)

    h = jax.nn.relu(conv1d(x_ncl, w1, b1)); h = pool3(h)
    h = jax.nn.relu(conv1d(h, w2, b2));     h = pool3(h)
    h = jax.nn.relu(conv1d(h, w3, b3))                     # (N, 32, 8)
    f = h.reshape(h.shape[0], -1)                          # channel-major flatten
    z = f @ wf1.T + bf1[None]
    return z @ wf2.T + bf2[None]


if __name__ == "__main__":
    key = jax.random.PRNGKey(0)
    kp, kx = jax.random.split(key)
    params = init_params(kp)
    packed = pack_params(params)                            # bf16 GEMM weights, f32 biases

    # PyTorch input layout (N, C_in, L) = (2, 2, 100)
    x = jax.random.normal(kx, (2, C_IN, L_IN), jnp.float32)

    out = pytorch_malware_forward(x, packed, block_b=128)
    out = jax.block_until_ready(out)

    ref = reference_forward(x, params)
    assert out.shape == (2, 2), out.shape
    # bf16 matmul operands (f32 accumulation) vs f32 reference
    assert jnp.allclose(out, ref, atol=3e-2, rtol=3e-2), (out, ref)
    print("KERNEL_OK")
</pallas_src>

<mosaic_0001>
module attributes {stable_mosaic.version = 11 : i64} {
  func.func @malware_kernel(%arg0: i32, %arg1: memref<8x200xf32, #tpu.memory_space<vmem>>, %arg2: memref<200x3072xbf16, #tpu.memory_space<vmem>>, %arg3: memref<1x3072xf32, #tpu.memory_space<vmem>>, %arg4: memref<1024x1152xbf16, #tpu.memory_space<vmem>>, %arg5: memref<1x1152xf32, #tpu.memory_space<vmem>>, %arg6: memref<384x256xbf16, #tpu.memory_space<vmem>>, %arg7: memref<1x256xf32, #tpu.memory_space<vmem>>, %arg8: memref<256x128xbf16, #tpu.memory_space<vmem>>, %arg9: memref<1x128xf32, #tpu.memory_space<vmem>>, %arg10: memref<128x128xbf16, #tpu.memory_space<vmem>>, %arg11: memref<1x128xf32, #tpu.memory_space<vmem>>, %arg12: memref<8x128xf32, #tpu.memory_space<vmem>>) attributes {dimension_semantics = [#tpu.dimension_semantics<parallel>], iteration_bounds = array<i64: 1>, scalar_prefetch = 0 : i64, scratch_operands = 0 : i64, tpu.core_type = #tpu.core_type<tc>, window_params = [{transform_indices = @transform_0, window_bounds = array<i64: 8, 200>}, {pipeline_mode = #tpu.pipeline_mode<synchronous>, transform_indices = @transform_1, window_bounds = array<i64: 200, 3072>}, {pipeline_mode = #tpu.pipeline_mode<synchronous>, transform_indices = @transform_2, window_bounds = array<i64: 1, 3072>}, {pipeline_mode = #tpu.pipeline_mode<synchronous>, transform_indices = @transform_3, window_bounds = array<i64: 1024, 1152>}, {pipeline_mode = #tpu.pipeline_mode<synchronous>, transform_indices = @transform_4, window_bounds = array<i64: 1, 1152>}, {pipeline_mode = #tpu.pipeline_mode<synchronous>, transform_indices = @transform_5, window_bounds = array<i64: 384, 256>}, {pipeline_mode = #tpu.pipeline_mode<synchronous>, transform_indices = @transform_6, window_bounds = array<i64: 1, 256>}, {pipeline_mode = #tpu.pipeline_mode<synchronous>, transform_indices = @transform_7, window_bounds = array<i64: 256, 128>}, {pipeline_mode = #tpu.pipeline_mode<synchronous>, transform_indices = @transform_8, window_bounds = array<i64: 1, 128>}, {pipeline_mode = #tpu.pipeline_mode<synchronous>, transform_indices = @transform_9, window_bounds = array<i64: 128, 128>}, {pipeline_mode = #tpu.pipeline_mode<synchronous>, transform_indices = @transform_10, window_bounds = array<i64: 1, 128>}, {transform_indices = @transform_11, window_bounds = array<i64: 8, 128>}]} {
    %c0 = arith.constant 0 : index
    %c0_0 = arith.constant 0 : index
    %0 = vector.load %arg1[%c0, %c0_0] : memref<8x200xf32, #tpu.memory_space<vmem>>, vector<8x200xf32>
    %1 = arith.truncf %0 : vector<8x200xf32> to vector<8x200xbf16>
    %c0_1 = arith.constant 0 : index
    %c0_2 = arith.constant 0 : index
    %2 = vector.load %arg2[%c0_1, %c0_2] : memref<200x3072xbf16, #tpu.memory_space<vmem>>, vector<200x3072xbf16>
    %cst = arith.constant dense<0.000000e+00> : vector<8x3072xf32>
    %3 = tpu.matmul %1, %2, %cst {dimension_numbers = #tpu.dot_dimension_numbers<[1], [0], [0], [1], [0, 0, 1, 1], [], []>} : vector<8x200xbf16>, vector<200x3072xbf16>, vector<8x3072xf32> -> vector<8x3072xf32>
    %c0_3 = arith.constant 0 : index
    %c0_4 = arith.constant 0 : index
    %4 = vector.load %arg3[%c0_3, %c0_4] : memref<1x3072xf32, #tpu.memory_space<vmem>>, vector<1x3072xf32>
    %5 = vector.broadcast %4 : vector<1x3072xf32> to vector<8x3072xf32>
    %6 = arith.addf %3, %5 : vector<8x3072xf32>
    %cst_5 = arith.constant 0.000000e+00 : f32
    %7 = vector.broadcast %cst_5 : f32 to vector<8x3072xf32>
    %8 = arith.maximumf %6, %7 : vector<8x3072xf32>
    %9 = vector.extract_strided_slice %8 {offsets = [0, 0], sizes = [8, 1024], strides = [1, 1]} : vector<8x3072xf32> to vector<8x1024xf32>
    %10 = vector.extract_strided_slice %8 {offsets = [0, 1024], sizes = [8, 1024], strides = [1, 1]} : vector<8x3072xf32> to vector<8x1024xf32>
    %11 = arith.maximumf %9, %10 : vector<8x1024xf32>
    %12 = vector.extract_strided_slice %8 {offsets = [0, 2048], sizes = [8, 1024], strides = [1, 1]} : vector<8x3072xf32> to vector<8x1024xf32>
    %13 = arith.maximumf %11, %12 : vector<8x1024xf32>
    %14 = arith.truncf %13 : vector<8x1024xf32> to vector<8x1024xbf16>
    %c0_6 = arith.constant 0 : index
    %c0_7 = arith.constant 0 : index
    %15 = vector.load %arg4[%c0_6, %c0_7] : memref<1024x1152xbf16, #tpu.memory_space<vmem>>, vector<1024x1152xbf16>
    %cst_8 = arith.constant dense<0.000000e+00> : vector<8x1152xf32>
    %16 = tpu.matmul %14, %15, %cst_8 {dimension_numbers = #tpu.dot_dimension_numbers<[1], [0], [0], [1], [0, 0, 1, 1], [], []>} : vector<8x1024xbf16>, vector<1024x1152xbf16>, vector<8x1152xf32> -> vector<8x1152xf32>
    %c0_9 = arith.constant 0 : index
    %c0_10 = arith.constant 0 : index
    %17 = vector.load %arg5[%c0_9, %c0_10] : memref<1x1152xf32, #tpu.memory_space<vmem>>, vector<1x1152xf32>
    %18 = vector.broadcast %17 : vector<1x1152xf32> to vector<8x1152xf32>
    %19 = arith.addf %16, %18 : vector<8x1152xf32>
    %cst_11 = arith.constant 0.000000e+00 : f32
    %20 = vector.broadcast %cst_11 : f32 to vector<8x1152xf32>
    %21 = arith.maximumf %19, %20 : vector<8x1152xf32>
    %22 = vector.extract_strided_slice %21 {offsets = [0, 0], sizes = [8, 384], strides = [1, 1]} : vector<8x1152xf32> to vector<8x384xf32>
    %23 = vector.extract_strided_slice %21 {offsets = [0, 384], sizes = [8, 384], strides = [1, 1]} : vector<8x1152xf32> to vector<8x384xf32>
    %24 = arith.maximumf %22, %23 : vector<8x384xf32>
    %25 = vector.extract_strided_slice %21 {offsets = [0, 768], sizes = [8, 384], strides = [1, 1]} : vector<8x1152xf32> to vector<8x384xf32>
    %26 = arith.maximumf %24, %25 : vector<8x384xf32>
    %27 = arith.truncf %26 : vector<8x384xf32> to vector<8x384xbf16>
    %c0_12 = arith.constant 0 : index
    %c0_13 = arith.constant 0 : index
    %28 = vector.load %arg6[%c0_12, %c0_13] : memref<384x256xbf16, #tpu.memory_space<vmem>>, vector<384x256xbf16>
    %cst_14 = arith.constant dense<0.000000e+00> : vector<8x256xf32>
    %29 = tpu.matmul %27, %28, %cst_14 {dimension_numbers = #tpu.dot_dimension_numbers<[1], [0], [0], [1], [0, 0, 1, 1], [], []>} : vector<8x384xbf16>, vector<384x256xbf16>, vector<8x256xf32> -> vector<8x256xf32>
    %c0_15 = arith.constant 0 : index
    %c0_16 = arith.constant 0 : index
    %30 = vector.load %arg7[%c0_15, %c0_16] : memref<1x256xf32, #tpu.memory_space<vmem>>, vector<1x256xf32>
    %31 = vector.broadcast %30 : vector<1x256xf32> to vector<8x256xf32>
    %32 = arith.addf %29, %31 : vector<8x256xf32>
    %cst_17 = arith.constant 0.000000e+00 : f32
    %33 = vector.broadcast %cst_17 : f32 to vector<8x256xf32>
    %34 = arith.maximumf %32, %33 : vector<8x256xf32>
    %35 = arith.truncf %34 : vector<8x256xf32> to vector<8x256xbf16>
    %c0_18 = arith.constant 0 : index
    %c0_19 = arith.constant 0 : index
    %36 = vector.load %arg8[%c0_18, %c0_19] : memref<256x128xbf16, #tpu.memory_space<vmem>>, vector<256x128xbf16>
    %cst_20 = arith.constant dense<0.000000e+00> : vector<8x128xf32>
    %37 = tpu.matmul %35, %36, %cst_20 {dimension_numbers = #tpu.dot_dimension_numbers<[1], [0], [0], [1], [0, 0, 1, 1], [], []>} : vector<8x256xbf16>, vector<256x128xbf16>, vector<8x128xf32> -> vector<8x128xf32>
    %c0_21 = arith.constant 0 : index
    %c0_22 = arith.constant 0 : index
    %38 = vector.load %arg9[%c0_21, %c0_22] : memref<1x128xf32, #tpu.memory_space<vmem>>, vector<1x128xf32>
    %39 = vector.broadcast %38 : vector<1x128xf32> to vector<8x128xf32>
    %40 = arith.addf %37, %39 : vector<8x128xf32>
    %41 = arith.truncf %40 : vector<8x128xf32> to vector<8x128xbf16>
    %c0_23 = arith.constant 0 : index
    %c0_24 = arith.constant 0 : index
    %42 = vector.load %arg10[%c0_23, %c0_24] : memref<128x128xbf16, #tpu.memory_space<vmem>>, vector<128x128xbf16>
    %cst_25 = arith.constant dense<0.000000e+00> : vector<8x128xf32>
    %43 = tpu.matmul %41, %42, %cst_25 {dimension_numbers = #tpu.dot_dimension_numbers<[1], [0], [0], [1], [0, 0, 1, 1], [], []>} : vector<8x128xbf16>, vector<128x128xbf16>, vector<8x128xf32> -> vector<8x128xf32>
    %c0_26 = arith.constant 0 : index
    %c0_27 = arith.constant 0 : index
    %44 = vector.load %arg11[%c0_26, %c0_27] : memref<1x128xf32, #tpu.memory_space<vmem>>, vector<1x128xf32>
    %45 = vector.broadcast %44 : vector<1x128xf32> to vector<8x128xf32>
    %46 = arith.addf %43, %45 : vector<8x128xf32>
    %c0_28 = arith.constant 0 : index
    %c0_29 = arith.constant 0 : index
    %47 = vector.load %arg12[%c0_28, %c0_29] : memref<8x128xf32, #tpu.memory_space<vmem>>, vector<8x128xf32>
    tpu.vector_store %arg12[%c0_28, %c0_29], %46 {strides = array<i32>} : memref<8x128xf32, #tpu.memory_space<vmem>>, vector<8x128xf32>,
    return
  }
  func.func @transform_0(%arg0: i32) -> (i32, i32) {
    %c0_i32 = arith.constant 0 : i32
    %c0_i32_0 = arith.constant 0 : i32
    return %arg0, %c0_i32 : i32, i32
  }
  func.func @transform_1(%arg0: i32) -> (i32, i32) {
    %c0_i32 = arith.constant 0 : i32
    %c0_i32_0 = arith.constant 0 : i32
    %c0_i32_1 = arith.constant 0 : i32
    return %c0_i32, %c0_i32_0 : i32, i32
  }
  func.func @transform_2(%arg0: i32) -> (i32, i32) {
    %c0_i32 = arith.constant 0 : i32
    %c0_i32_0 = arith.constant 0 : i32
    %c0_i32_1 = arith.constant 0 : i32
    return %c0_i32, %c0_i32_0 : i32, i32
  }
  func.func @transform_3(%arg0: i32) -> (i32, i32) {
    %c0_i32 = arith.constant 0 : i32
    %c0_i32_0 = arith.constant 0 : i32
    %c0_i32_1 = arith.constant 0 : i32
    return %c0_i32, %c0_i32_0 : i32, i32
  }
  func.func @transform_4(%arg0: i32) -> (i32, i32) {
    %c0_i32 = arith.constant 0 : i32
    %c0_i32_0 = arith.constant 0 : i32
    %c0_i32_1 = arith.constant 0 : i32
    return %c0_i32, %c0_i32_0 : i32, i32
  }
  func.func @transform_5(%arg0: i32) -> (i32, i32) {
    %c0_i32 = arith.constant 0 : i32
    %c0_i32_0 = arith.constant 0 : i32
    %c0_i32_1 = arith.constant 0 : i32
    return %c0_i32, %c0_i32_0 : i32, i32
  }
  func.func @transform_6(%arg0: i32) -> (i32, i32) {
    %c0_i32 = arith.constant 0 : i32
    %c0_i32_0 = arith.constant 0 : i32
    %c0_i32_1 = arith.constant 0 : i32
    return %c0_i32, %c0_i32_0 : i32, i32
  }
  func.func @transform_7(%arg0: i32) -> (i32, i32) {
    %c0_i32 = arith.constant 0 : i32
    %c0_i32_0 = arith.constant 0 : i32
    %c0_i32_1 = arith.constant 0 : i32
    return %c0_i32, %c0_i32_0 : i32, i32
  }
  func.func @transform_8(%arg0: i32) -> (i32, i32) {
    %c0_i32 = arith.constant 0 : i32
    %c0_i32_0 = arith.constant 0 : i32
    %c0_i32_1 = arith.constant 0 : i32
    return %c0_i32, %c0_i32_0 : i32, i32
  }
  func.func @transform_9(%arg0: i32) -> (i32, i32) {
    %c0_i32 = arith.constant 0 : i32
    %c0_i32_0 = arith.constant 0 : i32
    %c0_i32_1 = arith.constant 0 : i32
    return %c0_i32, %c0_i32_0 : i32, i32
  }
  func.func @transform_10(%arg0: i32) -> (i32, i32) {
    %c0_i32 = arith.constant 0 : i32
    %c0_i32_0 = arith.constant 0 : i32
    %c0_i32_1 = arith.constant 0 : i32
    return %c0_i32, %c0_i32_0 : i32, i32
  }
  func.func @transform_11(%arg0: i32) -> (i32, i32) {
    %c0_i32 = arith.constant 0 : i32
    %c0_i32_0 = arith.constant 0 : i32
    return %arg0, %c0_i32 : i32, i32
  }
}

</mosaic_0001>

<bundles_post_ra>
// kernel: tpu_custom_call.1
= control target key start
LH: loop header
LB: loop body
LE: loop exit
PB: predicated region body
PF: predicated region fallthrough
CT: control target
= control target key end

     0   :  { %16 = vsyncpa [#allocation3], 0  ;;  %s10666_s0 = inlined_call_operand.hbm [shape: f32[8,200], index: 0, kind: input, shape index: {}]   ;;  %s10667_s1 = inlined_call_operand.hbm [shape: bf16[200,3072], index: 1, kind: input, shape index: {}]   ;;  %s10668_s2 = inlined_call_operand.hbm [shape: f32[1,3072], index: 2, kind: input, shape index: {}]   ;;  %s10669_s3 = inlined_call_operand.hbm [shape: bf16[1024,1152], index: 3, kind: input, shape index: {}]   ;;  %s10670_s4 = inlined_call_operand.hbm [shape: f32[1,1152], index: 4, kind: input, shape index: {}]   ;;  %s10671_s5 = inlined_call_operand.hbm [shape: bf16[384,256], index: 5, kind: input, shape index: {}]   ;;  %s10672_s6 = inlined_call_operand.hbm [shape: f32[1,256], index: 6, kind: input, shape index: {}]   ;;  %s10673_s7 = inlined_call_operand.hbm [shape: bf16[256,128], index: 7, kind: input, shape index: {}]   ;;  %s10674_s8 = inlined_call_operand.hbm [shape: f32[1,128], index: 8, kind: input, shape index: {}]   ;;  %s10675_s9 = inlined_call_operand.hbm [shape: bf16[128,128], index: 9, kind: input, shape index: {}]   ;;  %s10676_s10 = inlined_call_operand.hbm [shape: f32[1,128], index: 10, kind: input, shape index: {}]   ;;  %s10677_s11 = inlined_call_operand.hbm [shape: f32[8,128], index: 11, kind: output, shape index: {}]  }
   0x1   :  { %17 = vsyncpa [#allocation6], 0 }
   0x2   :  { %18 = vsyncpa [#allocation9], 0 }
   0x3   :  { %19 = vsyncpa [#allocation12], 0 }
   0x4   :  { %20 = vsyncpa [#allocation15], 0 }
   0x5   :  { %21 = vsyncpa [#allocation18], 0 }
   0x6   :  { %22 = vsyncpa [#allocation4], 0  ;;  %s10241_s17 = smov [#allocation5]  }
   0x7   :  { %s38_s18 = sshll.u32 %s10241_s17, 4  ;;  %s39_s18 = int_to_ptr.vmem [resolvable:$true] %s38_s18 }
   0x8   :  { %s9995_s19 = scalar_lea.vmem %s39_s18, 38400  ;;  %p10000_p1 = scmp.lt.s32.totalorder %s39_s18, %s39_s18 }
   0x9   :  { %p9996_p0 = scmp.ne.s32.totalorder %s39_s18, %s9995_s19  ;;  %p10001_p2 = scmp.lt.s32.totalorder %s9995_s19, %s9995_s19 }
   0xb   :  { %p10002_p3 = por %p10001_p2, %p10000_p1 }
   0xd   :  { %p10003_p4 = pnand %p10002_p3, %p9996_p0 }
   0xf   :  { %10006 = shalt.err (!%p10003_p4)
}
  0x10   :  { %s10242_s20 = smov 1536   ;;  %s10243_s21 = smov 96  }
  0x11   :  { %44 = dma.hbm_to_vmem [thread:$0]  %s10667_s1, 38400, %s39_s18, [#allocation6], %s10242_s20, %s10242_s20, %s10243_s21  }
  0x12   :  { %s10244_s24 = smov [#allocation8]  }
  0x13   :  { %s60_s25 = sshll.u32 %s10244_s24, 4  ;;  %s61_s25 = int_to_ptr.vmem [resolvable:$true] %s60_s25 }
  0x14   :  { %s10015_s26 = scalar_lea.vmem %s61_s25, 73728  ;;  %p10020_p6 = scmp.lt.s32.totalorder %s61_s25, %s61_s25 }
  0x15   :  { %p10016_p5 = scmp.ne.s32.totalorder %s61_s25, %s10015_s26  ;;  %p10021_p7 = scmp.lt.s32.totalorder %s10015_s26, %s10015_s26 }
  0x17   :  { %p10022_p8 = por %p10021_p7, %p10020_p6 }
  0x19   :  { %p10023_p9 = pnand %p10022_p8, %p10016_p5 }
  0x1b   :  { %10026 = shalt.err (!%p10023_p9)
}
  0x1c   :  { %s10245_s27 = smov 576   ;;  %s10246_s28 = smov 36  }
  0x1d   :  { %66 = dma.hbm_to_vmem [thread:$0]  %s10669_s3, 73728, %s61_s25, [#allocation9], %s10245_s27, %s10245_s27, %s10246_s28  }
  0x1e   :  { %s10247_s12 = smov [#allocation11]  }
  0x1f   :  { %s82_s13 = sshll.u32 %s10247_s12, 4  ;;  %s83_s13 = int_to_ptr.vmem [resolvable:$true] %s82_s13 }
  0x20   :  { %s10035_s1 = scalar_lea.vmem %s83_s13, 6144  ;;  %p10040_p11 = scmp.lt.s32.totalorder %s83_s13, %s83_s13 }
  0x21   :  { %p10036_p10 = scmp.ne.s32.totalorder %s83_s13, %s10035_s1  ;;  %p10041_p12 = scmp.lt.s32.totalorder %s10035_s1, %s10035_s1 }
  0x23   :  { %p10042_p13 = por %p10041_p12, %p10040_p11 }
  0x25   :  { %p10043_p0 = pnand %p10042_p13, %p10036_p10 }
  0x27   :  { %10046 = shalt.err (!%p10043_p0)
}
  0x28   :  { %s10248_s14 = smov 128   ;;  %s10249_s15 = smov 8  }
  0x29   :  { %88 = dma.hbm_to_vmem [thread:$0]  %s10671_s5, 6144, %s83_s13, [#allocation12], %s10248_s14, %s10248_s14, %s10249_s15  }
  0x2a   :  { %s10250_s18 = smov [#allocation14]  }
  0x2b   :  { %s104_s19 = sshll.u32 %s10250_s18, 4  ;;  %s105_s19 = int_to_ptr.vmem [resolvable:$true] %s104_s19 }
  0x2c   :  { %s10055_s3 = scalar_lea.vmem %s105_s19, 2048  ;;  %p10060_p2 = scmp.lt.s32.totalorder %s105_s19, %s105_s19 }
  0x2d   :  { %p10056_p1 = scmp.ne.s32.totalorder %s105_s19, %s10055_s3  ;;  %p10061_p3 = scmp.lt.s32.totalorder %s10055_s3, %s10055_s3 }
  0x2f   :  { %p10062_p4 = por %p10061_p3, %p10060_p2 }
  0x31   :  { %p10063_p5 = pnand %p10062_p4, %p10056_p1 }
  0x33   :  { %10066 = shalt.err (!%p10063_p5)
}
  0x34   :  { %s10251_s20 = smov 64   ;;  %s10252_s21 = smov 4  }
  0x35   :  { %110 = dma.hbm_to_vmem [thread:$0]  %s10673_s7, 2048, %s105_s19, [#allocation15], %s10251_s20, %s10251_s20, %s10252_s21  }
  0x36   :  { %s10253_s24 = smov [#allocation17]   ;;  %s10254_s26 = smov [#allocation2]  }
  0x37   :  { %s126_s25 = sshll.u32 %s10253_s24, 4  ;;  %s29_s5 = sshll.u32 %s10254_s26, 4  ;;  %s127_s25 = int_to_ptr.vmem [resolvable:$true] %s126_s25  ;;  %s30_s5 = int_to_ptr.vmem [resolvable:$true] %s29_s5 }
  0x38   :  { %s10075_s27 = scalar_lea.vmem %s127_s25, 1024  ;;  %p10080_p7 = scmp.lt.s32.totalorder %s127_s25, %s127_s25 }
  0x39   :  { %p10076_p6 = scmp.ne.s32.totalorder %s127_s25, %s10075_s27  ;;  %p10081_p8 = scmp.lt.s32.totalorder %s10075_s27, %s10075_s27 }
  0x3b   :  { %p10082_p9 = por %p10081_p8, %p10080_p7 }
  0x3d   :  { %p10083_p10 = pnand %p10082_p9, %p10076_p6 }
  0x3f   :  { %10086 = shalt.err (!%p10083_p10)
}
  0x40   :  { %132 = dma.hbm_to_vmem [thread:$0]  %s10675_s9, 1024, %s127_s25, [#allocation18], %s10251_s20, %s10251_s20, %s10252_s21  }
  0x41   :  { %s10095_s30 = scalar_lea.vmem %s30_s5, 256  ;;  %p10100_p12 = scmp.lt.s32.totalorder %s30_s5, %s30_s5 }
  0x42   :  { %p10096_p11 = scmp.ne.s32.totalorder %s30_s5, %s10095_s30  ;;  %p10101_p13 = scmp.lt.s32.totalorder %s10095_s30, %s10095_s30 }
  0x44   :  { %p10102_p0 = por %p10101_p13, %p10100_p12 }
  0x46   :  { %p10103_p1 = pnand %p10102_p0, %p10096_p11 }
  0x48   :  { %10106 = shalt.err (!%p10103_p1)
}
  0x49   :  { %32 = dma.hbm_to_vmem [thread:$0]  %s10666_s0, 256, %s30_s5, [#allocation3]  }
  0x4a   :  { %s10255_s13 = smov [#allocation7]   ;;  %s10256_s14 = smov [#allocation10]  }
  0x4b   :  { %s51_s1 = sshll.u32 %s10255_s13, 4  ;;  %s73_s15 = sshll.u32 %s10256_s14, 4  ;;  %s52_s1 = int_to_ptr.vmem [resolvable:$true] %s51_s1  ;;  %s74_s15 = int_to_ptr.vmem [resolvable:$true] %s73_s15 }
  0x4c   :  { %s10115_s16 = scalar_lea.vmem %s52_s1, 384  ;;  %p10120_p3 = scmp.lt.s32.totalorder %s52_s1, %s52_s1 }
  0x4d   :  { %p10116_p2 = scmp.ne.s32.totalorder %s52_s1, %s10115_s16  ;;  %p10121_p4 = scmp.lt.s32.totalorder %s10115_s16, %s10115_s16 }
  0x4f   :  { %p10122_p5 = por %p10121_p4, %p10120_p3 }
  0x51   :  { %p10123_p6 = pnand %p10122_p5, %p10116_p2 }
  0x53   :  { %10126 = shalt.err (!%p10123_p6)
}
  0x54   :  { %54 = dma.hbm_to_vmem [thread:$0]  %s10668_s2, 384, %s52_s1, [#allocation6]  }
  0x55   :  { %s10135_s18 = scalar_lea.vmem %s74_s15, 144  ;;  %s10139_s0 = scalar_lea.vmem %s74_s15, 160 }
  0x56   :  { %p10136_p7 = scmp.ne.s32.totalorder %s74_s15, %s10135_s18  ;;  %p10140_p8 = scmp.lt.s32.totalorder %s74_s15, %s74_s15 }
  0x57   :  { %p10141_p9 = scmp.lt.s32.totalorder %s10139_s0, %s10135_s18 }
  0x59   :  { %p10142_p10 = por %p10141_p9, %p10140_p8 }
  0x5b   :  { %p10143_p11 = pnand %p10142_p10, %p10136_p7 }
  0x5d   :  { %10146 = shalt.err (!%p10143_p11)
}
  0x5e   :  { %76 = dma.hbm_to_vmem [thread:$0]  %s10670_s4, 144, %s74_s15, [#allocation9]  }
  0x5f   :  { %s10257_s20 = smov [#allocation13]   ;;  %s10258_s22 = smov [#allocation16]  }
  0x60   :  { %s95_s21 = sshll.u32 %s10257_s20, 4  ;;  %s117_s23 = sshll.u32 %s10258_s22, 4  ;;  %s96_s21 = int_to_ptr.vmem [resolvable:$true] %s95_s21  ;;  %s118_s23 = int_to_ptr.vmem [resolvable:$true] %s117_s23 }
  0x61   :  { %s10155_s24 = scalar_lea.vmem %s96_s21, 32  ;;  %p10160_p13 = scmp.lt.s32.totalorder %s96_s21, %s96_s21 }
  0x62   :  { %p10156_p12 = scmp.ne.s32.totalorder %s96_s21, %s10155_s24  ;;  %p10161_p0 = scmp.lt.s32.totalorder %s10155_s24, %s10155_s24 }
  0x64   :  { %p10162_p1 = por %p10161_p0, %p10160_p13 }
  0x66   :  { %p10163_p2 = pnand %p10162_p1, %p10156_p12 }
  0x68   :  { %10166 = shalt.err (!%p10163_p2)
}
  0x69   :  { %98 = dma.hbm_to_vmem [thread:$0]  %s10672_s6, 32, %s96_s21, [#allocation12]  }
  0x6a   :  { %s10175_s26 = scalar_lea.vmem %s118_s23, 16  ;;  %s10179_s4 = scalar_lea.vmem %s118_s23, 32 }
  0x6b   :  { %p10176_p3 = scmp.ne.s32.totalorder %s118_s23, %s10175_s26  ;;  %p10180_p4 = scmp.lt.s32.totalorder %s118_s23, %s118_s23 }
  0x6c   :  { %p10181_p5 = scmp.lt.s32.totalorder %s10179_s4, %s10175_s26 }
  0x6e   :  { %p10182_p6 = por %p10181_p5, %p10180_p4 }
  0x70   :  { %p10183_p7 = pnand %p10182_p6, %p10176_p3 }
  0x72   :  { %10186 = shalt.err (!%p10183_p7)
}
  0x73   :  { %120 = dma.hbm_to_vmem [thread:$0]  %s10674_s8, 16, %s118_s23, [#allocation15]  }
  0x74   :  { %s10259_s28 = smov [#allocation19]  }
  0x75   :  { %s139_s29 = sshll.u32 %s10259_s28, 4  ;;  %s140_s29 = int_to_ptr.vmem [resolvable:$true] %s139_s29 }
  0x76   :  { %s10195_s30 = scalar_lea.vmem %s140_s29, 16  ;;  %s10199_s7 = scalar_lea.vmem %s140_s29, 32 }
  0x77   :  { %p10196_p8 = scmp.ne.s32.totalorder %s140_s29, %s10195_s30  ;;  %p10200_p9 = scmp.lt.s32.totalorder %s140_s29, %s140_s29 }
  0x78   :  { %p10201_p10 = scmp.lt.s32.totalorder %s10199_s7, %s10195_s30 }
  0x7a   :  { %p10202_p11 = por %p10201_p10, %p10200_p9 }
  0x7c   :  { %p10203_p12 = pnand %p10202_p11, %p10196_p8 }
  0x7e   :  { %10206 = shalt.err (!%p10203_p12)
}
  0x7f   :  { %142 = dma.hbm_to_vmem [thread:$0]  %s10676_s10, 16, %s140_s29, [#allocation18]  }
  0x80   :  { %10227 = dma.done.wait [#allocation3], 256  }
  0x81   :  { %10228 = vsyncadd [#allocation3], 4294967040 }
  0x82   :  { %10229 = dma.done.wait [#allocation6], 38784  }
  0x83   :  { %10230 = vsyncadd [#allocation6], 4294928512 }
  0x84   :  { %10231 = dma.done.wait [#allocation9], 73872  }
  0x85   :  { %10232 = vsyncadd [#allocation9], 4294893424 }
  0x86   :  { %10233 = dma.done.wait [#allocation12], 6176  }
  0x87   :  { %10234 = vsyncadd [#allocation12], 4294961120 }
  0x88   :  { %10235 = dma.done.wait [#allocation15], 2064  }
  0x89   :  { %10236 = vsyncadd [#allocation15], 4294965232 }
  0x8a   :  { %10237 = dma.done.wait [#allocation18], 1040  }
  0x8b   :  { %10238 = vsyncadd [#allocation18], 4294966256  ;;  %v349_v0 = vld [vmem:[#allocation5 + $0x540] sm:$0xff]  ;;  %v350_v2 = vld [vmem:[#allocation5 + $0x548] sm:$0xff]  ;;  %vm2107_vm0 = vcmask 588800   ;;  %vm2111_vm1 = vcmask 1043456  }
  0x8c   :  { %v361_v1 = vld [vmem:[#allocation5 + $0x5a0] sm:$0xff]  ;;  %v362_v4 = vld [vmem:[#allocation5 + $0x5a8] sm:$0xff]  ;;  %v178_v43 = vld [vmem:[#allocation2 + $0x8] sm:$0xff]  ;;  %vm10262_vm2 = vmmov 0   ;;  %s10263_s8 = smov [#allocation20]  }
  0x8d   :  { %v8054_v3 = vcombine.high %v349_v0, %v361_v1  ;;  %v8053_v5 = vcombine.low %v349_v0, %v361_v1  ;;  %v325_v6 = vld [vmem:[#allocation5 + $0x480] sm:$0xff]  ;;  %v8056_v8 = vcombine.high %v350_v2, %v362_v4  ;;  %v8055_v9 = vcombine.low %v350_v2, %v362_v4  ;;  %v326_v11 = vld [vmem:[#allocation5 + $0x488] sm:$0xff]  ;;  %s7871_s10 = sshll.u32 %s10263_s8, 4  ;;  %s7872_s10 = int_to_ptr.vmem [resolvable:$true] %s7871_s10 }
  0x8e   :  { %v337_v7 = vld [vmem:[#allocation5 + $0x4e0] sm:$0xff]  ;;  %v338_v12 = vld [vmem:[#allocation5 + $0x4e8] sm:$0xff]  ;;  %v10357_v46 = vpack.c.bf16 %v178_v43, %v178_v43  ;;  %v364_v43 = vld [vmem:[#allocation5 + $0x5b8] sm:$0xff]  ;;  %s10207_s13 = scalar_lea.vmem %s7872_s10, 128  ;;  %p10212_p0 = scmp.lt.s32.totalorder %s7872_s10, %s7872_s10 }
  0x8f   :  { %v8030_v10 = vcombine.high %v325_v6, %v337_v7  ;;  %v301_v13 = vld [vmem:[#allocation5 + $0x3c0] sm:$0xff]  ;;  %2184 = vmatprep.subr.bf16.mxu0 %v8054_v3  ;;  %v8032_v14 = vcombine.high %v326_v11, %v338_v12  ;;  %v302_v16 = vld [vmem:[#allocation5 + $0x3c8] sm:$0xff]  ;;  %2225 = vmatprep.subr.bf16.mxu1 %v8056_v8  ;;  %v8029_v18 = vcombine.low %v325_v6, %v337_v7  ;;  %p10208_p13 = scmp.ne.s32.totalorder %s7872_s10, %s10207_s13  ;;  %p10213_p1 = scmp.lt.s32.totalorder %s10207_s13, %s10207_s13 }
  0x90   :  { %v313_v15 = vld [vmem:[#allocation5 + $0x420] sm:$0xff]  ;;  %v314_v17 = vld [vmem:[#allocation5 + $0x428] sm:$0xff]  ;;  %2185 = vmatpush1.bf16.msra.mxu0 %v8053_v5  ;;  %2226 = vmatpush1.bf16.msra.mxu1 %v8055_v9  ;;  %v8031_v19 = vcombine.low %v326_v11, %v338_v12 }
  0x91   :  { %2186 = vmatprep.subr.bf16.mxu0 %v8030_v10  ;;  %v8006_v20 = vcombine.high %v301_v13, %v313_v15  ;;  %2227 = vmatprep.subr.bf16.mxu1 %v8032_v14  ;;  %v8008_v21 = vcombine.high %v302_v16, %v314_v17  ;;  %v277_v22 = vld [vmem:[#allocation5 + $0x300] sm:$0xff]  ;;  %v278_v24 = vld [vmem:[#allocation5 + $0x308] sm:$0xff]  ;;  %v8005_v26 = vcombine.low %v301_v13, %v313_v15  ;;  %p10214_p2 = por %p10213_p1, %p10212_p0 }
  0x92   :  { %v289_v23 = vld [vmem:[#allocation5 + $0x360] sm:$0xff]  ;;  %v290_v25 = vld [vmem:[#allocation5 + $0x368] sm:$0xff]  ;;  %v8007_v27 = vcombine.low %v302_v16, %v314_v17  ;;  %8198 = vmatprep.mubr.msk.bf16.mxu0 %vm2107_vm0, %v10357_v46  ;;  %8200 = vmatprep.mubr.msk.bf16.mxu1 %vm2107_vm0, %v10357_v46 }
  0x93   :  { %v7982_v28 = vcombine.high %v277_v22, %v289_v23  ;;  %v7984_v29 = vcombine.high %v278_v24, %v290_v25  ;;  %v253_v30 = vld [vmem:[#allocation5 + $0x240] sm:$0xff]  ;;  %v254_v32 = vld [vmem:[#allocation5 + $0x248] sm:$0xff]  ;;  %v7981_v34 = vcombine.low %v277_v22, %v289_v23  ;;  %v7983_v35 = vcombine.low %v278_v24, %v290_v25  ;;  %p10215_p3 = pnand %p10214_p2, %p10208_p13 }
  0x94   :  { %2187 = vmatpush1.bf16.msra.mxu0 %v8029_v18  ;;  %2228 = vmatpush1.bf16.msra.mxu1 %v8031_v19  ;;  %v265_v31 = vld [vmem:[#allocation5 + $0x2a0] sm:$0xff]  ;;  %v266_v33 = vld [vmem:[#allocation5 + $0x2a8] sm:$0xff] }
  0x95   :  { %2188 = vmatprep.subr.bf16.mxu0 %v8006_v20  ;;  %2229 = vmatprep.subr.bf16.mxu1 %v8008_v21  ;;  %v7958_v36 = vcombine.high %v253_v30, %v265_v31  ;;  %v7960_v37 = vcombine.high %v254_v32, %v266_v33  ;;  %v229_v38 = vld [vmem:[#allocation5 + $0x180] sm:$0xff]  ;;  %v230_v40 = vld [vmem:[#allocation5 + $0x188] sm:$0xff]  ;;  %v7957_v42 = vcombine.low %v253_v30, %v265_v31 }
  0x96   :  { %v241_v39 = vld [vmem:[#allocation5 + $0x1e0] sm:$0xff]  ;;  %v242_v41 = vld [vmem:[#allocation5 + $0x1e8] sm:$0xff]  ;;  %v7959_v44 = vcombine.low %v254_v32, %v266_v33 }
  0x97   :  { %v7934_v45 = vcombine.high %v229_v38, %v241_v39  ;;  %v7936_v47 = vcombine.high %v230_v40, %v242_v41  ;;  %v205_v48 = vld [vmem:[#allocation5 + $0xc0] sm:$0xff]  ;;  %v206_v50 = vld [vmem:[#allocation5 + $0xc8] sm:$0xff]  ;;  %v7933_v52 = vcombine.low %v229_v38, %v241_v39  ;;  %v7935_v53 = vcombine.low %v230_v40, %v242_v41  ;;  %v351_v40 = vld [vmem:[#allocation5 + $0x550] sm:$0xff] }
  0x98   :  { %2189 = vmatpush1.bf16.msra.mxu0 %v8005_v26  ;;  %2230 = vmatpush1.bf16.msra.mxu1 %v8007_v27  ;;  %v217_v49 = vld [vmem:[#allocation5 + $0x120] sm:$0xff]  ;;  %v218_v51 = vld [vmem:[#allocation5 + $0x128] sm:$0xff]  ;;  %v363_v41 = vld [vmem:[#allocation5 + $0x5b0] sm:$0xff] }
  0x99   :  { %2190 = vmatprep.subr.bf16.mxu0 %v7982_v28  ;;  %2231 = vmatprep.subr.bf16.mxu1 %v7984_v29  ;;  %v7910_v54 = vcombine.high %v205_v48, %v217_v49  ;;  %v7912_v55 = vcombine.high %v206_v50, %v218_v51  ;;  %v181_v56 = vld [vmem:[#allocation5] sm:$0xff]  ;;  %v182_v58 = vld [vmem:[#allocation5 + $0x8] sm:$0xff]  ;;  %v7909_v60 = vcombine.low %v205_v48, %v217_v49 }
  0x9a   :  { %v193_v57 = vld [vmem:[#allocation5 + $0x60] sm:$0xff]  ;;  %v194_v59 = vld [vmem:[#allocation5 + $0x68] sm:$0xff]  ;;  %v7911_v61 = vcombine.low %v206_v50, %v218_v51  ;;  %v8058_v48 = vcombine.high %v351_v40, %v363_v41  ;;  %v327_v50 = vld [vmem:[#allocation5 + $0x490] sm:$0xff] }
  0x9b   :  { %v7886_v62 = vcombine.high %v181_v56, %v193_v57  ;;  %v7888_v63 = vcombine.high %v182_v58, %v194_v59  ;;  %v469_v0 = vld [vmem:[#allocation5 + $0x900] sm:$0xff]  ;;  %v470_v1 = vld [vmem:[#allocation5 + $0x908] sm:$0xff]  ;;  %v7885_v2 = vcombine.low %v181_v56, %v193_v57  ;;  %v7887_v3 = vcombine.low %v182_v58, %v194_v59  ;;  %v339_v51 = vld [vmem:[#allocation5 + $0x4f0] sm:$0xff] }
  0x9c   :  { %2191 = vmatpush1.bf16.msra.mxu0 %v7981_v34  ;;  %2232 = vmatpush1.bf16.msra.mxu1 %v7983_v35  ;;  %v8174_v4 = vcombine.high %v469_v0, %v469_v0  ;;  %v8173_v5 = vcombine.low %v469_v0, %v469_v0  ;;  %v8176_v6 = vcombine.high %v470_v1, %v470_v1  ;;  %v445_v8 = vld [vmem:[#allocation5 + $0x840] sm:$0xff]  ;;  %v446_v10 = vld [vmem:[#allocation5 + $0x848] sm:$0xff]  ;;  %v303_v59 = vld [vmem:[#allocation5 + $0x3d0] sm:$0xff] }
  0x9d   :  { %2192 = vmatprep.subr.bf16.mxu0 %v7958_v36  ;;  %2233 = vmatprep.subr.bf16.mxu1 %v7960_v37  ;;  %v8175_v7 = vcombine.low %v470_v1, %v470_v1  ;;  %v457_v9 = vld [vmem:[#allocation5 + $0x8a0] sm:$0xff]  ;;  %v458_v11 = vld [vmem:[#allocation5 + $0x8a8] sm:$0xff]  ;;  %v8034_v57 = vcombine.high %v327_v50, %v339_v51 }
  0x9e   :  { %v2113_v12 = vsel %vm2111_vm1, %v8173_v5, 0  ;;  %v8150_v13 = vcombine.high %v445_v8, %v457_v9  ;;  %v8152_v15 = vcombine.high %v446_v10, %v458_v11  ;;  %v421_v16 = vld [vmem:[#allocation5 + $0x780] sm:$0xff]  ;;  %v422_v18 = vld [vmem:[#allocation5 + $0x788] sm:$0xff]  ;;  %v8149_v20 = vcombine.low %v445_v8, %v457_v9  ;;  %v280_v5 = vld [vmem:[#allocation5 + $0x318] sm:$0xff] }
  0x9f   :  { %v2119_v14 = vsel %vm2111_vm1, %v8175_v7, 0  ;;  %v433_v17 = vld [vmem:[#allocation5 + $0x7e0] sm:$0xff]  ;;  %v434_v19 = vld [vmem:[#allocation5 + $0x7e8] sm:$0xff]  ;;  %v8151_v21 = vcombine.low %v446_v10, %v458_v11  ;;  %v255_v8 = vld [vmem:[#allocation5 + $0x250] sm:$0xff] }
  0xa0   :  { %2193 = vmatpush1.bf16.msra.mxu0 %v7957_v42  ;;  %2234 = vmatpush1.bf16.msra.mxu1 %v7959_v44  ;;  %v8126_v22 = vcombine.high %v421_v16, %v433_v17  ;;  %v8128_v23 = vcombine.high %v422_v18, %v434_v19  ;;  %v397_v24 = vld [vmem:[#allocation5 + $0x6c0] sm:$0xff]  ;;  %v398_v26 = vld [vmem:[#allocation5 + $0x6c8] sm:$0xff]  ;;  %v8125_v28 = vcombine.low %v421_v16, %v433_v17  ;;  %v352_v42 = vld [vmem:[#allocation5 + $0x558] sm:$0xff] }
  0xa1   :  { %2194 = vmatprep.subr.bf16.mxu0 %v7934_v45  ;;  %2235 = vmatprep.subr.bf16.mxu1 %v7936_v47  ;;  %v409_v25 = vld [vmem:[#allocation5 + $0x720] sm:$0xff]  ;;  %v410_v27 = vld [vmem:[#allocation5 + $0x728] sm:$0xff]  ;;  %v8127_v29 = vcombine.low %v422_v18, %v434_v19  ;;  %v177_v45 = vld [vmem:[#allocation2] sm:$0xff]  ;;  %v8060_v49 = vcombine.high %v352_v42, %v364_v43  ;;  %v8059_v56 = vcombine.low %v352_v42, %v364_v43 }
  0xa2   :  { %v8102_v30 = vcombine.high %v397_v24, %v409_v25  ;;  %v8104_v31 = vcombine.high %v398_v26, %v410_v27  ;;  %v373_v32 = vld [vmem:[#allocation5 + $0x600] sm:$0xff]  ;;  %v374_v34 = vld [vmem:[#allocation5 + $0x608] sm:$0xff]  ;;  %v8101_v36 = vcombine.low %v397_v24, %v409_v25  ;;  %v8103_v37 = vcombine.low %v398_v26, %v410_v27  ;;  %v267_v11 = vld [vmem:[#allocation5 + $0x2b0] sm:$0xff] }
  0xa3   :  { %v385_v33 = vld [vmem:[#allocation5 + $0x660] sm:$0xff]  ;;  %v386_v35 = vld [vmem:[#allocation5 + $0x668] sm:$0xff]  ;;  %v7962_v17 = vcombine.high %v255_v8, %v267_v11  ;;  %v231_v18 = vld [vmem:[#allocation5 + $0x190] sm:$0xff] }
  0xa4   :  { %2195 = vmatpush1.bf16.msra.mxu0 %v7933_v52  ;;  %2236 = vmatpush1.bf16.msra.mxu1 %v7935_v53  ;;  %v8078_v38 = vcombine.high %v373_v32, %v385_v33  ;;  %v8080_v39 = vcombine.high %v374_v34, %v386_v35  ;;  %v8077_v44 = vcombine.low %v373_v32, %v385_v33  ;;  %v328_v53 = vld [vmem:[#allocation5 + $0x498] sm:$0xff]  ;;  %v243_v19 = vld [vmem:[#allocation5 + $0x1f0] sm:$0xff] }
  0xa5   :  { %2196 = vmatprep.subr.bf16.mxu0 %v7910_v54  ;;  %2237 = vmatprep.subr.bf16.mxu1 %v7912_v55  ;;  %v8079_v47 = vcombine.low %v374_v34, %v386_v35  ;;  %v10367_v52 = vpack.c.bf16 %v177_v45, %v177_v45  ;;  %v340_v54 = vld [vmem:[#allocation5 + $0x4f8] sm:$0xff]  ;;  %v8057_v55 = vcombine.low %v351_v40, %v363_v41  ;;  %v207_v26 = vld [vmem:[#allocation5 + $0xd0] sm:$0xff] }
  0xa6   :  { %v8036_v58 = vcombine.high %v328_v53, %v340_v54  ;;  %v8035_v0 = vcombine.low %v328_v53, %v340_v54  ;;  %v7938_v25 = vcombine.high %v231_v18, %v243_v19  ;;  %v219_v27 = vld [vmem:[#allocation5 + $0x130] sm:$0xff]  ;;  %v448_v53 = vld [vmem:[#allocation5 + $0x858] sm:$0xff] }
  0xa7   :  { %v7914_v33 = vcombine.high %v207_v26, %v219_v27  ;;  %v183_v34 = vld [vmem:[#allocation5 + $0x10] sm:$0xff] }
  0xa8   :  { %2197 = vmatpush1.bf16.msra.mxu0 %v7909_v60  ;;  %2238 = vmatpush1.bf16.msra.mxu1 %v7911_v61  ;;  %v315_v60 = vld [vmem:[#allocation5 + $0x430] sm:$0xff]  ;;  %v304_v61 = vld [vmem:[#allocation5 + $0x3d8] sm:$0xff] }
  0xa9   :  { %2198 = vmatprep.subr.bf16.mxu0 %v7886_v62  ;;  %2239 = vmatprep.subr.bf16.mxu1 %v7888_v63  ;;  %v316_v62 = vld [vmem:[#allocation5 + $0x438] sm:$0xff]  ;;  %v8033_v63 = vcombine.low %v327_v50, %v339_v51  ;;  %v8010_v1 = vcombine.high %v303_v59, %v315_v60  ;;  %v8009_v7 = vcombine.low %v303_v59, %v315_v60  ;;  %v195_v35 = vld [vmem:[#allocation5 + $0x70] sm:$0xff] }
  0xaa   :  { %v8011_v9 = vcombine.low %v304_v61, %v316_v62  ;;  %v7890_v41 = vcombine.high %v183_v34, %v195_v35  ;;  %v471_v42 = vld [vmem:[#allocation5 + $0x910] sm:$0xff]  ;;  %v7889_v45 = vcombine.low %v183_v34, %v195_v35 }
  0xab   :  { %v447_v50 = vld [vmem:[#allocation5 + $0x850] sm:$0xff] }
  0xac   :  { %2199 = vmatpush1.bf16.msra.mxu0 %v7885_v2  ;;  %2240 = vmatpush1.bf16.msra.mxu1 %v7887_v3  ;;  %v8012_v2 = vcombine.high %v304_v61, %v316_v62  ;;  %v279_v3 = vld [vmem:[#allocation5 + $0x310] sm:$0xff]  ;;  %v424_v61 = vld [vmem:[#allocation5 + $0x798] sm:$0xff] }
  0xad   :  { %8197 = vmatprep.subr.msk.bf16.mxu0 %vm2111_vm1, %v8174_v4  ;;  %8199 = vmatprep.subr.msk.bf16.mxu1 %vm2111_vm1, %v8176_v6  ;;  %v291_v4 = vld [vmem:[#allocation5 + $0x370] sm:$0xff]  ;;  %v292_v6 = vld [vmem:[#allocation5 + $0x378] sm:$0xff] }
  0xae   :  { %v7986_v10 = vcombine.high %v279_v3, %v291_v4  ;;  %v7987_v16 = vcombine.low %v280_v5, %v292_v6  ;;  %v459_v51 = vld [vmem:[#allocation5 + $0x8b0] sm:$0xff] }
  0xaf   :  { %v423_v59 = vld [vmem:[#allocation5 + $0x790] sm:$0xff] }
  0xb0   :  { %2207 = vmatpush2.bf16.msra.mxu0 %v2113_v12  ;;  %2248 = vmatpush2.bf16.msra.mxu1 %v2119_v14  ;;  %v256_v12 = vld [vmem:[#allocation5 + $0x258] sm:$0xff]  ;;  %v7988_v14 = vcombine.high %v280_v5, %v292_v6  ;;  %v435_v60 = vld [vmem:[#allocation5 + $0x7f0] sm:$0xff] }
  0xb1   :  { %2208 = vmatprep.subr.bf16.mxu0 %v8150_v13  ;;  %2249 = vmatprep.subr.bf16.mxu1 %v8152_v15  ;;  %v268_v13 = vld [vmem:[#allocation5 + $0x2b8] sm:$0xff]  ;;  %v7985_v15 = vcombine.low %v279_v3, %v291_v4  ;;  %v8130_v3 = vcombine.high %v423_v59, %v435_v60  ;;  %v399_v4 = vld [vmem:[#allocation5 + $0x6d0] sm:$0xff] }
  0xb2   :  { %v7963_v24 = vcombine.low %v256_v12, %v268_v13  ;;  %v411_v5 = vld [vmem:[#allocation5 + $0x730] sm:$0xff]  ;;  %v400_v6 = vld [vmem:[#allocation5 + $0x6d8] sm:$0xff] }
  0xb4   :  { %2209 = vmatpush2.bf16.msra.mxu0 %v8149_v20  ;;  %2250 = vmatpush2.bf16.msra.mxu1 %v8151_v21  ;;  %v232_v20 = vld [vmem:[#allocation5 + $0x198] sm:$0xff]  ;;  %v7964_v21 = vcombine.high %v256_v12, %v268_v13  ;;  %v375_v12 = vld [vmem:[#allocation5 + $0x610] sm:$0xff] }
  0xb5   :  { %2210 = vmatprep.subr.bf16.mxu0 %v8126_v22  ;;  %2251 = vmatprep.subr.bf16.mxu1 %v8128_v23  ;;  %v244_v22 = vld [vmem:[#allocation5 + $0x1f8] sm:$0xff]  ;;  %v7961_v23 = vcombine.low %v255_v8, %v267_v11  ;;  %v8106_v11 = vcombine.high %v399_v4, %v411_v5  ;;  %v387_v13 = vld [vmem:[#allocation5 + $0x670] sm:$0xff] }
  0xb6   :  { %v7939_v32 = vcombine.low %v232_v20, %v244_v22  ;;  %v412_v8 = vld [vmem:[#allocation5 + $0x738] sm:$0xff] }
  0xb8   :  { %2211 = vmatpush2.bf16.msra.mxu0 %v8125_v28  ;;  %2252 = vmatpush2.bf16.msra.mxu1 %v8127_v29  ;;  %v208_v28 = vld [vmem:[#allocation5 + $0xd8] sm:$0xff]  ;;  %v7940_v29 = vcombine.high %v232_v20, %v244_v22  ;;  %v353_v20 = vld [vmem:[#allocation5 + $0x560] sm:$0xff]  ;;  %v354_v22 = vld [vmem:[#allocation5 + $0x568] sm:$0xff] }
  0xb9   :  { %2212 = vmatprep.subr.bf16.mxu0 %v8102_v30  ;;  %2253 = vmatprep.subr.bf16.mxu1 %v8104_v31  ;;  %v220_v30 = vld [vmem:[#allocation5 + $0x138] sm:$0xff]  ;;  %v7937_v31 = vcombine.low %v231_v18, %v243_v19  ;;  %v8107_v18 = vcombine.low %v400_v6, %v412_v8  ;;  %v8082_v19 = vcombine.high %v375_v12, %v387_v13 }
  0xba   :  { %v7915_v40 = vcombine.low %v208_v28, %v220_v30 }
  0xbc   :  { %2213 = vmatpush2.bf16.msra.mxu0 %v8101_v36  ;;  %2254 = vmatpush2.bf16.msra.mxu1 %v8103_v37  ;;  %v184_v36 = vld [vmem:[#allocation5 + $0x18] sm:$0xff]  ;;  %v7916_v37 = vcombine.high %v208_v28, %v220_v30  ;;  %v329_v28 = vld [vmem:[#allocation5 + $0x4a0] sm:$0xff]  ;;  %v330_v30 = vld [vmem:[#allocation5 + $0x4a8] sm:$0xff] }
  0xbd   :  { %2214 = vmatprep.subr.bf16.mxu0 %v8078_v38  ;;  %2255 = vmatprep.subr.bf16.mxu1 %v8080_v39  ;;  %v196_v38 = vld [vmem:[#allocation5 + $0x78] sm:$0xff]  ;;  %v7913_v39 = vcombine.low %v207_v26, %v219_v27 }
  0xbe   :  { %v7892_v43 = vcombine.high %v184_v36, %v196_v38 }
  0xc0   :  { %2215 = vmatpush2.bf16.msra.mxu0 %v8077_v44  ;;  %2256 = vmatpush2.bf16.msra.mxu1 %v8079_v47  ;;  %v472_v44 = vld [vmem:[#allocation5 + $0x918] sm:$0xff]  ;;  %v7891_v47 = vcombine.low %v184_v36, %v196_v38  ;;  %v305_v36 = vld [vmem:[#allocation5 + $0x3e0] sm:$0xff]  ;;  %v306_v38 = vld [vmem:[#allocation5 + $0x3e8] sm:$0xff] }
  0xc1   :  { %2266 = vmatprep.subr.bf16.mxu0 %v8058_v48  ;;  %2307 = vmatprep.subr.bf16.mxu1 %v8060_v49  ;;  %v8178_v48 = vcombine.high %v471_v42, %v471_v42  ;;  %v8177_v49 = vcombine.low %v471_v42, %v471_v42  ;;  %v8180_v54 = vcombine.high %v472_v44, %v472_v44 }
  0xc3   :  { %2217 = vmatmul.mubr.bf16.vlgmr.msra.gmra.mxu0 %v10367_v52  ;;  %2258 = vmatmul.mubr.bf16.vlgmr.msra.gmra.mxu1 %v10367_v52 }
  0xc4   :  { %2267 = vmatpush1.bf16.msra.mxu0 %v8057_v55  ;;  %2308 = vmatpush1.bf16.msra.mxu1 %v8059_v56  ;;  %v8179_v55 = vcombine.low %v472_v44, %v472_v44  ;;  %v460_v56 = vld [vmem:[#allocation5 + $0x8b8] sm:$0xff]  ;;  %v281_v44 = vld [vmem:[#allocation5 + $0x320] sm:$0xff] }
  0xc5   :  { %2268 = vmatprep.subr.bf16.mxu0 %v8034_v57  ;;  %2309 = vmatprep.subr.bf16.mxu1 %v8036_v58  ;;  %v2125_v57 = vsel %vm2111_vm1, %v8177_v49, 0  ;;  %v8154_v58 = vcombine.high %v447_v50, %v459_v51  ;;  %v294_v49 = vld [vmem:[#allocation5 + $0x388] sm:$0xff] }
  0xc6   :  { %8202 = vmatprep.mubr.msk.bf16.mxu0 %vm2107_vm0, %v10357_v46  ;;  %8204 = vmatprep.mubr.msk.bf16.mxu1 %vm2107_vm0, %v10357_v46  ;;  %v2131_v62 = vsel %vm2111_vm1, %v8179_v55, 0 }
  0xc8   :  { %2269 = vmatpush1.bf16.msra.mxu0 %v8033_v63  ;;  %2310 = vmatpush1.bf16.msra.mxu1 %v8035_v0  ;;  %v8156_v63 = vcombine.high %v448_v53, %v460_v56  ;;  %v436_v0 = vld [vmem:[#allocation5 + $0x7f8] sm:$0xff] }
  0xc9   :  { %2270 = vmatprep.subr.bf16.mxu0 %v8010_v1  ;;  %2311 = vmatprep.subr.bf16.mxu1 %v8012_v2  ;;  %v8153_v1 = vcombine.low %v447_v50, %v459_v51  ;;  %v8155_v2 = vcombine.low %v448_v53, %v460_v56  ;;  %v257_v51 = vld [vmem:[#allocation5 + $0x260] sm:$0xff]  ;;  %v258_v56 = vld [vmem:[#allocation5 + $0x268] sm:$0xff] }
  0xca   :  { %v269_v53 = vld [vmem:[#allocation5 + $0x2c0] sm:$0xff] }
  0xcc   :  { %2271 = vmatpush1.bf16.msra.mxu0 %v8009_v7  ;;  %2312 = vmatpush1.bf16.msra.mxu1 %v8011_v9  ;;  %v8132_v7 = vcombine.high %v424_v61, %v436_v0  ;;  %v8129_v9 = vcombine.low %v423_v59, %v435_v60 }
  0xcd   :  { %2272 = vmatprep.subr.bf16.mxu0 %v7986_v10  ;;  %2313 = vmatprep.subr.bf16.mxu1 %v7988_v14  ;;  %v8131_v10 = vcombine.low %v424_v61, %v436_v0  ;;  %v376_v14 = vld [vmem:[#allocation5 + $0x618] sm:$0xff]  ;;  %v7966_v61 = vcombine.high %v257_v51, %v269_v53 }
  0xd0   :  { %2273 = vmatpush1.bf16.msra.mxu0 %v7985_v15  ;;  %2314 = vmatpush1.bf16.msra.mxu1 %v7987_v16  ;;  %v8108_v15 = vcombine.high %v400_v6, %v412_v8  ;;  %v388_v16 = vld [vmem:[#allocation5 + $0x678] sm:$0xff]  ;;  %v209_v6 = vld [vmem:[#allocation5 + $0xe0] sm:$0xff]  ;;  %v210_v8 = vld [vmem:[#allocation5 + $0xe8] sm:$0xff] }
  0xd1   :  { %2274 = vmatprep.subr.bf16.mxu0 %v7962_v17  ;;  %2315 = vmatprep.subr.bf16.mxu1 %v7964_v21  ;;  %v8105_v17 = vcombine.low %v399_v4, %v411_v5  ;;  %v365_v21 = vld [vmem:[#allocation5 + $0x5c0] sm:$0xff]  ;;  %v8083_v26 = vcombine.low %v376_v14, %v388_v16 }
  0xd2   :  { %v8062_v27 = vcombine.high %v353_v20, %v365_v21 }
  0xd4   :  { %2275 = vmatpush1.bf16.msra.mxu0 %v7961_v23  ;;  %2316 = vmatpush1.bf16.msra.mxu1 %v7963_v24  ;;  %v8084_v23 = vcombine.high %v376_v14, %v388_v16  ;;  %v366_v24 = vld [vmem:[#allocation5 + $0x5c8] sm:$0xff]  ;;  %v185_v14 = vld [vmem:[#allocation5 + $0x20] sm:$0xff] }
  0xd5   :  { %2276 = vmatprep.subr.bf16.mxu0 %v7938_v25  ;;  %2317 = vmatprep.subr.bf16.mxu1 %v7940_v29  ;;  %v8081_v25 = vcombine.low %v375_v12, %v387_v13  ;;  %v341_v29 = vld [vmem:[#allocation5 + $0x500] sm:$0xff]  ;;  %v8063_v34 = vcombine.low %v354_v22, %v366_v24  ;;  %v186_v16 = vld [vmem:[#allocation5 + $0x28] sm:$0xff] }
  0xd6   :  { %v8038_v35 = vcombine.high %v329_v28, %v341_v29 }
  0xd8   :  { %2277 = vmatpush1.bf16.msra.mxu0 %v7937_v31  ;;  %2318 = vmatpush1.bf16.msra.mxu1 %v7939_v32  ;;  %v8064_v31 = vcombine.high %v354_v22, %v366_v24  ;;  %v342_v32 = vld [vmem:[#allocation5 + $0x508] sm:$0xff]  ;;  %v473_v22 = vld [vmem:[#allocation5 + $0x920] sm:$0xff] }
  0xd9   :  { %2278 = vmatprep.subr.bf16.mxu0 %v7914_v33  ;;  %2319 = vmatprep.subr.bf16.mxu1 %v7916_v37  ;;  %v8061_v33 = vcombine.low %v353_v20, %v365_v21  ;;  %v317_v37 = vld [vmem:[#allocation5 + $0x440] sm:$0xff]  ;;  %v8039_v42 = vcombine.low %v330_v30, %v342_v32  ;;  %v474_v24 = vld [vmem:[#allocation5 + $0x928] sm:$0xff] }
  0xda   :  { %v8013_v50 = vcombine.low %v305_v36, %v317_v37 }
  0xdc   :  { %2279 = vmatpush1.bf16.msra.mxu0 %v7913_v39  ;;  %2320 = vmatpush1.bf16.msra.mxu1 %v7915_v40  ;;  %v8040_v39 = vcombine.high %v330_v30, %v342_v32  ;;  %v318_v40 = vld [vmem:[#allocation5 + $0x448] sm:$0xff]  ;;  %v461_v30 = vld [vmem:[#allocation5 + $0x8c0] sm:$0xff]  ;;  %v8184_v32 = vcombine.high %v474_v24, %v474_v24 }
  0xdd   :  { %2280 = vmatprep.subr.bf16.mxu0 %v7890_v41  ;;  %2321 = vmatprep.subr.bf16.mxu1 %v7892_v43  ;;  %v8037_v41 = vcombine.low %v329_v28, %v341_v29  ;;  %v8014_v43 = vcombine.high %v305_v36, %v317_v37  ;;  %v8181_v28 = vcombine.low %v473_v22, %v473_v22  ;;  %v449_v29 = vld [vmem:[#allocation5 + $0x860] sm:$0xff] }
  0xde   :  { %v8158_v36 = vcombine.high %v449_v29, %v461_v30  ;;  %v425_v37 = vld [vmem:[#allocation5 + $0x7a0] sm:$0xff] }
  0xe0   :  { %2281 = vmatpush1.bf16.msra.mxu0 %v7889_v45  ;;  %2322 = vmatpush1.bf16.msra.mxu1 %v7891_v47  ;;  %v293_v45 = vld [vmem:[#allocation5 + $0x380] sm:$0xff]  ;;  %v282_v47 = vld [vmem:[#allocation5 + $0x328] sm:$0xff] }
  0xe1   :  { %8201 = vmatprep.subr.msk.bf16.mxu0 %vm2111_vm1, %v8178_v48  ;;  %8203 = vmatprep.subr.msk.bf16.mxu1 %vm2111_vm1, %v8180_v54  ;;  %v8016_v48 = vcombine.high %v306_v38, %v318_v40  ;;  %v8015_v54 = vcombine.low %v306_v38, %v318_v40  ;;  %v7990_v55 = vcombine.high %v281_v44, %v293_v45  ;;  %v437_v38 = vld [vmem:[#allocation5 + $0x800] sm:$0xff] }
  0xe2   :  { %v7989_v59 = vcombine.low %v281_v44, %v293_v45  ;;  %v7991_v60 = vcombine.low %v282_v47, %v294_v49  ;;  %v8134_v45 = vcombine.high %v425_v37, %v437_v38 }
  0xe4   :  { %2289 = vmatpush2.bf16.msra.mxu0 %v2125_v57  ;;  %2330 = vmatpush2.bf16.msra.mxu1 %v2131_v62  ;;  %v270_v57 = vld [vmem:[#allocation5 + $0x2c8] sm:$0xff]  ;;  %v233_v62 = vld [vmem:[#allocation5 + $0x1a0] sm:$0xff] }
  0xe5   :  { %2290 = vmatprep.subr.bf16.mxu0 %v8154_v58  ;;  %2331 = vmatprep.subr.bf16.mxu1 %v8156_v63  ;;  %v7992_v58 = vcombine.high %v282_v47, %v294_v49  ;;  %v245_v63 = vld [vmem:[#allocation5 + $0x200] sm:$0xff]  ;;  %v7968_v0 = vcombine.high %v258_v56, %v270_v57  ;;  %v7967_v4 = vcombine.low %v258_v56, %v270_v57  ;;  %v402_v49 = vld [vmem:[#allocation5 + $0x6e8] sm:$0xff] }
  0xe6   :  { %v7942_v5 = vcombine.high %v233_v62, %v245_v63  ;;  %v401_v47 = vld [vmem:[#allocation5 + $0x6e0] sm:$0xff] }
  0xe7   :  { %v377_v56 = vld [vmem:[#allocation5 + $0x620] sm:$0xff] }
  0xe8   :  { %2291 = vmatpush2.bf16.msra.mxu0 %v8153_v1  ;;  %2332 = vmatpush2.bf16.msra.mxu1 %v8155_v2  ;;  %v234_v1 = vld [vmem:[#allocation5 + $0x1a8] sm:$0xff]  ;;  %v389_v57 = vld [vmem:[#allocation5 + $0x680] sm:$0xff] }
  0xe9   :  { %2292 = vmatprep.subr.bf16.mxu0 %v8130_v3  ;;  %2333 = vmatprep.subr.bf16.mxu1 %v8132_v7  ;;  %v246_v2 = vld [vmem:[#allocation5 + $0x208] sm:$0xff]  ;;  %v7965_v3 = vcombine.low %v257_v51, %v269_v53  ;;  %v221_v7 = vld [vmem:[#allocation5 + $0x140] sm:$0xff]  ;;  %v8133_v53 = vcombine.low %v425_v37, %v437_v38 }
  0xea   :  { %v7943_v12 = vcombine.low %v234_v1, %v246_v2  ;;  %v7918_v13 = vcombine.high %v209_v6, %v221_v7  ;;  %v414_v51 = vld [vmem:[#allocation5 + $0x748] sm:$0xff] }
  0xec   :  { %2293 = vmatpush2.bf16.msra.mxu0 %v8129_v9  ;;  %2334 = vmatpush2.bf16.msra.mxu1 %v8131_v10  ;;  %v7944_v9 = vcombine.high %v234_v1, %v246_v2  ;;  %v222_v10 = vld [vmem:[#allocation5 + $0x148] sm:$0xff]  ;;  %v367_v1 = vld [vmem:[#allocation5 + $0x5d0] sm:$0xff]  ;;  %v356_v2 = vld [vmem:[#allocation5 + $0x578] sm:$0xff] }
  0xed   :  { %2294 = vmatprep.subr.bf16.mxu0 %v8106_v11  ;;  %2335 = vmatprep.subr.bf16.mxu1 %v8108_v15  ;;  %v7941_v11 = vcombine.low %v233_v62, %v245_v63  ;;  %v197_v15 = vld [vmem:[#allocation5 + $0x80] sm:$0xff]  ;;  %v7919_v20 = vcombine.low %v210_v8, %v222_v10  ;;  %v8111_v62 = vcombine.low %v402_v49, %v414_v51 }
  0xee   :  { %v7894_v21 = vcombine.high %v185_v14, %v197_v15  ;;  %v8086_v63 = vcombine.high %v377_v56, %v389_v57 }
  0xf0   :  { %2295 = vmatpush2.bf16.msra.mxu0 %v8105_v17  ;;  %2336 = vmatpush2.bf16.msra.mxu1 %v8107_v18  ;;  %v7920_v17 = vcombine.high %v210_v8, %v222_v10  ;;  %v198_v18 = vld [vmem:[#allocation5 + $0x88] sm:$0xff]  ;;  %v331_v8 = vld [vmem:[#allocation5 + $0x4b0] sm:$0xff]  ;;  %v332_v10 = vld [vmem:[#allocation5 + $0x4b8] sm:$0xff] }
  0xf1   :  { %2296 = vmatprep.subr.bf16.mxu0 %v8082_v19  ;;  %2337 = vmatprep.subr.bf16.mxu1 %v8084_v23  ;;  %v7917_v19 = vcombine.low %v209_v6, %v221_v7  ;;  %v7896_v23 = vcombine.high %v186_v16, %v198_v18 }
  0xf4   :  { %2297 = vmatpush2.bf16.msra.mxu0 %v8081_v25  ;;  %2338 = vmatpush2.bf16.msra.mxu1 %v8083_v26  ;;  %v7893_v25 = vcombine.low %v185_v14, %v197_v15  ;;  %v7895_v26 = vcombine.low %v186_v16, %v198_v18  ;;  %v307_v16 = vld [vmem:[#allocation5 + $0x3f0] sm:$0xff]  ;;  %v308_v18 = vld [vmem:[#allocation5 + $0x3f8] sm:$0xff] }
  0xf5   :  { %2348 = vmatprep.subr.bf16.mxu0 %v8062_v27  ;;  %2389 = vmatprep.subr.bf16.mxu1 %v8064_v31  ;;  %v8182_v27 = vcombine.high %v473_v22, %v473_v22  ;;  %v450_v31 = vld [vmem:[#allocation5 + $0x868] sm:$0xff] }
  0xf7   :  { %2299 = vmatmul.mubr.bf16.vlgmr.msra.gmra.mxu0 %v10367_v52  ;;  %2340 = vmatmul.mubr.bf16.vlgmr.msra.gmra.mxu1 %v10367_v52 }
  0xf8   :  { %2349 = vmatpush1.bf16.msra.mxu0 %v8061_v33  ;;  %2390 = vmatpush1.bf16.msra.mxu1 %v8063_v34  ;;  %v8183_v33 = vcombine.low %v474_v24, %v474_v24  ;;  %v462_v34 = vld [vmem:[#allocation5 + $0x8c8] sm:$0xff]  ;;  %v283_v24 = vld [vmem:[#allocation5 + $0x330] sm:$0xff] }
  0xf9   :  { %2350 = vmatprep.subr.bf16.mxu0 %v8038_v35  ;;  %2391 = vmatprep.subr.bf16.mxu1 %v8040_v39  ;;  %v2137_v35 = vsel %vm2111_vm1, %v8181_v28, 0  ;;  %v426_v39 = vld [vmem:[#allocation5 + $0x7a8] sm:$0xff]  ;;  %v8159_v44 = vcombine.low %v450_v31, %v462_v34  ;;  %v296_v28 = vld [vmem:[#allocation5 + $0x398] sm:$0xff] }
  0xfa   :  { %8206 = vmatprep.mubr.msk.bf16.mxu0 %vm2107_vm0, %v10357_v46  ;;  %8208 = vmatprep.mubr.msk.bf16.mxu1 %vm2107_vm0, %v10357_v46  ;;  %v2143_v40 = vsel %vm2111_vm1, %v8183_v33, 0 }
  0xfc   :  { %2351 = vmatpush1.bf16.msra.mxu0 %v8037_v41  ;;  %2392 = vmatpush1.bf16.msra.mxu1 %v8039_v42  ;;  %v8160_v41 = vcombine.high %v450_v31, %v462_v34  ;;  %v438_v42 = vld [vmem:[#allocation5 + $0x808] sm:$0xff]  ;;  %v271_v31 = vld [vmem:[#allocation5 + $0x2d0] sm:$0xff]  ;;  %v260_v34 = vld [vmem:[#allocation5 + $0x278] sm:$0xff] }
  0xfd   :  { %2352 = vmatprep.subr.bf16.mxu0 %v8014_v43  ;;  %2393 = vmatprep.subr.bf16.mxu1 %v8016_v48  ;;  %v8157_v43 = vcombine.low %v449_v29, %v461_v30  ;;  %v413_v48 = vld [vmem:[#allocation5 + $0x740] sm:$0xff]  ;;  %v259_v30 = vld [vmem:[#allocation5 + $0x270] sm:$0xff] }
 0x100   :  { %2353 = vmatpush1.bf16.msra.mxu0 %v8013_v50  ;;  %2394 = vmatpush1.bf16.msra.mxu1 %v8015_v54  ;;  %v8136_v50 = vcombine.high %v426_v39, %v438_v42  ;;  %v8135_v54 = vcombine.low %v426_v39, %v438_v42  ;;  %v7970_v39 = vcombine.high %v259_v30, %v271_v31  ;;  %v236_v42 = vld [vmem:[#allocation5 + $0x1b8] sm:$0xff] }
 0x101   :  { %2354 = vmatprep.subr.bf16.mxu0 %v7990_v55  ;;  %2395 = vmatprep.subr.bf16.mxu1 %v7992_v58  ;;  %v8110_v55 = vcombine.high %v401_v47, %v413_v48  ;;  %v378_v58 = vld [vmem:[#allocation5 + $0x628] sm:$0xff] }
 0x104   :  { %2355 = vmatpush1.bf16.msra.mxu0 %v7989_v59  ;;  %2396 = vmatpush1.bf16.msra.mxu1 %v7991_v60  ;;  %v8112_v59 = vcombine.high %v402_v49, %v414_v51  ;;  %v390_v60 = vld [vmem:[#allocation5 + $0x688] sm:$0xff]  ;;  %v211_v49 = vld [vmem:[#allocation5 + $0xf0] sm:$0xff]  ;;  %v212_v51 = vld [vmem:[#allocation5 + $0xf8] sm:$0xff] }
 0x105   :  { %2356 = vmatprep.subr.bf16.mxu0 %v7966_v61  ;;  %2397 = vmatprep.subr.bf16.mxu1 %v7968_v0  ;;  %v8109_v61 = vcombine.low %v401_v47, %v413_v48  ;;  %v355_v0 = vld [vmem:[#allocation5 + $0x570] sm:$0xff]  ;;  %v8087_v6 = vcombine.low %v378_v58, %v390_v60 }
 0x106   :  { %v8066_v7 = vcombine.high %v355_v0, %v367_v1 }
 0x108   :  { %2357 = vmatpush1.bf16.msra.mxu0 %v7965_v3  ;;  %2398 = vmatpush1.bf16.msra.mxu1 %v7967_v4  ;;  %v8088_v3 = vcombine.high %v378_v58, %v390_v60  ;;  %v368_v4 = vld [vmem:[#allocation5 + $0x5d8] sm:$0xff]  ;;  %v187_v58 = vld [vmem:[#allocation5 + $0x30] sm:$0xff] }
 0x109   :  { %2358 = vmatprep.subr.bf16.mxu0 %v7942_v5  ;;  %2399 = vmatprep.subr.bf16.mxu1 %v7944_v9  ;;  %v8085_v5 = vcombine.low %v377_v56, %v389_v57  ;;  %v343_v9 = vld [vmem:[#allocation5 + $0x510] sm:$0xff]  ;;  %v8067_v14 = vcombine.low %v356_v2, %v368_v4  ;;  %v188_v60 = vld [vmem:[#allocation5 + $0x38] sm:$0xff] }
 0x10a   :  { %v8042_v15 = vcombine.high %v331_v8, %v343_v9 }
 0x10c   :  { %2359 = vmatpush1.bf16.msra.mxu0 %v7941_v11  ;;  %2400 = vmatpush1.bf16.msra.mxu1 %v7943_v12  ;;  %v8068_v11 = vcombine.high %v356_v2, %v368_v4  ;;  %v344_v12 = vld [vmem:[#allocation5 + $0x518] sm:$0xff]  ;;  %v475_v2 = vld [vmem:[#allocation5 + $0x930] sm:$0xff] }
 0x10d   :  { %2360 = vmatprep.subr.bf16.mxu0 %v7918_v13  ;;  %2401 = vmatprep.subr.bf16.mxu1 %v7920_v17  ;;  %v8065_v13 = vcombine.low %v355_v0, %v367_v1  ;;  %v319_v17 = vld [vmem:[#allocation5 + $0x450] sm:$0xff]  ;;  %v8043_v22 = vcombine.low %v332_v10, %v344_v12  ;;  %v476_v4 = vld [vmem:[#allocation5 + $0x938] sm:$0xff] }
 0x10e   :  { %v8017_v29 = vcombine.low %v307_v16, %v319_v17 }
 0x110   :  { %2361 = vmatpush1.bf16.msra.mxu0 %v7917_v19  ;;  %2402 = vmatpush1.bf16.msra.mxu1 %v7919_v20  ;;  %v8044_v19 = vcombine.high %v332_v10, %v344_v12  ;;  %v320_v20 = vld [vmem:[#allocation5 + $0x458] sm:$0xff]  ;;  %v8185_v10 = vcombine.low %v475_v2, %v475_v2 }
 0x111   :  { %2362 = vmatprep.subr.bf16.mxu0 %v7894_v21  ;;  %2403 = vmatprep.subr.bf16.mxu1 %v7896_v23  ;;  %v8041_v21 = vcombine.low %v331_v8, %v343_v9  ;;  %v8018_v23 = vcombine.high %v307_v16, %v319_v17  ;;  %v8186_v9 = vcombine.high %v475_v2, %v475_v2  ;;  %v464_v12 = vld [vmem:[#allocation5 + $0x8d8] sm:$0xff]  ;;  %v439_v16 = vld [vmem:[#allocation5 + $0x810] sm:$0xff]  ;;  %v285_v2 = vld [vmem:[#allocation5 + $0x340] sm:$0xff] }
 0x112   :  { %v2149_v17 = vsel %vm2111_vm1, %v8185_v10, 0  ;;  %v261_v10 = vld [vmem:[#allocation5 + $0x280] sm:$0xff] }
 0x114   :  { %2363 = vmatpush1.bf16.msra.mxu0 %v7893_v25  ;;  %2404 = vmatpush1.bf16.msra.mxu1 %v7895_v26  ;;  %v295_v25 = vld [vmem:[#allocation5 + $0x390] sm:$0xff]  ;;  %v284_v26 = vld [vmem:[#allocation5 + $0x338] sm:$0xff] }
 0x115   :  { %8205 = vmatprep.subr.msk.bf16.mxu0 %vm2111_vm1, %v8182_v27  ;;  %8207 = vmatprep.subr.msk.bf16.mxu1 %vm2111_vm1, %v8184_v32  ;;  %v8020_v27 = vcombine.high %v308_v18, %v320_v20  ;;  %v8019_v32 = vcombine.low %v308_v18, %v320_v20  ;;  %v7994_v33 = vcombine.high %v283_v24, %v295_v25  ;;  %v440_v20 = vld [vmem:[#allocation5 + $0x818] sm:$0xff] }
 0x116   :  { %v7993_v37 = vcombine.low %v283_v24, %v295_v25  ;;  %v7995_v38 = vcombine.low %v284_v26, %v296_v28  ;;  %v403_v24 = vld [vmem:[#allocation5 + $0x6f0] sm:$0xff] }
 0x117   :  { %v415_v25 = vld [vmem:[#allocation5 + $0x750] sm:$0xff] }
 0x118   :  { %2371 = vmatpush2.bf16.msra.mxu0 %v2137_v35  ;;  %2412 = vmatpush2.bf16.msra.mxu1 %v2143_v40  ;;  %v272_v35 = vld [vmem:[#allocation5 + $0x2d8] sm:$0xff]  ;;  %v235_v40 = vld [vmem:[#allocation5 + $0x1b0] sm:$0xff] }
 0x119   :  { %2372 = vmatprep.subr.bf16.mxu0 %v8158_v36  ;;  %2413 = vmatprep.subr.bf16.mxu1 %v8160_v41  ;;  %v7996_v36 = vcombine.high %v284_v26, %v296_v28  ;;  %v247_v41 = vld [vmem:[#allocation5 + $0x210] sm:$0xff]  ;;  %v7971_v47 = vcombine.low %v260_v34, %v272_v35  ;;  %v404_v28 = vld [vmem:[#allocation5 + $0x6f8] sm:$0xff] }
 0x11a   :  { %v7946_v48 = vcombine.high %v235_v40, %v247_v41 }
 0x11c   :  { %2373 = vmatpush2.bf16.msra.mxu0 %v8157_v43  ;;  %2414 = vmatpush2.bf16.msra.mxu1 %v8159_v44  ;;  %v7972_v43 = vcombine.high %v260_v34, %v272_v35  ;;  %v248_v44 = vld [vmem:[#allocation5 + $0x218] sm:$0xff]  ;;  %v8114_v35 = vcombine.high %v403_v24, %v415_v25 }
 0x11d   :  { %2374 = vmatprep.subr.bf16.mxu0 %v8134_v45  ;;  %2415 = vmatprep.subr.bf16.mxu1 %v8136_v50  ;;  %v7969_v45 = vcombine.low %v259_v30, %v271_v31  ;;  %v223_v50 = vld [vmem:[#allocation5 + $0x150] sm:$0xff]  ;;  %v7947_v56 = vcombine.low %v236_v42, %v248_v44 }
 0x11e   :  { %v7922_v57 = vcombine.high %v211_v49, %v223_v50 }
 0x120   :  { %2375 = vmatpush2.bf16.msra.mxu0 %v8133_v53  ;;  %2416 = vmatpush2.bf16.msra.mxu1 %v8135_v54  ;;  %v7948_v53 = vcombine.high %v236_v42, %v248_v44  ;;  %v224_v54 = vld [vmem:[#allocation5 + $0x158] sm:$0xff]  ;;  %v358_v44 = vld [vmem:[#allocation5 + $0x588] sm:$0xff] }
 0x121   :  { %2376 = vmatprep.subr.bf16.mxu0 %v8110_v55  ;;  %2417 = vmatprep.subr.bf16.mxu1 %v8112_v59  ;;  %v7945_v55 = vcombine.low %v235_v40, %v247_v41  ;;  %v199_v59 = vld [vmem:[#allocation5 + $0x90] sm:$0xff]  ;;  %v7923_v0 = vcombine.low %v212_v51, %v224_v54  ;;  %v357_v40 = vld [vmem:[#allocation5 + $0x580] sm:$0xff] }
 0x122   :  { %v7898_v1 = vcombine.high %v187_v58, %v199_v59  ;;  %v369_v41 = vld [vmem:[#allocation5 + $0x5e0] sm:$0xff] }
 0x124   :  { %2377 = vmatpush2.bf16.msra.mxu0 %v8109_v61  ;;  %2418 = vmatpush2.bf16.msra.mxu1 %v8111_v62  ;;  %v7924_v61 = vcombine.high %v212_v51, %v224_v54  ;;  %v200_v62 = vld [vmem:[#allocation5 + $0x98] sm:$0xff]  ;;  %v334_v54 = vld [vmem:[#allocation5 + $0x4c8] sm:$0xff] }
 0x125   :  { %2378 = vmatprep.subr.bf16.mxu0 %v8086_v63  ;;  %2419 = vmatprep.subr.bf16.mxu1 %v8088_v3  ;;  %v7921_v63 = vcombine.low %v211_v49, %v223_v50  ;;  %v7900_v3 = vcombine.high %v188_v60, %v200_v62  ;;  %v7899_v8 = vcombine.low %v188_v60, %v200_v62  ;;  %v333_v49 = vld [vmem:[#allocation5 + $0x4c0] sm:$0xff]  ;;  %v310_v62 = vld [vmem:[#allocation5 + $0x408] sm:$0xff] }
 0x126   :  { %v345_v50 = vld [vmem:[#allocation5 + $0x520] sm:$0xff] }
 0x128   :  { %2379 = vmatpush2.bf16.msra.mxu0 %v8085_v5  ;;  %2420 = vmatpush2.bf16.msra.mxu1 %v8087_v6  ;;  %v7897_v5 = vcombine.low %v187_v58, %v199_v59  ;;  %v451_v6 = vld [vmem:[#allocation5 + $0x870] sm:$0xff]  ;;  %v309_v58 = vld [vmem:[#allocation5 + $0x400] sm:$0xff] }
 0x129   :  { %2430 = vmatprep.subr.bf16.mxu0 %v8066_v7  ;;  %2471 = vmatprep.subr.bf16.mxu1 %v8068_v11  ;;  %v463_v7 = vld [vmem:[#allocation5 + $0x8d0] sm:$0xff]  ;;  %v452_v11 = vld [vmem:[#allocation5 + $0x878] sm:$0xff]  ;;  %v321_v59 = vld [vmem:[#allocation5 + $0x460] sm:$0xff] }
 0x12a   :  { %v8162_v18 = vcombine.high %v451_v6, %v463_v7  ;;  %v8163_v26 = vcombine.low %v452_v11, %v464_v12 }
 0x12b   :  { %2381 = vmatmul.mubr.bf16.vlgmr.msra.gmra.mxu0 %v10367_v52  ;;  %2422 = vmatmul.mubr.bf16.vlgmr.msra.gmra.mxu1 %v10367_v52 }
 0x12c   :  { %2431 = vmatpush1.bf16.msra.mxu0 %v8065_v13  ;;  %2472 = vmatpush1.bf16.msra.mxu1 %v8067_v14  ;;  %v8188_v13 = vcombine.high %v476_v4, %v476_v4  ;;  %v8187_v14 = vcombine.low %v476_v4, %v476_v4 }
 0x12d   :  { %2432 = vmatprep.subr.bf16.mxu0 %v8042_v15  ;;  %2473 = vmatprep.subr.bf16.mxu1 %v8044_v19  ;;  %v427_v15 = vld [vmem:[#allocation5 + $0x7b0] sm:$0xff]  ;;  %v428_v19 = vld [vmem:[#allocation5 + $0x7b8] sm:$0xff] }
 0x12e   :  { %8210 = vmatprep.mubr.msk.bf16.mxu0 %vm2107_vm0, %v10357_v46  ;;  %8212 = vmatprep.mubr.msk.bf16.mxu1 %vm2107_vm0, %v10357_v46  ;;  %v8140_v30 = vcombine.high %v428_v19, %v440_v20  ;;  %v8137_v31 = vcombine.low %v427_v15, %v439_v16  ;;  %v8139_v34 = vcombine.low %v428_v19, %v440_v20  ;;  %v249_v19 = vld [vmem:[#allocation5 + $0x220] sm:$0xff] }
 0x130   :  { %2433 = vmatpush1.bf16.msra.mxu0 %v8041_v21  ;;  %2474 = vmatpush1.bf16.msra.mxu1 %v8043_v22  ;;  %v2155_v21 = vsel %vm2111_vm1, %v8187_v14, 0  ;;  %v8164_v22 = vcombine.high %v452_v11, %v464_v12  ;;  %v273_v11 = vld [vmem:[#allocation5 + $0x2e0] sm:$0xff]  ;;  %v262_v14 = vld [vmem:[#allocation5 + $0x288] sm:$0xff] }
 0x131   :  { %2434 = vmatprep.subr.bf16.mxu0 %v8018_v23  ;;  %2475 = vmatprep.subr.bf16.mxu1 %v8020_v27  ;;  %v8161_v23 = vcombine.low %v451_v6, %v463_v7  ;;  %v8138_v27 = vcombine.high %v427_v15, %v439_v16  ;;  %v286_v6 = vld [vmem:[#allocation5 + $0x348] sm:$0xff] }
 0x132   :  { %v298_v7 = vld [vmem:[#allocation5 + $0x3a8] sm:$0xff] }
 0x133   :  { %v274_v15 = vld [vmem:[#allocation5 + $0x2e8] sm:$0xff]  ;;  %v8000_v16 = vcombine.high %v286_v6, %v298_v7  ;;  %v7999_v20 = vcombine.low %v286_v6, %v298_v7 }
 0x134   :  { %2435 = vmatpush1.bf16.msra.mxu0 %v8017_v29  ;;  %2476 = vmatpush1.bf16.msra.mxu1 %v8019_v32  ;;  %v416_v29 = vld [vmem:[#allocation5 + $0x758] sm:$0xff]  ;;  %v379_v32 = vld [vmem:[#allocation5 + $0x630] sm:$0xff] }
 0x135   :  { %2436 = vmatprep.subr.bf16.mxu0 %v7994_v33  ;;  %2477 = vmatprep.subr.bf16.mxu1 %v7996_v36  ;;  %v391_v33 = vld [vmem:[#allocation5 + $0x690] sm:$0xff]  ;;  %v380_v36 = vld [vmem:[#allocation5 + $0x638] sm:$0xff]  ;;  %v8115_v42 = vcombine.low %v404_v28, %v416_v29 }
 0x138   :  { %2437 = vmatpush1.bf16.msra.mxu0 %v7993_v37  ;;  %2478 = vmatpush1.bf16.msra.mxu1 %v7995_v38  ;;  %v392_v37 = vld [vmem:[#allocation5 + $0x698] sm:$0xff]  ;;  %v8116_v38 = vcombine.high %v404_v28, %v416_v29  ;;  %v7975_v28 = vcombine.low %v262_v14, %v274_v15 }
 0x139   :  { %2438 = vmatprep.subr.bf16.mxu0 %v7970_v39  ;;  %2479 = vmatprep.subr.bf16.mxu1 %v7972_v43  ;;  %v8113_v39 = vcombine.low %v403_v24, %v415_v25  ;;  %v8090_v43 = vcombine.high %v379_v32, %v391_v33  ;;  %v8091_v51 = vcombine.low %v380_v36, %v392_v37 }
 0x13a   :  { %v7976_v24 = vcombine.high %v262_v14, %v274_v15  ;;  %v7973_v25 = vcombine.low %v261_v10, %v273_v11  ;;  %v381_v14 = vld [vmem:[#allocation5 + $0x640] sm:$0xff] }
 0x13b   :  { %v393_v15 = vld [vmem:[#allocation5 + $0x6a0] sm:$0xff] }
 0x13c   :  { %2439 = vmatpush1.bf16.msra.mxu0 %v7969_v45  ;;  %2480 = vmatpush1.bf16.msra.mxu1 %v7971_v47  ;;  %v370_v45 = vld [vmem:[#allocation5 + $0x5e8] sm:$0xff]  ;;  %v8092_v47 = vcombine.high %v380_v36, %v392_v37 }
 0x13d   :  { %2440 = vmatprep.subr.bf16.mxu0 %v7946_v48  ;;  %2481 = vmatprep.subr.bf16.mxu1 %v7948_v53  ;;  %v8089_v48 = vcombine.low %v379_v32, %v391_v33  ;;  %v8070_v53 = vcombine.high %v357_v40, %v369_v41  ;;  %v8071_v60 = vcombine.low %v358_v44, %v370_v45 }
 0x140   :  { %2441 = vmatpush1.bf16.msra.mxu0 %v7945_v55  ;;  %2482 = vmatpush1.bf16.msra.mxu1 %v7947_v56  ;;  %v346_v55 = vld [vmem:[#allocation5 + $0x528] sm:$0xff]  ;;  %v8072_v56 = vcombine.high %v358_v44, %v370_v45 }
 0x141   :  { %2442 = vmatprep.subr.bf16.mxu0 %v7922_v57  ;;  %2483 = vmatprep.subr.bf16.mxu1 %v7924_v61  ;;  %v8069_v57 = vcombine.low %v357_v40, %v369_v41  ;;  %v8046_v61 = vcombine.high %v333_v49, %v345_v50  ;;  %v8047_v4 = vcombine.low %v334_v54, %v346_v55  ;;  %v202_v40 = vld [vmem:[#allocation5 + $0xa8] sm:$0xff] }
 0x142   :  { %v478_v45 = vld [vmem:[#allocation5 + $0x948] sm:$0xff] }
 0x144   :  { %2443 = vmatpush1.bf16.msra.mxu0 %v7921_v63  ;;  %2484 = vmatpush1.bf16.msra.mxu1 %v7923_v0  ;;  %v322_v63 = vld [vmem:[#allocation5 + $0x468] sm:$0xff]  ;;  %v8048_v0 = vcombine.high %v334_v54, %v346_v55 }
 0x145   :  { %2444 = vmatprep.subr.bf16.mxu0 %v7898_v1  ;;  %2485 = vmatprep.subr.bf16.mxu1 %v7900_v3  ;;  %v8045_v1 = vcombine.low %v333_v49, %v345_v50  ;;  %v297_v3 = vld [vmem:[#allocation5 + $0x3a0] sm:$0xff]  ;;  %v8023_v12 = vcombine.low %v310_v62, %v322_v63  ;;  %v454_v55 = vld [vmem:[#allocation5 + $0x888] sm:$0xff] }
 0x146   :  { %v453_v49 = vld [vmem:[#allocation5 + $0x880] sm:$0xff] }
 0x147   :  { %v465_v50 = vld [vmem:[#allocation5 + $0x8e0] sm:$0xff] }
 0x148   :  { %2445 = vmatpush1.bf16.msra.mxu0 %v7897_v5  ;;  %2486 = vmatpush1.bf16.msra.mxu1 %v7899_v8  ;;  %v8022_v5 = vcombine.high %v309_v58, %v321_v59  ;;  %v8024_v8 = vcombine.high %v310_v62, %v322_v63  ;;  %v8166_v62 = vcombine.high %v453_v49, %v465_v50  ;;  %v430_v63 = vld [vmem:[#allocation5 + $0x7c8] sm:$0xff] }
 0x149   :  { %8209 = vmatprep.subr.msk.bf16.mxu0 %vm2111_vm1, %v8186_v9  ;;  %8211 = vmatprep.subr.msk.bf16.mxu1 %vm2111_vm1, %v8188_v13  ;;  %v8021_v9 = vcombine.low %v309_v58, %v321_v59  ;;  %v7998_v13 = vcombine.high %v285_v2, %v297_v3  ;;  %v8191_v58 = vcombine.low %v478_v45, %v478_v45  ;;  %v429_v59 = vld [vmem:[#allocation5 + $0x7c0] sm:$0xff] }
 0x14c   :  { %2453 = vmatpush2.bf16.msra.mxu0 %v2149_v17  ;;  %2494 = vmatpush2.bf16.msra.mxu1 %v2155_v21  ;;  %v7997_v17 = vcombine.low %v285_v2, %v297_v3  ;;  %v7974_v21 = vcombine.high %v261_v10, %v273_v11  ;;  %v8165_v3 = vcombine.low %v453_v49, %v465_v50  ;;  %v312_v49 = vld [vmem:[#allocation5 + $0x418] sm:$0xff] }
 0x14d   :  { %2454 = vmatprep.subr.bf16.mxu0 %v8162_v18  ;;  %2495 = vmatprep.subr.bf16.mxu1 %v8164_v22  ;;  %v237_v18 = vld [vmem:[#allocation5 + $0x1c0] sm:$0xff]  ;;  %v238_v22 = vld [vmem:[#allocation5 + $0x1c8] sm:$0xff]  ;;  %v324_v50 = vld [vmem:[#allocation5 + $0x478] sm:$0xff] }
 0x14e   :  { %v7950_v29 = vcombine.high %v237_v18, %v249_v19  ;;  %v7949_v33 = vcombine.low %v237_v18, %v249_v19  ;;  %v382_v19 = vld [vmem:[#allocation5 + $0x648] sm:$0xff] }
 0x150   :  { %2455 = vmatpush2.bf16.msra.mxu0 %v8161_v23  ;;  %2496 = vmatpush2.bf16.msra.mxu1 %v8163_v26  ;;  %v250_v23 = vld [vmem:[#allocation5 + $0x228] sm:$0xff]  ;;  %v213_v26 = vld [vmem:[#allocation5 + $0x100] sm:$0xff] }
 0x151   :  { %2456 = vmatprep.subr.bf16.mxu0 %v8138_v27  ;;  %2497 = vmatprep.subr.bf16.mxu1 %v8140_v30  ;;  %v225_v27 = vld [vmem:[#allocation5 + $0x160] sm:$0xff]  ;;  %v214_v30 = vld [vmem:[#allocation5 + $0x108] sm:$0xff]  ;;  %v7952_v32 = vcombine.high %v238_v22, %v250_v23  ;;  %v7951_v36 = vcombine.low %v238_v22, %v250_v23 }
 0x152   :  { %v7926_v37 = vcombine.high %v213_v26, %v225_v27  ;;  %v7925_v41 = vcombine.low %v213_v26, %v225_v27  ;;  %v359_v26 = vld [vmem:[#allocation5 + $0x590] sm:$0xff] }
 0x153   :  { %v371_v27 = vld [vmem:[#allocation5 + $0x5f0] sm:$0xff] }
 0x154   :  { %2457 = vmatpush2.bf16.msra.mxu0 %v8137_v31  ;;  %2498 = vmatpush2.bf16.msra.mxu1 %v8139_v34  ;;  %v226_v31 = vld [vmem:[#allocation5 + $0x168] sm:$0xff]  ;;  %v189_v34 = vld [vmem:[#allocation5 + $0x40] sm:$0xff] }
 0x155   :  { %2458 = vmatprep.subr.bf16.mxu0 %v8114_v35  ;;  %2499 = vmatprep.subr.bf16.mxu1 %v8116_v38  ;;  %v201_v35 = vld [vmem:[#allocation5 + $0xa0] sm:$0xff]  ;;  %v7928_v38 = vcombine.high %v214_v30, %v226_v31 }
 0x156   :  { %v7902_v44 = vcombine.high %v189_v34, %v201_v35 }
 0x158   :  { %2459 = vmatpush2.bf16.msra.mxu0 %v8113_v39  ;;  %2500 = vmatpush2.bf16.msra.mxu1 %v8115_v42  ;;  %v190_v39 = vld [vmem:[#allocation5 + $0x48] sm:$0xff]  ;;  %v477_v42 = vld [vmem:[#allocation5 + $0x940] sm:$0xff] }
 0x159   :  { %2460 = vmatprep.subr.bf16.mxu0 %v8090_v43  ;;  %2501 = vmatprep.subr.bf16.mxu1 %v8092_v47  ;;  %v7927_v43 = vcombine.low %v214_v30, %v226_v31  ;;  %v7904_v47 = vcombine.high %v190_v39, %v202_v40  ;;  %v8189_v54 = vcombine.low %v477_v42, %v477_v42  ;;  %v360_v31 = vld [vmem:[#allocation5 + $0x598] sm:$0xff] }
 0x15a   :  { %v8094_v30 = vcombine.high %v381_v14, %v393_v15 }
 0x15c   :  { %2461 = vmatpush2.bf16.msra.mxu0 %v8089_v48  ;;  %2502 = vmatpush2.bf16.msra.mxu1 %v8091_v51  ;;  %v7901_v48 = vcombine.low %v189_v34, %v201_v35  ;;  %v7903_v51 = vcombine.low %v190_v39, %v202_v40  ;;  %v8093_v35 = vcombine.low %v381_v14, %v393_v15  ;;  %v336_v40 = vld [vmem:[#allocation5 + $0x4d8] sm:$0xff] }
 0x15d   :  { %2512 = vmatprep.subr.bf16.mxu0 %v8070_v53  ;;  %2553 = vmatprep.subr.bf16.mxu1 %v8072_v56  ;;  %v8190_v53 = vcombine.high %v477_v42, %v477_v42  ;;  %v466_v56 = vld [vmem:[#allocation5 + $0x8e8] sm:$0xff]  ;;  %v8074_v39 = vcombine.high %v359_v26, %v371_v27 }
 0x15e   :  { %v8168_v2 = vcombine.high %v454_v55, %v466_v56  ;;  %v8167_v6 = vcombine.low %v454_v55, %v466_v56  ;;  %v299_v55 = vld [vmem:[#allocation5 + $0x3b0] sm:$0xff] }
 0x15f   :  { %2463 = vmatmul.mubr.bf16.vlgmr.msra.gmra.mxu0 %v10367_v52  ;;  %2504 = vmatmul.mubr.bf16.vlgmr.msra.gmra.mxu1 %v10367_v52 }
 0x160   :  { %2513 = vmatpush1.bf16.msra.mxu0 %v8069_v57  ;;  %2554 = vmatpush1.bf16.msra.mxu1 %v8071_v60  ;;  %v8192_v57 = vcombine.high %v478_v45, %v478_v45  ;;  %v441_v60 = vld [vmem:[#allocation5 + $0x820] sm:$0xff]  ;;  %v323_v45 = vld [vmem:[#allocation5 + $0x470] sm:$0xff] }
 0x161   :  { %2514 = vmatprep.subr.bf16.mxu0 %v8046_v61  ;;  %2555 = vmatprep.subr.bf16.mxu1 %v8048_v0  ;;  %v2161_v61 = vsel %vm2111_vm1, %v8189_v54, 0  ;;  %v442_v0 = vld [vmem:[#allocation5 + $0x828] sm:$0xff]  ;;  %v8142_v7 = vcombine.high %v429_v59, %v441_v60  ;;  %v287_v54 = vld [vmem:[#allocation5 + $0x350] sm:$0xff] }
 0x162   :  { %8214 = vmatprep.mubr.msk.bf16.mxu0 %vm2107_vm0, %v10357_v46  ;;  %8216 = vmatprep.mubr.msk.bf16.mxu1 %vm2107_vm0, %v10357_v46  ;;  %v8144_v10 = vcombine.high %v430_v63, %v442_v0 }
 0x164   :  { %2515 = vmatpush1.bf16.msra.mxu0 %v8045_v1  ;;  %2556 = vmatpush1.bf16.msra.mxu1 %v8047_v4  ;;  %v2167_v1 = vsel %vm2111_vm1, %v8191_v58, 0  ;;  %v405_v4 = vld [vmem:[#allocation5 + $0x700] sm:$0xff]  ;;  %v288_v58 = vld [vmem:[#allocation5 + $0x358] sm:$0xff] }
 0x165   :  { %2516 = vmatprep.subr.bf16.mxu0 %v8022_v5  ;;  %2557 = vmatprep.subr.bf16.mxu1 %v8024_v8  ;;  %v417_v5 = vld [vmem:[#allocation5 + $0x760] sm:$0xff]  ;;  %v406_v8 = vld [vmem:[#allocation5 + $0x708] sm:$0xff] }
 0x166   :  { %v8118_v18 = vcombine.high %v405_v4, %v417_v5 }
 0x168   :  { %2517 = vmatpush1.bf16.msra.mxu0 %v8021_v9  ;;  %2558 = vmatpush1.bf16.msra.mxu1 %v8023_v12  ;;  %v418_v9 = vld [vmem:[#allocation5 + $0x768] sm:$0xff] }
 0x169   :  { %2518 = vmatprep.subr.bf16.mxu0 %v7998_v13  ;;  %2559 = vmatprep.subr.bf16.mxu1 %v8000_v16  ;;  %v8141_v13 = vcombine.low %v429_v59, %v441_v60  ;;  %v8120_v22 = vcombine.high %v406_v8, %v418_v9  ;;  %v300_v59 = vld [vmem:[#allocation5 + $0x3b8] sm:$0xff]  ;;  %v8028_v60 = vcombine.high %v312_v49, %v324_v50 }
 0x16c   :  { %2519 = vmatpush1.bf16.msra.mxu0 %v7997_v17  ;;  %2560 = vmatpush1.bf16.msra.mxu1 %v7999_v20  ;;  %v8143_v17 = vcombine.low %v430_v63, %v442_v0  ;;  %v394_v20 = vld [vmem:[#allocation5 + $0x6a8] sm:$0xff]  ;;  %v275_v63 = vld [vmem:[#allocation5 + $0x2f0] sm:$0xff]  ;;  %v8027_v0 = vcombine.low %v312_v49, %v324_v50  ;;  %v456_v49 = vld [vmem:[#allocation5 + $0x898] sm:$0xff] }
 0x16d   :  { %2520 = vmatprep.subr.bf16.mxu0 %v7974_v21  ;;  %2561 = vmatprep.subr.bf16.mxu1 %v7976_v24  ;;  %v8096_v34 = vcombine.high %v382_v19, %v394_v20  ;;  %v468_v50 = vld [vmem:[#allocation5 + $0x8f8] sm:$0xff] }
 0x170   :  { %2521 = vmatpush1.bf16.msra.mxu0 %v7973_v25  ;;  %2562 = vmatpush1.bf16.msra.mxu1 %v7975_v28  ;;  %v8117_v25 = vcombine.low %v405_v4, %v417_v5  ;;  %v8004_v4 = vcombine.high %v288_v58, %v300_v59  ;;  %v8001_v5 = vcombine.low %v287_v54, %v299_v55 }
 0x171   :  { %2522 = vmatprep.subr.bf16.mxu0 %v7950_v29  ;;  %2563 = vmatprep.subr.bf16.mxu1 %v7952_v32  ;;  %v8119_v29 = vcombine.low %v406_v8, %v418_v9  ;;  %v372_v32 = vld [vmem:[#allocation5 + $0x5f8] sm:$0xff]  ;;  %v8003_v8 = vcombine.low %v288_v58, %v300_v59  ;;  %v431_v58 = vld [vmem:[#allocation5 + $0x7d0] sm:$0xff] }
 0x172   :  { %v8076_v42 = vcombine.high %v360_v31, %v372_v32  ;;  %v240_v9 = vld [vmem:[#allocation5 + $0x1d8] sm:$0xff]  ;;  %v443_v59 = vld [vmem:[#allocation5 + $0x830] sm:$0xff] }
 0x174   :  { %2523 = vmatpush1.bf16.msra.mxu0 %v7949_v33  ;;  %2564 = vmatpush1.bf16.msra.mxu1 %v7951_v36  ;;  %v335_v36 = vld [vmem:[#allocation5 + $0x4d0] sm:$0xff] }
 0x175   :  { %2524 = vmatprep.subr.bf16.mxu0 %v7926_v37  ;;  %2565 = vmatprep.subr.bf16.mxu1 %v7928_v38  ;;  %v347_v37 = vld [vmem:[#allocation5 + $0x530] sm:$0xff]  ;;  %v8095_v38 = vcombine.low %v382_v19, %v394_v20 }
 0x176   :  { %v227_v19 = vld [vmem:[#allocation5 + $0x170] sm:$0xff] }
 0x178   :  { %2525 = vmatpush1.bf16.msra.mxu0 %v7925_v41  ;;  %2566 = vmatpush1.bf16.msra.mxu1 %v7927_v43  ;;  %v348_v41 = vld [vmem:[#allocation5 + $0x538] sm:$0xff]  ;;  %v8073_v43 = vcombine.low %v359_v26, %v371_v27 }
 0x179   :  { %2526 = vmatprep.subr.bf16.mxu0 %v7902_v44  ;;  %2567 = vmatprep.subr.bf16.mxu1 %v7904_v47  ;;  %v311_v44 = vld [vmem:[#allocation5 + $0x410] sm:$0xff]  ;;  %v8075_v47 = vcombine.low %v360_v31, %v372_v32  ;;  %v8051_v56 = vcombine.low %v336_v40, %v348_v41  ;;  %v204_v31 = vld [vmem:[#allocation5 + $0xb8] sm:$0xff] }
 0x17c   :  { %2527 = vmatpush1.bf16.msra.mxu0 %v7901_v48  ;;  %2568 = vmatpush1.bf16.msra.mxu1 %v7903_v51  ;;  %v8050_v48 = vcombine.high %v335_v36, %v347_v37  ;;  %v8052_v51 = vcombine.high %v336_v40, %v348_v41 }
 0x17d   :  { %8213 = vmatprep.subr.msk.bf16.mxu0 %vm2111_vm1, %v8190_v53  ;;  %8215 = vmatprep.subr.msk.bf16.mxu1 %vm2111_vm1, %v8192_v57  ;;  %v8049_v53 = vcombine.low %v335_v36, %v347_v37  ;;  %v8026_v57 = vcombine.high %v311_v44, %v323_v45  ;;  %v479_v37 = vld [vmem:[#allocation5 + $0x950] sm:$0xff] }
 0x17e   :  { %v8194_v41 = vcombine.high %v479_v37, %v479_v37 }
 0x180   :  { %2535 = vmatpush2.bf16.msra.mxu0 %v2161_v61  ;;  %2576 = vmatpush2.bf16.msra.mxu1 %v2167_v1  ;;  %v8025_v61 = vcombine.low %v311_v44, %v323_v45  ;;  %v8002_v1 = vcombine.high %v287_v54, %v299_v55 }
 0x181   :  { %2536 = vmatprep.subr.bf16.mxu0 %v8166_v62  ;;  %2577 = vmatprep.subr.bf16.mxu1 %v8168_v2  ;;  %v263_v62 = vld [vmem:[#allocation5 + $0x290] sm:$0xff]  ;;  %v264_v2 = vld [vmem:[#allocation5 + $0x298] sm:$0xff] }
 0x182   :  { %v7977_v14 = vcombine.low %v263_v62, %v275_v63 }
 0x183   :  { %v10409_v11 = vpop.f32.mrf.mxu0  ;;  %v10411_v12 = vpop.f32.mrf.mxu1 }
 0x184   :  { %2537 = vmatpush2.bf16.msra.mxu0 %v8165_v3  ;;  %2578 = vmatpush2.bf16.msra.mxu1 %v8167_v6  ;;  %v276_v3 = vld [vmem:[#allocation5 + $0x2f8] sm:$0xff]  ;;  %v239_v6 = vld [vmem:[#allocation5 + $0x1d0] sm:$0xff] }
 0x185   :  { %v10413_v16 = vpop.f32.mrf.mxu0  ;;  %2538 = vmatprep.subr.bf16.mxu0 %v8142_v7  ;;  %v10415_v21 = vpop.f32.mrf.mxu1  ;;  %2579 = vmatprep.subr.bf16.mxu1 %v8144_v10  ;;  %v251_v7 = vld [vmem:[#allocation5 + $0x230] sm:$0xff]  ;;  %v252_v10 = vld [vmem:[#allocation5 + $0x238] sm:$0xff]  ;;  %v7979_v15 = vcombine.low %v264_v2, %v276_v3 }
 0x186   :  { %v7956_v20 = vcombine.high %v240_v9, %v252_v10 }
 0x187   :  { %v2222_v23 = vpop.f32.mrf.mxu0  ;;  %v2263_v24 = vpop.f32.mrf.mxu1 }
 0x188   :  { %2539 = vmatpush2.bf16.msra.mxu0 %v8141_v13  ;;  %2580 = vmatpush2.bf16.msra.mxu1 %v8143_v17  ;;  %v7980_v13 = vcombine.high %v264_v2, %v276_v3  ;;  %v7954_v17 = vcombine.high %v239_v6, %v251_v7  ;;  %v228_v23 = vld [vmem:[#allocation5 + $0x178] sm:$0xff]  ;;  %v7953_v24 = vcombine.low %v239_v6, %v251_v7 }
 0x189   :  { %v2223_v28 = vpop.f32.mrf.mxu0  ;;  %2540 = vmatprep.subr.bf16.mxu0 %v8118_v18  ;;  %v2264_v33 = vpop.f32.mrf.mxu1  ;;  %2581 = vmatprep.subr.bf16.mxu1 %v8120_v22  ;;  %v215_v18 = vld [vmem:[#allocation5 + $0x110] sm:$0xff]  ;;  %v216_v22 = vld [vmem:[#allocation5 + $0x118] sm:$0xff]  ;;  %v8171_v3 = vcombine.low %v456_v49, %v468_v50 }
 0x18a   :  { %v7930_v26 = vcombine.high %v215_v18, %v227_v19  ;;  %v7932_v27 = vcombine.high %v216_v22, %v228_v23  ;;  %v191_v28 = vld [vmem:[#allocation5 + $0x50] sm:$0xff]  ;;  %v7929_v32 = vcombine.low %v215_v18, %v227_v19  ;;  %v7931_v33 = vcombine.low %v216_v22, %v228_v23  ;;  %v408_v6 = vld [vmem:[#allocation5 + $0x718] sm:$0xff] }
 0x18b   :  { %v420_v7 = vld [vmem:[#allocation5 + $0x778] sm:$0xff] }
 0x18c   :  { %2541 = vmatpush2.bf16.msra.mxu0 %v8117_v25  ;;  %2582 = vmatpush2.bf16.msra.mxu1 %v8119_v29  ;;  %v7955_v25 = vcombine.low %v240_v9, %v252_v10  ;;  %v203_v29 = vld [vmem:[#allocation5 + $0xb0] sm:$0xff]  ;;  %v384_v22 = vld [vmem:[#allocation5 + $0x658] sm:$0xff] }
 0x18d   :  { %2542 = vmatprep.subr.bf16.mxu0 %v8094_v30  ;;  %2583 = vmatprep.subr.bf16.mxu1 %v8096_v34  ;;  %v192_v30 = vld [vmem:[#allocation5 + $0x58] sm:$0xff]  ;;  %v7906_v34 = vcombine.high %v191_v28, %v203_v29 }
 0x18e   :  { %v7908_v36 = vcombine.high %v192_v30, %v204_v31  ;;  %v7907_v40 = vcombine.low %v192_v30, %v204_v31  ;;  %v396_v23 = vld [vmem:[#allocation5 + $0x6b8] sm:$0xff]  ;;  %v8123_v30 = vcombine.low %v408_v6, %v420_v7 }
 0x190   :  { %2543 = vmatpush2.bf16.msra.mxu0 %v8093_v35  ;;  %2584 = vmatpush2.bf16.msra.mxu1 %v8095_v38  ;;  %v487_v35 = vlaneseq  ;;  %v480_v38 = vld [vmem:[#allocation5 + $0x958] sm:$0xff] }
 0x191   :  { %2594 = vmatprep.subr.bf16.mxu0 %v8074_v39  ;;  %2635 = vmatprep.subr.bf16.mxu1 %v8076_v42  ;;  %v7905_v39 = vcombine.low %v191_v28, %v203_v29  ;;  %v8193_v42 = vcombine.low %v479_v37, %v479_v37  ;;  %v8196_v44 = vcombine.high %v480_v38, %v480_v38 }
 0x192   :  { %v8195_v45 = vcombine.low %v480_v38, %v480_v38  ;;  %v8099_v37 = vcombine.low %v384_v22, %v396_v23  ;;  %v9058_v38 = vld [vmem:[#allocation8 + $0x1f8] ss:$36 sps:$4 sm:$0xff]  }
 0x193   :  { %2545 = vmatmul.mubr.bf16.vlgmr.msra.gmra.mxu0 %v10367_v52  ;;  %2586 = vmatmul.mubr.bf16.vlgmr.msra.gmra.mxu1 %v10367_v52 }
 0x194   :  { %2595 = vmatpush1.bf16.msra.mxu0 %v8073_v43  ;;  %2636 = vmatpush1.bf16.msra.mxu1 %v8075_v47  ;;  %v10423_v43 = vshrl.u32 %v487_v35, 7  ;;  %v455_v47 = vld [vmem:[#allocation5 + $0x890] sm:$0xff] }
 0x195   :  { %2596 = vmatprep.subr.bf16.mxu0 %v8050_v48  ;;  %2637 = vmatprep.subr.bf16.mxu1 %v8052_v51  ;;  %v467_v48 = vld [vmem:[#allocation5 + $0x8f0] sm:$0xff] }
 0x196   :  { %8218 = vmatprep.mubr.msk.bf16.mxu0 %vm2107_vm0, %v10357_v46  ;;  %8220 = vmatprep.mubr.msk.bf16.mxu1 %vm2107_vm0, %v10357_v46  ;;  %v7978_v46 = vcombine.high %v263_v62, %v275_v63  ;;  %v10426_v51 = vsub.s32 4, %v10423_v43  ;;  %v10431_v54 = vsub.s32 6, %v10423_v43  ;;  %v8170_v55 = vcombine.high %v455_v47, %v467_v48  ;;  %v444_v62 = vld [vmem:[#allocation5 + $0x838] sm:$0xff] }
 0x198   :  { %2597 = vmatpush1.bf16.msra.mxu0 %v8049_v53  ;;  %2638 = vmatpush1.bf16.msra.mxu1 %v8051_v56  ;;  %v2173_v53 = vsel %vm2111_vm1, %v8193_v42, 0  ;;  %v2179_v56 = vsel %vm2111_vm1, %v8195_v45, 0  ;;  %v9064_v42 = vld [vmem:[#allocation8 + $0x1b0] ss:$36 sps:$4 sm:$0xff]  }
 0x199   :  { %2598 = vmatprep.subr.bf16.mxu0 %v8026_v57  ;;  %2639 = vmatprep.subr.bf16.mxu1 %v8028_v60  ;;  %v8172_v57 = vcombine.high %v456_v49, %v468_v50  ;;  %v10435_v60 = vld [vmem:[#allocation7] sm:$0xff] }
 0x19a   :  { %v506_v63 = vrot.slane %v10435_v60, %v10426_v51  ;;  %v514_v2 = vrot.slane %v10435_v60, %v10431_v54  ;;  %v9072_v45 = vld [vmem:[#allocation8 + $0x16c] ss:$36 sps:$4 sm:$0xff]   ;;  %v9078_v50 = vld [vmem:[#allocation8 + $0x124] ss:$36 sps:$4 sm:$0xff]  }
 0x19b   :  { %v9073_v49 = vld [vmem:[#allocation8 + $0x5e8] ss:$36 sps:$4 sm:$0xff]  }
 0x19c   :  { %2599 = vmatpush1.bf16.msra.mxu0 %v8025_v61  ;;  %2640 = vmatpush1.bf16.msra.mxu1 %v8027_v0  ;;  %v432_v61 = vld [vmem:[#allocation5 + $0x7d8] sm:$0xff]  ;;  %v8169_v0 = vcombine.low %v455_v47, %v467_v48  ;;  %v9075_v47 = vld [vmem:[#allocation8 + $0x5ec] ss:$36 sps:$4 sm:$0xff]  }
 0x19d   :  { %2600 = vmatprep.subr.bf16.mxu0 %v8002_v1  ;;  %2641 = vmatprep.subr.bf16.mxu1 %v8004_v4  ;;  %v407_v1 = vld [vmem:[#allocation5 + $0x710] sm:$0xff]  ;;  %v8146_v4 = vcombine.high %v431_v58, %v443_v59  ;;  %v8147_v19 = vcombine.low %v432_v61, %v444_v62  ;;  %v9070_v48 = vld [vmem:[#allocation8 + $0x168] ss:$36 sps:$4 sm:$0xff]  }
 0x1a0   :  { %2601 = vmatpush1.bf16.msra.mxu0 %v8001_v5  ;;  %2642 = vmatpush1.bf16.msra.mxu1 %v8003_v8  ;;  %v419_v5 = vld [vmem:[#allocation5 + $0x770] sm:$0xff]  ;;  %v8148_v8 = vcombine.high %v432_v61, %v444_v62  ;;  %v9088_v62 = vld [vmem:[#allocation8 + $0x90] ss:$36 sps:$4 sm:$0xff]  }
 0x1a1   :  { %2602 = vmatprep.subr.bf16.mxu0 %v7978_v46  ;;  %2643 = vmatprep.subr.bf16.mxu1 %v7980_v13  ;;  %v8145_v13 = vcombine.low %v431_v58, %v443_v59  ;;  %v8121_v28 = vcombine.low %v407_v1, %v419_v5  ;;  %v9087_v58 = vld [vmem:[#allocation8 + $0x55c] ss:$36 sps:$4 sm:$0xff]   ;;  %v9090_v61 = vld [vmem:[#allocation8 + $0x94] ss:$36 sps:$4 sm:$0xff]  }
 0x1a2   :  { %v9085_v59 = vld [vmem:[#allocation8 + $0x558] ss:$36 sps:$4 sm:$0xff]  }
 0x1a4   :  { %2603 = vmatpush1.bf16.msra.mxu0 %v7977_v14  ;;  %2644 = vmatpush1.bf16.msra.mxu1 %v7979_v15  ;;  %v383_v14 = vld [vmem:[#allocation5 + $0x650] sm:$0xff] }
 0x1a5   :  { %2604 = vmatprep.subr.bf16.mxu0 %v7954_v17  ;;  %2645 = vmatprep.subr.bf16.mxu1 %v7956_v20  ;;  %v395_v15 = vld [vmem:[#allocation5 + $0x6b0] sm:$0xff]  ;;  %v8122_v20 = vcombine.high %v407_v1, %v419_v5  ;;  %v9096_v1 = vld [vmem:[#allocation8 + $0x4c] ss:$36 sps:$4 sm:$0xff]   ;;  %v9102_v5 = vld [vmem:[#allocation8 + $0x4] ss:$36 sps:$4 sm:$0xff]  }
 0x1a6   :  { %v8098_v31 = vcombine.high %v383_v14, %v395_v15  ;;  %v8097_v35 = vcombine.low %v383_v14, %v395_v15  ;;  %v9111_v14 = vld [vmem:[#allocation8 + $0x8bc] ss:$36 sps:$4 sm:$0xff]   ;;  %v10455_v15 = vsub.s32 2, %v10423_v43 }
 0x1a8   :  { %2605 = vmatpush1.bf16.msra.mxu0 %v7953_v24  ;;  %2646 = vmatpush1.bf16.msra.mxu1 %v7955_v25  ;;  %v8124_v25 = vcombine.high %v408_v6, %v420_v7  ;;  %v9100_v6 = vld [vmem:[#allocation8] ss:$36 sps:$4 sm:$0xff]  }
 0x1a9   :  { %2606 = vmatprep.subr.bf16.mxu0 %v7930_v26  ;;  %2647 = vmatprep.subr.bf16.mxu1 %v7932_v27  ;;  %v9105_v7 = vld [vmem:[#allocation8 + $0x484] ss:$36 sps:$4 sm:$0xff]  }
 0x1ac   :  { %2607 = vmatpush1.bf16.msra.mxu0 %v7929_v32  ;;  %2648 = vmatpush1.bf16.msra.mxu1 %v7931_v33  ;;  %v8100_v33 = vcombine.high %v384_v22, %v396_v23  ;;  %v10463_v22 = vld [vmem:[#allocation7 + $0x8] sm:$0xff]  ;;  %v9109_v23 = vld [vmem:[#allocation8 + $0x8b8] ss:$36 sps:$4 sm:$0xff]  }
 0x1ad   :  { %2608 = vmatprep.subr.bf16.mxu0 %v7906_v34  ;;  %2649 = vmatprep.subr.bf16.mxu1 %v7908_v36  ;;  %v9060_v34 = vld [vmem:[#allocation8 + $0x1fc] ss:$36 sps:$4 sm:$0xff]  }
 0x1ae   :  { %v9063_v36 = vld [vmem:[#allocation8 + $0x67c] ss:$36 sps:$4 sm:$0xff]  }
 0x1b0   :  { %2609 = vmatpush1.bf16.msra.mxu0 %v7905_v39  ;;  %2650 = vmatpush1.bf16.msra.mxu1 %v7907_v40  ;;  %v9061_v39 = vld [vmem:[#allocation8 + $0x678] ss:$36 sps:$4 sm:$0xff]  }
 0x1b1   :  { %8217 = vmatprep.subr.msk.bf16.mxu0 %vm2111_vm1, %v8194_v41  ;;  %8219 = vmatprep.subr.msk.bf16.mxu1 %vm2111_vm1, %v8196_v44  ;;  %v9066_v40 = vld [vmem:[#allocation8 + $0x1b4] ss:$36 sps:$4 sm:$0xff]  }
 0x1b2   :  { %v9069_v41 = vld [vmem:[#allocation8 + $0x634] ss:$36 sps:$4 sm:$0xff]  }
 0x1b3   :  { %v9067_v44 = vld [vmem:[#allocation8 + $0x630] ss:$36 sps:$4 sm:$0xff]  }
 0x1b4   :  { %2617 = vmatpush2.bf16.msra.mxu0 %v2173_v53  ;;  %2658 = vmatpush2.bf16.msra.mxu1 %v2179_v56  ;;  %v9081_v53 = vld [vmem:[#allocation8 + $0x5a4] ss:$36 sps:$4 sm:$0xff]  }
 0x1b5   :  { %2618 = vmatprep.subr.bf16.mxu0 %v8170_v55  ;;  %2659 = vmatprep.subr.bf16.mxu1 %v8172_v57  ;;  %v9076_v55 = vld [vmem:[#allocation8 + $0x120] ss:$36 sps:$4 sm:$0xff]  }
 0x1b6   :  { %v9079_v56 = vld [vmem:[#allocation8 + $0x5a0] ss:$36 sps:$4 sm:$0xff]  }
 0x1b7   :  { %v2300_v46 = vpop.f32.mrf.mxu0  ;;  %v2341_v10 = vpop.f32.mrf.mxu1  ;;  %v9084_v57 = vld [vmem:[#allocation8 + $0xdc] ss:$36 sps:$4 sm:$0xff]  }
 0x1b8   :  { %v10441_v9 = vadd.f32 %v2300_v46, %v506_v63  ;;  %2619 = vmatpush2.bf16.msra.mxu0 %v8169_v0  ;;  %v10443_v17 = vadd.f32 %v2341_v10, %v514_v2  ;;  %2660 = vmatpush2.bf16.msra.mxu1 %v8171_v3  ;;  %v9093_v63 = vld [vmem:[#allocation8 + $0x514] ss:$36 sps:$4 sm:$0xff]   ;;  %v9094_v2 = vld [vmem:[#allocation8 + $0x48] ss:$36 sps:$4 sm:$0xff]   ;;  %v9108_v46 = vld [vmem:[#allocation8 + $0x43c] ss:$36 sps:$4 sm:$0xff]  }
 0x1b9   :  { %v10445_v18 = vpop.f32.mrf.mxu0  ;;  %2620 = vmatprep.subr.bf16.mxu0 %v8146_v4  ;;  %v10447_v24 = vpop.f32.mrf.mxu1  ;;  %2661 = vmatprep.subr.bf16.mxu1 %v8148_v8  ;;  %v9091_v0 = vld [vmem:[#allocation8 + $0x510] ss:$36 sps:$4 sm:$0xff]   ;;  %v9097_v4 = vld [vmem:[#allocation8 + $0x4c8] ss:$36 sps:$4 sm:$0xff]   ;;  %v9103_v8 = vld [vmem:[#allocation8 + $0x480] ss:$36 sps:$4 sm:$0xff]  }
 0x1ba   :  { %v9099_v3 = vld [vmem:[#allocation8 + $0x4cc] ss:$36 sps:$4 sm:$0xff]   ;;  %v10452_v10 = vsub.s32 0, %v10423_v43 }
 0x1bb   :  { %v2304_v26 = vpop.f32.mrf.mxu0  ;;  %v2345_v27 = vpop.f32.mrf.mxu1 }
 0x1bc   :  { %2621 = vmatpush2.bf16.msra.mxu0 %v8145_v13  ;;  %2662 = vmatpush2.bf16.msra.mxu1 %v8147_v19  ;;  %v9106_v13 = vld [vmem:[#allocation8 + $0x438] ss:$36 sps:$4 sm:$0xff]   ;;  %v10458_v19 = vsub.s32 1, %v10423_v43  ;;  %v490_v26 = vrot.slane %v10435_v60, %v10452_v10  ;;  %v9112_v27 = vld [vmem:[#allocation8 + $0x3f0] ss:$36 sps:$4 sm:$0xff]  }
 0x1bd   :  { %v2305_v29 = vpop.f32.mrf.mxu0  ;;  %2622 = vmatprep.subr.bf16.mxu0 %v8122_v20  ;;  %v2346_v32 = vpop.f32.mrf.mxu1  ;;  %2663 = vmatprep.subr.bf16.mxu1 %v8124_v25  ;;  %v10461_v20 = vsub.s32 3, %v10423_v43  ;;  %v9114_v25 = vld [vmem:[#allocation8 + $0x3f4] ss:$36 sps:$4 sm:$0xff]  }
 0x1be   :  { %v498_v29 = vrot.slane %v10435_v60, %v10455_v15  ;;  %v522_v32 = vrot.slane %v10463_v22, %v10452_v10 }
 0x1c0   :  { %2623 = vmatpush2.bf16.msra.mxu0 %v8121_v28  ;;  %2664 = vmatpush2.bf16.msra.mxu1 %v8123_v30  ;;  %v9117_v28 = vld [vmem:[#allocation8 + $0x874] ss:$36 sps:$4 sm:$0xff]   ;;  %v494_v30 = vrot.slane %v10435_v60, %v10458_v19 }
 0x1c1   :  { %2624 = vmatprep.subr.bf16.mxu0 %v8098_v31  ;;  %2665 = vmatprep.subr.bf16.mxu1 %v8100_v33  ;;  %v502_v31 = vrot.slane %v10435_v60, %v10461_v20  ;;  %v530_v33 = vrot.slane %v10463_v22, %v10455_v15 }
 0x1c4   :  { %2625 = vmatpush2.bf16.msra.mxu0 %v8097_v35  ;;  %2666 = vmatpush2.bf16.msra.mxu1 %v8099_v37  ;;  %v9120_v35 = vld [vmem:[#allocation8 + $0x3ac] ss:$36 sps:$4 sm:$0xff]   ;;  %v526_v37 = vrot.slane %v10463_v22, %v10458_v19 }
 0x1c5   :  { %6357 = vmatprep.subr.bf16.mxu0 %v9060_v34  ;;  %6398 = vmatprep.subr.bf16.mxu1 %v9063_v36  ;;  %v9115_v34 = vld [vmem:[#allocation8 + $0x870] ss:$36 sps:$4 sm:$0xff]   ;;  %v2219_v36 = vadd.f32 %v10409_v11, %v490_v26 }
 0x1c6   :  { %v9138_v26 = vld [vmem:[#allocation8 + $0x2d4] ss:$36 sps:$4 sm:$0xff]  }
 0x1c7   :  { %2627 = vmatmul.mubr.bf16.vlgmr.msra.gmra.mxu0 %v10367_v52  ;;  %2668 = vmatmul.mubr.bf16.vlgmr.msra.gmra.mxu1 %v10367_v52  ;;  %v9082_v52 = vld [vmem:[#allocation8 + $0xd8] ss:$36 sps:$4 sm:$0xff]  }
 0x1c8   :  { %6358 = vmatpush1.bf16.msra.mxu0 %v9058_v38  ;;  %6399 = vmatpush1.bf16.msra.mxu1 %v9061_v39  ;;  %v9118_v38 = vld [vmem:[#allocation8 + $0x3a8] ss:$36 sps:$4 sm:$0xff]  }
 0x1c9   :  { %6359 = vmatprep.subr.bf16.mxu0 %v9066_v40  ;;  %6400 = vmatprep.subr.bf16.mxu1 %v9069_v41  ;;  %v9123_v39 = vld [vmem:[#allocation8 + $0x82c] ss:$36 sps:$4 sm:$0xff]   ;;  %v2260_v40 = vadd.f32 %v10411_v12, %v498_v29 }
 0x1ca   :  { %v9139_v29 = vld [vmem:[#allocation8 + $0x750] ss:$36 sps:$4 sm:$0xff]  }
 0x1cc   :  { %6360 = vmatpush1.bf16.msra.mxu0 %v9064_v42  ;;  %6401 = vmatpush1.bf16.msra.mxu1 %v9067_v44  ;;  %v534_v42 = vrot.slane %v10463_v22, %v10461_v20  ;;  %v2221_v44 = vadd.f32 %v10413_v16, %v494_v30  ;;  %v9144_v30 = vld [vmem:[#allocation8 + $0x28c] ss:$36 sps:$4 sm:$0xff]  }
 0x1cd   :  { %6361 = vmatprep.subr.bf16.mxu0 %v9072_v45  ;;  %6402 = vmatprep.subr.bf16.mxu1 %v9075_v47  ;;  %v2262_v45 = vadd.f32 %v10415_v21, %v502_v31  ;;  %v9147_v31 = vld [vmem:[#allocation8 + $0x70c] ss:$36 sps:$4 sm:$0xff]  }
 0x1d0   :  { %6362 = vmatpush1.bf16.msra.mxu0 %v9070_v48  ;;  %6403 = vmatpush1.bf16.msra.mxu1 %v9073_v49 }
 0x1d1   :  { %6363 = vmatprep.subr.bf16.mxu0 %v9078_v50  ;;  %6404 = vmatprep.subr.bf16.mxu1 %v9081_v53  ;;  %v9121_v50 = vld [vmem:[#allocation8 + $0x828] ss:$36 sps:$4 sm:$0xff]  }
 0x1d2   :  { %v9126_v53 = vld [vmem:[#allocation8 + $0x364] ss:$36 sps:$4 sm:$0xff]  }
 0x1d4   :  { %6364 = vmatpush1.bf16.msra.mxu0 %v9076_v55  ;;  %6405 = vmatpush1.bf16.msra.mxu1 %v9079_v56  ;;  %v2676_v55 = vmax.f32 %v2219_v36, 0.0  ;;  %v9148_v36 = vld [vmem:[#allocation8 + $0x240] ss:$36 sps:$4 sm:$0xff]  }
 0x1d5   :  { %6365 = vmatprep.subr.bf16.mxu0 %v9084_v57  ;;  %6406 = vmatprep.subr.bf16.mxu1 %v9087_v58  ;;  %v9124_v58 = vld [vmem:[#allocation8 + $0x360] ss:$36 sps:$4 sm:$0xff]  }
 0x1d8   :  { %6366 = vmatpush1.bf16.msra.mxu0 %v9082_v52  ;;  %6407 = vmatpush1.bf16.msra.mxu1 %v9085_v59  ;;  %v9129_v52 = vld [vmem:[#allocation8 + $0x7e4] ss:$36 sps:$4 sm:$0xff]   ;;  %v2678_v59 = vmax.f32 %v2260_v40, 0.0  ;;  %v10494_v40 = vsub.s32 5, %v10423_v43 }
 0x1d9   :  { %6367 = vmatprep.subr.bf16.mxu0 %v9090_v61  ;;  %6408 = vmatprep.subr.bf16.mxu1 %v9093_v63  ;;  %v2679_v63 = vmax.f32 %v2262_v45, 0.0 }
 0x1dc   :  { %6368 = vmatpush1.bf16.msra.mxu0 %v9088_v62  ;;  %6409 = vmatpush1.bf16.msra.mxu1 %v9091_v0  ;;  %v2677_v62 = vmax.f32 %v2221_v44, 0.0  ;;  %v538_v44 = vrot.slane %v10463_v22, %v10426_v51 }
 0x1dd   :  { %6369 = vmatprep.subr.bf16.mxu0 %v9096_v1  ;;  %6410 = vmatprep.subr.bf16.mxu1 %v9099_v3 }
 0x1e0   :  { %6370 = vmatpush1.bf16.msra.mxu0 %v9094_v2  ;;  %6411 = vmatpush1.bf16.msra.mxu1 %v9097_v4 }
 0x1e1   :  { %6371 = vmatprep.subr.bf16.mxu0 %v9102_v5  ;;  %6412 = vmatprep.subr.bf16.mxu1 %v9105_v7  ;;  %v9132_v7 = vld [vmem:[#allocation8 + $0x31c] ss:$36 sps:$4 sm:$0xff]  }
 0x1e4   :  { %6372 = vmatpush1.bf16.msra.mxu0 %v9100_v6  ;;  %6413 = vmatpush1.bf16.msra.mxu1 %v9103_v8  ;;  %v9127_v6 = vld [vmem:[#allocation8 + $0x7e0] ss:$36 sps:$4 sm:$0xff]  }
 0x1e5   :  { %6373 = vmatprep.subr.bf16.mxu0 %v9108_v46  ;;  %6414 = vmatprep.subr.bf16.mxu1 %v9111_v14  ;;  %v9135_v14 = vld [vmem:[#allocation8 + $0x79c] ss:$36 sps:$4 sm:$0xff]  }
 0x1e8   :  { %6374 = vmatpush2.bf16.msra.mxu0 %v9106_v13  ;;  %6415 = vmatpush2.bf16.msra.mxu1 %v9109_v23  ;;  %v9130_v13 = vld [vmem:[#allocation8 + $0x318] ss:$36 sps:$4 sm:$0xff]  }
 0x1e9   :  { %6375 = vmatprep.subr.bf16.mxu0 %v9114_v25  ;;  %6416 = vmatprep.subr.bf16.mxu1 %v9117_v28  ;;  %v9133_v25 = vld [vmem:[#allocation8 + $0x798] ss:$36 sps:$4 sm:$0xff]  }
 0x1ea   :  { %v9141_v28 = vld [vmem:[#allocation8 + $0x754] ss:$36 sps:$4 sm:$0xff]  }
 0x1eb   :  { %v2382_v41 = vpop.f32.mrf.mxu0  ;;  %v2423_v48 = vpop.f32.mrf.mxu1 }
 0x1ec   :  { %v2383_v47 = vadd.f32 %v2382_v41, %v522_v32  ;;  %6376 = vmatpush2.bf16.msra.mxu0 %v9112_v27  ;;  %v2424_v11 = vadd.f32 %v2423_v48, %v530_v33  ;;  %6417 = vmatpush2.bf16.msra.mxu1 %v9115_v34  ;;  %v9136_v27 = vld [vmem:[#allocation8 + $0x2d0] ss:$36 sps:$4 sm:$0xff]   ;;  %v9142_v32 = vld [vmem:[#allocation8 + $0x288] ss:$36 sps:$4 sm:$0xff]   ;;  %v10497_v41 = vsub.s32 7, %v10423_v43  ;;  %v542_v48 = vrot.slane %v10463_v22, %v10494_v40 }
 0x1ed   :  { %v2384_v49 = vpop.f32.mrf.mxu0  ;;  %6377 = vmatprep.subr.bf16.mxu0 %v9120_v35  ;;  %v2425_v57 = vpop.f32.mrf.mxu1  ;;  %6418 = vmatprep.subr.bf16.mxu1 %v9123_v39  ;;  %v9145_v33 = vld [vmem:[#allocation8 + $0x708] ss:$36 sps:$4 sm:$0xff]   ;;  %v9159_v39 = vld [vmem:[#allocation8 + $0xf7c] ss:$36 sps:$4 sm:$0xff]  }
 0x1ee   :  { %v2684_v56 = vmax.f32 %v2383_v47, 0.0  ;;  %v2385_v12 = vadd.f32 %v2384_v49, %v526_v37  ;;  %v2686_v16 = vmax.f32 %v2424_v11, 0.0  ;;  %v2426_v61 = vadd.f32 %v2425_v57, %v534_v42  ;;  %v9150_v34 = vld [vmem:[#allocation8 + $0x244] ss:$36 sps:$4 sm:$0xff]  }
 0x1ef   :  { %v2386_v21 = vpop.f32.mrf.mxu0  ;;  %v2427_v2 = vpop.f32.mrf.mxu1  ;;  %v9153_v35 = vld [vmem:[#allocation8 + $0x6c4] ss:$36 sps:$4 sm:$0xff]   ;;  %v510_v42 = vrot.slane %v10435_v60, %v10494_v40  ;;  %v518_v45 = vrot.slane %v10435_v60, %v10497_v41  ;;  %v546_v47 = vrot.slane %v10463_v22, %v10431_v54  ;;  %v550_v43 = vrot.slane %v10463_v22, %v10497_v41 }
 0x1f0   :  { %v10485_v0 = vmax.f32 %v2676_v55, %v2684_v56  ;;  %v2685_v1 = vmax.f32 %v2385_v12, 0.0  ;;  %6378 = vmatpush2.bf16.msra.mxu0 %v9118_v38  ;;  %v10487_v3 = vmax.f32 %v2678_v59, %v2686_v16  ;;  %v2687_v4 = vmax.f32 %v2426_v61, 0.0  ;;  %6419 = vmatpush2.bf16.msra.mxu1 %v9121_v50  ;;  %v9151_v37 = vld [vmem:[#allocation8 + $0x6c0] ss:$36 sps:$4 sm:$0xff]  }
 0x1f1   :  { %v2387_v5 = vpop.f32.mrf.mxu0  ;;  %6379 = vmatprep.subr.bf16.mxu0 %v9126_v53  ;;  %v2428_v46 = vpop.f32.mrf.mxu1  ;;  %6420 = vmatprep.subr.bf16.mxu1 %v9129_v52  ;;  %v9156_v38 = vld [vmem:[#allocation8 + $0xafc] ss:$36 sps:$4 sm:$0xff]   ;;  %v2303_v49 = vadd.f32 %v10445_v18, %v510_v42  ;;  %v2344_v55 = vadd.f32 %v10447_v24, %v518_v45  ;;  %v2680_v60 = vmax.f32 %v10441_v9, 0.0  ;;  %v2682_v59 = vmax.f32 %v10443_v17, 0.0 }
 0x1f2   :  { %v10489_v8 = vmax.f32 %v2677_v62, %v2685_v1  ;;  %v10491_v23 = vmax.f32 %v2679_v63, %v2687_v4 }
 0x1f3   :  { %v2681_v62 = vmax.f32 %v2303_v49, 0.0  ;;  %v2683_v1 = vmax.f32 %v2344_v55, 0.0  ;;  %v9162_v55 = vld [vmem:[#allocation8 + $0xab4] ss:$36 sps:$4 sm:$0xff]  }
 0x1f4   :  { %6380 = vmatpush2.bf16.msra.mxu0 %v9124_v58  ;;  %6421 = vmatpush2.bf16.msra.mxu1 %v9127_v6 }
 0x1f5   :  { %6381 = vmatprep.subr.bf16.mxu0 %v9132_v7  ;;  %6422 = vmatprep.subr.bf16.mxu1 %v9135_v14  ;;  %v10523_v7 = vld [vmem:[#allocation7 + $0x10] sm:$0xff] }
 0x1f6   :  { %v554_v17 = vrot.slane %v10523_v7, %v10452_v10  ;;  %v562_v46 = vrot.slane %v10523_v7, %v10455_v15 }
 0x1f8   :  { %6382 = vmatpush2.bf16.msra.mxu0 %v9130_v13  ;;  %6423 = vmatpush2.bf16.msra.mxu1 %v9133_v25  ;;  %v558_v13 = vrot.slane %v10523_v7, %v10458_v19  ;;  %v566_v25 = vrot.slane %v10523_v7, %v10461_v20 }
 0x1f9   :  { %6383 = vmatprep.subr.bf16.mxu0 %v9138_v26  ;;  %6424 = vmatprep.subr.bf16.mxu1 %v9141_v28 }
 0x1fc   :  { %6384 = vmatpush2.bf16.msra.mxu0 %v9136_v27  ;;  %6425 = vmatpush2.bf16.msra.mxu1 %v9139_v29 }
 0x1fd   :  { %6385 = vmatprep.subr.bf16.mxu0 %v9144_v30  ;;  %6426 = vmatprep.subr.bf16.mxu1 %v9147_v31 }
 0x200   :  { %6386 = vmatpush2.bf16.msra.mxu0 %v9142_v32  ;;  %6427 = vmatpush2.bf16.msra.mxu1 %v9145_v33 }
 0x201   :  { %6387 = vmatprep.subr.bf16.mxu0 %v9150_v34  ;;  %6428 = vmatprep.subr.bf16.mxu1 %v9153_v35 }
 0x204   :  { %6388 = vmatpush2.bf16.msra.mxu0 %v9148_v36  ;;  %6429 = vmatpush2.bf16.msra.mxu1 %v9151_v37 }
 0x205   :  { %6439 = vmatprep.subr.bf16.mxu0 %v9156_v38  ;;  %6480 = vmatprep.subr.bf16.mxu1 %v9159_v39 }
 0x21f   :  { %v2464_v11 = vpop.f32.mrf.mxu0  ;;  %v2505_v53 = vpop.f32.mrf.mxu1 }
 0x220   :  { %v2465_v50 = vadd.f32 %v2464_v11, %v538_v44  ;;  %v2506_v56 = vadd.f32 %v2505_v53, %v546_v47  ;;  %v9157_v53 = vld [vmem:[#allocation8 + $0xf78] ss:$36 sps:$4 sm:$0xff]  }
 0x221   :  { %v2466_v12 = vpop.f32.mrf.mxu0  ;;  %v2507_v52 = vpop.f32.mrf.mxu1 }
 0x222   :  { %v2688_v57 = vmax.f32 %v2465_v50, 0.0  ;;  %v2467_v58 = vadd.f32 %v2466_v12, %v542_v48  ;;  %v2690_v16 = vmax.f32 %v2506_v56, 0.0  ;;  %v2508_v61 = vadd.f32 %v2507_v52, %v550_v43  ;;  %v9154_v43 = vld [vmem:[#allocation8 + $0xaf8] ss:$36 sps:$4 sm:$0xff]   ;;  %v9171_v12 = vld [vmem:[#allocation8 + $0xeec] ss:$36 sps:$4 sm:$0xff]  }
 0x223   :  { %v2468_v21 = vpop.f32.mrf.mxu0  ;;  %v2509_v63 = vpop.f32.mrf.mxu1  ;;  %v9177_v52 = vld [vmem:[#allocation8 + $0xea4] ss:$36 sps:$4 sm:$0xff]  }
 0x224   :  { %v10515_v22 = vmax.f32 %v2680_v60, %v2688_v57  ;;  %v2689_v18 = vmax.f32 %v2467_v58, 0.0  ;;  %v10517_v2 = vmax.f32 %v2682_v59, %v2690_v16  ;;  %v2691_v24 = vmax.f32 %v2508_v61, 0.0  ;;  %v9166_v60 = vld [vmem:[#allocation8 + $0xa68] ss:$36 sps:$4 sm:$0xff]   ;;  %v9172_v59 = vld [vmem:[#allocation8 + $0xa20] ss:$36 sps:$4 sm:$0xff]  }
 0x225   :  { %v2469_v4 = vpop.f32.mrf.mxu0  ;;  %v2510_v9 = vpop.f32.mrf.mxu1  ;;  %v9169_v57 = vld [vmem:[#allocation8 + $0xee8] ss:$36 sps:$4 sm:$0xff]   ;;  %v9175_v16 = vld [vmem:[#allocation8 + $0xea0] ss:$36 sps:$4 sm:$0xff]   ;;  %v9186_v63 = vld [vmem:[#allocation8 + $0x994] ss:$36 sps:$4 sm:$0xff]  }
 0x226   :  { %v10519_v5 = vmax.f32 %v2681_v62, %v2689_v18  ;;  %v10521_v6 = vmax.f32 %v2683_v1, %v2691_v24  ;;  %v9174_v58 = vld [vmem:[#allocation8 + $0xa24] ss:$36 sps:$4 sm:$0xff]   ;;  %v9180_v61 = vld [vmem:[#allocation8 + $0x9dc] ss:$36 sps:$4 sm:$0xff]   ;;  %v9189_v1 = vld [vmem:[#allocation8 + $0xe14] ss:$36 sps:$4 sm:$0xff]  }
 0x227   :  { %v9183_v21 = vld [vmem:[#allocation8 + $0xe5c] ss:$36 sps:$4 sm:$0xff]   ;;  %v9184_v24 = vld [vmem:[#allocation8 + $0x990] ss:$36 sps:$4 sm:$0xff]  }
 0x228   :  { %v9178_v62 = vld [vmem:[#allocation8 + $0x9d8] ss:$36 sps:$4 sm:$0xff]   ;;  %v9187_v4 = vld [vmem:[#allocation8 + $0xe10] ss:$36 sps:$4 sm:$0xff]  }
 0x229   :  { %v9181_v18 = vld [vmem:[#allocation8 + $0xe58] ss:$36 sps:$4 sm:$0xff]   ;;  %v9192_v9 = vld [vmem:[#allocation8 + $0x94c] ss:$36 sps:$4 sm:$0xff]  }
 0x253   :  { %v2546_v14 = vpop.f32.mrf.mxu0  ;;  %v2587_v27 = vpop.f32.mrf.mxu1 }
 0x254   :  { %v2547_v26 = vadd.f32 %v2546_v14, %v554_v17  ;;  %v2588_v28 = vadd.f32 %v2587_v27, %v562_v46  ;;  %v9195_v17 = vld [vmem:[#allocation8 + $0xdcc] ss:$36 sps:$4 sm:$0xff]   ;;  %v9198_v14 = vld [vmem:[#allocation8 + $0x904] ss:$36 sps:$4 sm:$0xff]  }
 0x255   :  { %v2548_v29 = vpop.f32.mrf.mxu0  ;;  %v2589_v32 = vpop.f32.mrf.mxu1  ;;  %v9190_v46 = vld [vmem:[#allocation8 + $0x948] ss:$36 sps:$4 sm:$0xff]   ;;  %v9199_v27 = vld [vmem:[#allocation8 + $0xd80] ss:$36 sps:$4 sm:$0xff]  }
 0x256   :  { %v2692_v30 = vmax.f32 %v2547_v26, 0.0  ;;  %v2549_v31 = vadd.f32 %v2548_v29, %v558_v13  ;;  %v2694_v33 = vmax.f32 %v2588_v28, 0.0  ;;  %v2590_v34 = vadd.f32 %v2589_v32, %v566_v25  ;;  %v9193_v13 = vld [vmem:[#allocation8 + $0xdc8] ss:$36 sps:$4 sm:$0xff]   ;;  %v9196_v26 = vld [vmem:[#allocation8 + $0x900] ss:$36 sps:$4 sm:$0xff]  }
 0x257   :  { %v2550_v35 = vpop.f32.mrf.mxu0  ;;  %v2591_v37 = vpop.f32.mrf.mxu1  ;;  %v9201_v25 = vld [vmem:[#allocation8 + $0xd84] ss:$36 sps:$4 sm:$0xff]   ;;  %v9204_v28 = vld [vmem:[#allocation8 + $0xd3c] ss:$36 sps:$4 sm:$0xff]   ;;  %v9210_v32 = vld [vmem:[#allocation8 + $0xcf4] ss:$36 sps:$4 sm:$0xff]  }
 0x258   :  { %v2693_v36 = vmax.f32 %v2549_v31, 0.0  ;;  %v2708_v38 = vmax.f32 %v10485_v0, %v2692_v30  ;;  %v2695_v39 = vmax.f32 %v2590_v34, 0.0  ;;  %v2710_v44 = vmax.f32 %v10487_v3, %v2694_v33  ;;  %v9165_v0 = vld [vmem:[#allocation8 + $0xf34] ss:$36 sps:$4 sm:$0xff]   ;;  %v9207_v29 = vld [vmem:[#allocation8 + $0x11bc] ss:$36 sps:$4 sm:$0xff]  }
 0x259   :  { %v2551_v42 = vpop.f32.mrf.mxu0  ;;  %v2592_v47 = vpop.f32.mrf.mxu1  ;;  %v9160_v3 = vld [vmem:[#allocation8 + $0xab0] ss:$36 sps:$4 sm:$0xff]   ;;  %v9202_v30 = vld [vmem:[#allocation8 + $0xd38] ss:$36 sps:$4 sm:$0xff]  }
 0x25a   :  { %v2709_v45 = vmax.f32 %v10489_v8, %v2693_v36  ;;  %v2711_v48 = vmax.f32 %v10491_v23, %v2695_v39  ;;  %v10539_v49 = vpack.c.bf16 %v2708_v38, %v2708_v38  ;;  %v10543_v56 = vpack.c.bf16 %v2710_v44, %v2710_v44  ;;  %v9163_v8 = vld [vmem:[#allocation8 + $0xf30] ss:$36 sps:$4 sm:$0xff]   ;;  %v9205_v31 = vld [vmem:[#allocation8 + $0x11b8] ss:$36 sps:$4 sm:$0xff]   ;;  %v9214_v38 = vld [vmem:[#allocation8 + $0xca8] ss:$36 sps:$4 sm:$0xff]  }
 0x25b   :  { %v9168_v23 = vld [vmem:[#allocation8 + $0xa6c] ss:$36 sps:$4 sm:$0xff]   ;;  %v9213_v33 = vld [vmem:[#allocation8 + $0x1174] ss:$36 sps:$4 sm:$0xff]   ;;  %v9222_v42 = vld [vmem:[#allocation8 + $0xc64] ss:$36 sps:$4 sm:$0xff]   ;;  %v574_v44 = vrot.slane %v10523_v7, %v10494_v40 }
 0x25c   :  { %v10537_v11 = vpack.c.bf16 %v2709_v45, %v2709_v45  ;;  %v10541_v50 = vpack.c.bf16 %v2711_v48, %v2711_v48  ;;  %v9208_v34 = vld [vmem:[#allocation8 + $0xcf0] ss:$36 sps:$4 sm:$0xff]   ;;  %v9217_v39 = vld [vmem:[#allocation8 + $0x1128] ss:$36 sps:$4 sm:$0xff]   ;;  %v582_v48 = vrot.slane %v10523_v7, %v10497_v41 }
 0x25d   :  { %v9211_v35 = vld [vmem:[#allocation8 + $0x1170] ss:$36 sps:$4 sm:$0xff]   ;;  %v9225_v45 = vld [vmem:[#allocation8 + $0x10e4] ss:$36 sps:$4 sm:$0xff]  }
 0x25e   :  { %6389 = vmatprep.mubr.bf16.mxu0 %v10537_v11  ;;  %6430 = vmatprep.mubr.bf16.mxu1 %v10541_v50  ;;  %v9216_v36 = vld [vmem:[#allocation8 + $0xcac] ss:$36 sps:$4 sm:$0xff]  }
 0x25f   :  { %6390 = vmatmul.mubr.bf16.vlgmr.msra.gmra.mxu0 %v10539_v49  ;;  %6431 = vmatmul.mubr.bf16.vlgmr.msra.gmra.mxu1 %v10543_v56  ;;  %v9219_v37 = vld [vmem:[#allocation8 + $0x112c] ss:$36 sps:$4 sm:$0xff]  }
 0x260   :  { %6440 = vmatpush1.bf16.msra.mxu0 %v9154_v43  ;;  %6481 = vmatpush1.bf16.msra.mxu1 %v9157_v53  ;;  %v9220_v53 = vld [vmem:[#allocation8 + $0xc60] ss:$36 sps:$4 sm:$0xff]  }
 0x261   :  { %6441 = vmatprep.subr.bf16.mxu0 %v9162_v55  ;;  %6482 = vmatprep.subr.bf16.mxu1 %v9165_v0  ;;  %v9223_v0 = vld [vmem:[#allocation8 + $0x10e0] ss:$36 sps:$4 sm:$0xff]  }
 0x264   :  { %6442 = vmatpush1.bf16.msra.mxu0 %v9160_v3  ;;  %6483 = vmatpush1.bf16.msra.mxu1 %v9163_v8  ;;  %v9228_v3 = vld [vmem:[#allocation8 + $0xc1c] ss:$36 sps:$4 sm:$0xff]  }
 0x265   :  { %6443 = vmatprep.subr.bf16.mxu0 %v9168_v23  ;;  %6484 = vmatprep.subr.bf16.mxu1 %v9171_v12  ;;  %v9231_v12 = vld [vmem:[#allocation8 + $0x109c] ss:$36 sps:$4 sm:$0xff]  }
 0x268   :  { %6444 = vmatpush1.bf16.msra.mxu0 %v9166_v60  ;;  %6485 = vmatpush1.bf16.msra.mxu1 %v9169_v57 }
 0x269   :  { %6445 = vmatprep.subr.bf16.mxu0 %v9174_v58  ;;  %6486 = vmatprep.subr.bf16.mxu1 %v9177_v52  ;;  %v9226_v52 = vld [vmem:[#allocation8 + $0xc18] ss:$36 sps:$4 sm:$0xff]  }
 0x26c   :  { %6446 = vmatpush1.bf16.msra.mxu0 %v9172_v59  ;;  %6487 = vmatpush1.bf16.msra.mxu1 %v9175_v16  ;;  %v570_v16 = vrot.slane %v10523_v7, %v10426_v51 }
 0x26d   :  { %6447 = vmatprep.subr.bf16.mxu0 %v9180_v61  ;;  %6488 = vmatprep.subr.bf16.mxu1 %v9183_v21  ;;  %v9229_v21 = vld [vmem:[#allocation8 + $0x1098] ss:$36 sps:$4 sm:$0xff]  }
 0x270   :  { %6448 = vmatpush1.bf16.msra.mxu0 %v9178_v62  ;;  %6489 = vmatpush1.bf16.msra.mxu1 %v9181_v18  ;;  %v9234_v62 = vld [vmem:[#allocation8 + $0xbd4] ss:$36 sps:$4 sm:$0xff]  }
 0x271   :  { %6449 = vmatprep.subr.bf16.mxu0 %v9186_v63  ;;  %6490 = vmatprep.subr.bf16.mxu1 %v9189_v1  ;;  %v578_v63 = vrot.slane %v10523_v7, %v10431_v54 }
 0x274   :  { %6450 = vmatpush1.bf16.msra.mxu0 %v9184_v24  ;;  %6491 = vmatpush1.bf16.msra.mxu1 %v9187_v4  ;;  %v9237_v24 = vld [vmem:[#allocation8 + $0x1054] ss:$36 sps:$4 sm:$0xff]  }
 0x275   :  { %6451 = vmatprep.subr.bf16.mxu0 %v9192_v9  ;;  %6492 = vmatprep.subr.bf16.mxu1 %v9195_v17 }
 0x278   :  { %6452 = vmatpush1.bf16.msra.mxu0 %v9190_v46  ;;  %6493 = vmatpush1.bf16.msra.mxu1 %v9193_v13  ;;  %v9232_v46 = vld [vmem:[#allocation8 + $0xbd0] ss:$36 sps:$4 sm:$0xff]  }
 0x279   :  { %6453 = vmatprep.subr.bf16.mxu0 %v9198_v14  ;;  %6494 = vmatprep.subr.bf16.mxu1 %v9201_v25  ;;  %v9235_v25 = vld [vmem:[#allocation8 + $0x1050] ss:$36 sps:$4 sm:$0xff]  }
 0x27c   :  { %6454 = vmatpush1.bf16.msra.mxu0 %v9196_v26  ;;  %6495 = vmatpush1.bf16.msra.mxu1 %v9199_v27  ;;  %v9240_v26 = vld [vmem:[#allocation8 + $0xb8c] ss:$36 sps:$4 sm:$0xff]  }
 0x27d   :  { %6455 = vmatprep.subr.bf16.mxu0 %v9204_v28  ;;  %6496 = vmatprep.subr.bf16.mxu1 %v9207_v29  ;;  %v9241_v28 = vld [vmem:[#allocation8 + $0x1008] ss:$36 sps:$4 sm:$0xff]  }
 0x27e   :  { %v9246_v29 = vld [vmem:[#allocation8 + $0xb44] ss:$36 sps:$4 sm:$0xff]  }
 0x280   :  { %6456 = vmatpush2.bf16.msra.mxu0 %v9202_v30  ;;  %6497 = vmatpush2.bf16.msra.mxu1 %v9205_v31  ;;  %v9249_v31 = vld [vmem:[#allocation8 + $0xfc4] ss:$36 sps:$4 sm:$0xff]  }
 0x281   :  { %6457 = vmatprep.subr.bf16.mxu0 %v9210_v32  ;;  %6498 = vmatprep.subr.bf16.mxu1 %v9213_v33  ;;  %v9244_v32 = vld [vmem:[#allocation8 + $0xb40] ss:$36 sps:$4 sm:$0xff]  }
 0x284   :  { %6458 = vmatpush2.bf16.msra.mxu0 %v9208_v34  ;;  %6499 = vmatpush2.bf16.msra.mxu1 %v9211_v35  ;;  %v9247_v34 = vld [vmem:[#allocation8 + $0xfc0] ss:$36 sps:$4 sm:$0xff]  }
 0x285   :  { %6459 = vmatprep.subr.bf16.mxu0 %v9216_v36  ;;  %6500 = vmatprep.subr.bf16.mxu1 %v9219_v37  ;;  %v9252_v35 = vld [vmem:[#allocation8 + $0x204] ss:$36 sps:$4 sm:$0xff]  }
 0x286   :  { %v9255_v37 = vld [vmem:[#allocation8 + $0x684] ss:$36 sps:$4 sm:$0xff]  }
 0x287   :  { %v2628_v47 = vpop.f32.mrf.mxu0  ;;  %v2669_v43 = vpop.f32.mrf.mxu1 }
 0x288   :  { %6460 = vmatpush2.bf16.msra.mxu0 %v9214_v38  ;;  %6501 = vmatpush2.bf16.msra.mxu1 %v9217_v39  ;;  %v2629_v13 = vadd.f32 %v2628_v47, %v570_v16  ;;  %v2670_v27 = vadd.f32 %v2669_v43, %v578_v63  ;;  %v9250_v38 = vld [vmem:[#allocation8 + $0x200] ss:$36 sps:$4 sm:$0xff]   ;;  %v9259_v47 = vld [vmem:[#allocation8 + $0x638] ss:$36 sps:$4 sm:$0xff]   ;;  %v9289_v63 = vld [vmem:[#allocation8 + $0x4d0] ss:$36 sps:$4 sm:$0xff]  }
 0x289   :  { %v2630_v55 = vpop.f32.mrf.mxu0  ;;  %6461 = vmatprep.subr.bf16.mxu0 %v9222_v42  ;;  %v2671_v23 = vpop.f32.mrf.mxu1  ;;  %6502 = vmatprep.subr.bf16.mxu1 %v9225_v45  ;;  %v9253_v42 = vld [vmem:[#allocation8 + $0x680] ss:$36 sps:$4 sm:$0xff]   ;;  %v9267_v43 = vld [vmem:[#allocation8 + $0x5f4] ss:$36 sps:$4 sm:$0xff]  }
 0x28a   :  { %v2631_v8 = vadd.f32 %v2630_v55, %v574_v44  ;;  %v2672_v60 = vadd.f32 %v2671_v23, %v582_v48  ;;  %v2696_v7 = vmax.f32 %v2629_v13, 0.0  ;;  %v2698_v30 = vmax.f32 %v2670_v27, 0.0  ;;  %v9258_v45 = vld [vmem:[#allocation8 + $0x1bc] ss:$36 sps:$4 sm:$0xff]   ;;  %v9264_v48 = vld [vmem:[#allocation8 + $0x174] ss:$36 sps:$4 sm:$0xff]  }
 0x28b   :  { %v2632_v57 = vpop.f32.mrf.mxu0  ;;  %v2673_v59 = vpop.f32.mrf.mxu1  ;;  %v9265_v55 = vld [vmem:[#allocation8 + $0x5f0] ss:$36 sps:$4 sm:$0xff]   ;;  %v9271_v23 = vld [vmem:[#allocation8 + $0x5a8] ss:$36 sps:$4 sm:$0xff]   ;;  %v9280_v16 = vld [vmem:[#allocation8 + $0x98] ss:$36 sps:$4 sm:$0xff]  }
 0x28c   :  { %v2697_v58 = vmax.f32 %v2631_v8, 0.0  ;;  %6462 = vmatpush2.bf16.msra.mxu0 %v9220_v53  ;;  %v2699_v61 = vmax.f32 %v2672_v60, 0.0  ;;  %6503 = vmatpush2.bf16.msra.mxu1 %v9223_v0  ;;  %v2712_v33 = vmax.f32 %v10515_v22, %v2696_v7  ;;  %v2714_v36 = vmax.f32 %v10517_v2, %v2698_v30  ;;  %v9261_v22 = vld [vmem:[#allocation8 + $0x63c] ss:$36 sps:$4 sm:$0xff]   ;;  %v9262_v53 = vld [vmem:[#allocation8 + $0x170] ss:$36 sps:$4 sm:$0xff]  }
 0x28d   :  { %6463 = vmatprep.subr.bf16.mxu0 %v9228_v3  ;;  %v2633_v18 = vpop.f32.mrf.mxu0  ;;  %6504 = vmatprep.subr.bf16.mxu1 %v9231_v12  ;;  %v2674_v4 = vpop.f32.mrf.mxu1  ;;  %v9256_v2 = vld [vmem:[#allocation8 + $0x1b8] ss:$36 sps:$4 sm:$0xff]   ;;  %v9270_v0 = vld [vmem:[#allocation8 + $0x12c] ss:$36 sps:$4 sm:$0xff]   ;;  %v9276_v12 = vld [vmem:[#allocation8 + $0xe4] ss:$36 sps:$4 sm:$0xff]  }
 0x28e   :  { %v2713_v1 = vmax.f32 %v10519_v5, %v2697_v58  ;;  %v2715_v9 = vmax.f32 %v10521_v6, %v2699_v61  ;;  %v9243_v5 = vld [vmem:[#allocation8 + $0x100c] ss:$36 sps:$4 sm:$0xff]   ;;  %v10567_v39 = vpack.c.bf16 %v2712_v33, %v2712_v33  ;;  %v10569_v44 = vpack.c.bf16 %v2714_v36, %v2714_v36  ;;  %v9279_v60 = vld [vmem:[#allocation8 + $0x564] ss:$36 sps:$4 sm:$0xff]   ;;  %v9285_v59 = vld [vmem:[#allocation8 + $0x51c] ss:$36 sps:$4 sm:$0xff]  }
 0x28f   :  { %v9238_v6 = vld [vmem:[#allocation8 + $0xb88] ss:$36 sps:$4 sm:$0xff]   ;;  %v9274_v57 = vld [vmem:[#allocation8 + $0xe0] ss:$36 sps:$4 sm:$0xff]   ;;  %v9283_v61 = vld [vmem:[#allocation8 + $0x518] ss:$36 sps:$4 sm:$0xff]  }
 0x290   :  { %v10559_v17 = vpack.c.bf16 %v2713_v1, %v2713_v1  ;;  %6464 = vmatpush2.bf16.msra.mxu0 %v9226_v52  ;;  %v10561_v14 = vpack.c.bf16 %v2715_v9, %v2715_v9  ;;  %6505 = vmatpush2.bf16.msra.mxu1 %v9229_v21  ;;  %v9273_v3 = vld [vmem:[#allocation8 + $0x5ac] ss:$36 sps:$4 sm:$0xff]   ;;  %v9277_v58 = vld [vmem:[#allocation8 + $0x560] ss:$36 sps:$4 sm:$0xff]   ;;  %v9288_v21 = vld [vmem:[#allocation8 + $0x54] ss:$36 sps:$4 sm:$0xff]  }
 0x291   :  { %6465 = vmatprep.subr.bf16.mxu0 %v9234_v62  ;;  %6506 = vmatprep.subr.bf16.mxu1 %v9237_v24  ;;  %v9268_v8 = vld [vmem:[#allocation8 + $0x128] ss:$36 sps:$4 sm:$0xff]   ;;  %v9282_v52 = vld [vmem:[#allocation8 + $0x9c] ss:$36 sps:$4 sm:$0xff]   ;;  %v9291_v62 = vld [vmem:[#allocation8 + $0x4d4] ss:$36 sps:$4 sm:$0xff]  }
 0x292   :  { %6471 = vmatprep.mubr.bf16.mxu0 %v10559_v17  ;;  %6512 = vmatprep.mubr.bf16.mxu1 %v10561_v14  ;;  %v9286_v18 = vld [vmem:[#allocation8 + $0x50] ss:$36 sps:$4 sm:$0xff]   ;;  %v9292_v4 = vld [vmem:[#allocation8 + $0x8] ss:$36 sps:$4 sm:$0xff]   ;;  %v9306_v27 = vld [vmem:[#allocation8 + $0x3fc] ss:$36 sps:$4 sm:$0xff]  }
 0x293   :  { %v9294_v1 = vld [vmem:[#allocation8 + $0xc] ss:$36 sps:$4 sm:$0xff]   ;;  %v9303_v13 = vld [vmem:[#allocation8 + $0x8c4] ss:$36 sps:$4 sm:$0xff]   ;;  %v9307_v7 = vld [vmem:[#allocation8 + $0x878] ss:$36 sps:$4 sm:$0xff]  }
 0x294   :  { %6466 = vmatpush2.bf16.msra.mxu0 %v9232_v46  ;;  %6507 = vmatpush2.bf16.msra.mxu1 %v9235_v25  ;;  %v9297_v24 = vld [vmem:[#allocation8 + $0x48c] ss:$36 sps:$4 sm:$0xff]   ;;  %v9300_v46 = vld [vmem:[#allocation8 + $0x444] ss:$36 sps:$4 sm:$0xff]  }
 0x295   :  { %6467 = vmatprep.subr.bf16.mxu0 %v9240_v26  ;;  %6508 = vmatprep.subr.bf16.mxu1 %v9243_v5  ;;  %v9295_v9 = vld [vmem:[#allocation8 + $0x488] ss:$36 sps:$4 sm:$0xff]   ;;  %v9298_v25 = vld [vmem:[#allocation8 + $0x440] ss:$36 sps:$4 sm:$0xff]   ;;  %v9310_v30 = vld [vmem:[#allocation8 + $0x3b0] ss:$36 sps:$4 sm:$0xff]  }
 0x296   :  { %v9301_v26 = vld [vmem:[#allocation8 + $0x8c0] ss:$36 sps:$4 sm:$0xff]   ;;  %v9321_v33 = vld [vmem:[#allocation8 + $0x7ec] ss:$36 sps:$4 sm:$0xff]  }
 0x297   :  { %v9309_v5 = vld [vmem:[#allocation8 + $0x87c] ss:$36 sps:$4 sm:$0xff]   ;;  %v9324_v36 = vld [vmem:[#allocation8 + $0x324] ss:$36 sps:$4 sm:$0xff]  }
 0x298   :  { %6468 = vmatpush2.bf16.msra.mxu0 %v9238_v6  ;;  %6509 = vmatpush2.bf16.msra.mxu1 %v9241_v28  ;;  %v9304_v6 = vld [vmem:[#allocation8 + $0x3f8] ss:$36 sps:$4 sm:$0xff]  }
 0x299   :  { %6469 = vmatprep.subr.bf16.mxu0 %v9246_v29  ;;  %6510 = vmatprep.subr.bf16.mxu1 %v9249_v31  ;;  %v9312_v28 = vld [vmem:[#allocation8 + $0x3b4] ss:$36 sps:$4 sm:$0xff]  }
 0x29a   :  { %v9315_v29 = vld [vmem:[#allocation8 + $0x834] ss:$36 sps:$4 sm:$0xff]  }
 0x29b   :  { %v9313_v31 = vld [vmem:[#allocation8 + $0x830] ss:$36 sps:$4 sm:$0xff]  }
 0x29c   :  { %6470 = vmatpush2.bf16.msra.mxu0 %v9244_v32  ;;  %6511 = vmatpush2.bf16.msra.mxu1 %v9247_v34  ;;  %v9318_v32 = vld [vmem:[#allocation8 + $0x36c] ss:$36 sps:$4 sm:$0xff]  }
 0x29d   :  { %6521 = vmatprep.subr.bf16.mxu0 %v9252_v35  ;;  %6562 = vmatprep.subr.bf16.mxu1 %v9255_v37  ;;  %v9316_v34 = vld [vmem:[#allocation8 + $0x368] ss:$36 sps:$4 sm:$0xff]  }
 0x29e   :  { %v9319_v35 = vld [vmem:[#allocation8 + $0x7e8] ss:$36 sps:$4 sm:$0xff]  }
 0x29f   :  { %6472 = vmatmul.mubr.bf16.vlgmr.msra.gmra.mxu0 %v10567_v39  ;;  %6513 = vmatmul.mubr.bf16.vlgmr.msra.gmra.mxu1 %v10569_v44  ;;  %v9327_v37 = vld [vmem:[#allocation8 + $0x7a4] ss:$36 sps:$4 sm:$0xff]  }
 0x2a0   :  { %6522 = vmatpush1.bf16.msra.mxu0 %v9250_v38  ;;  %6553 = vmatprep.mubr.bf16.mxu0 %v10537_v11  ;;  %v9322_v38 = vld [vmem:[#allocation8 + $0x320] ss:$36 sps:$4 sm:$0xff]  }
 0x2a1   :  { %6563 = vmatpush1.bf16.msra.mxu1 %v9253_v42  ;;  %6594 = vmatprep.mubr.bf16.mxu1 %v10541_v50  ;;  %v9325_v42 = vld [vmem:[#allocation8 + $0x7a0] ss:$36 sps:$4 sm:$0xff]  }
 0x2a2   :  { %6523 = vmatprep.subr.bf16.mxu0 %v9258_v45  ;;  %6564 = vmatprep.subr.bf16.mxu1 %v9261_v22  ;;  %v9330_v45 = vld [vmem:[#allocation8 + $0x2dc] ss:$36 sps:$4 sm:$0xff]  }
 0x2a3   :  { %v9333_v22 = vld [vmem:[#allocation8 + $0x75c] ss:$36 sps:$4 sm:$0xff]  }
 0x2a4   :  { %6524 = vmatpush1.bf16.msra.mxu0 %v9256_v2  ;;  %v9328_v2 = vld [vmem:[#allocation8 + $0x2d8] ss:$36 sps:$4 sm:$0xff]  }
 0x2a5   :  { %6565 = vmatpush1.bf16.msra.mxu1 %v9259_v47  ;;  %6525 = vmatprep.subr.bf16.mxu0 %v9264_v48  ;;  %v9331_v47 = vld [vmem:[#allocation8 + $0x758] ss:$36 sps:$4 sm:$0xff]  }
 0x2a6   :  { %6566 = vmatprep.subr.bf16.mxu1 %v9267_v43  ;;  %v9336_v48 = vld [vmem:[#allocation8 + $0x294] ss:$36 sps:$4 sm:$0xff]  }
 0x2a7   :  { %v9339_v43 = vld [vmem:[#allocation8 + $0x714] ss:$36 sps:$4 sm:$0xff]  }
 0x2a8   :  { %6526 = vmatpush1.bf16.msra.mxu0 %v9262_v53  ;;  %v9334_v53 = vld [vmem:[#allocation8 + $0x290] ss:$36 sps:$4 sm:$0xff]  }
 0x2a9   :  { %6567 = vmatpush1.bf16.msra.mxu1 %v9265_v55  ;;  %6527 = vmatprep.subr.bf16.mxu0 %v9270_v0  ;;  %v9337_v55 = vld [vmem:[#allocation8 + $0x710] ss:$36 sps:$4 sm:$0xff]  }
 0x2aa   :  { %6568 = vmatprep.subr.bf16.mxu1 %v9273_v3  ;;  %v9342_v0 = vld [vmem:[#allocation8 + $0x24c] ss:$36 sps:$4 sm:$0xff]  }
 0x2ab   :  { %v9345_v3 = vld [vmem:[#allocation8 + $0x6cc] ss:$36 sps:$4 sm:$0xff]  }
 0x2ac   :  { %6528 = vmatpush1.bf16.msra.mxu0 %v9268_v8  ;;  %v9340_v8 = vld [vmem:[#allocation8 + $0x248] ss:$36 sps:$4 sm:$0xff]  }
 0x2ad   :  { %6569 = vmatpush1.bf16.msra.mxu1 %v9271_v23  ;;  %6529 = vmatprep.subr.bf16.mxu0 %v9276_v12  ;;  %v9343_v23 = vld [vmem:[#allocation8 + $0x6c8] ss:$36 sps:$4 sm:$0xff]  }
 0x2ae   :  { %6570 = vmatprep.subr.bf16.mxu1 %v9279_v60  ;;  %v9348_v12 = vld [vmem:[#allocation8 + $0xb04] ss:$36 sps:$4 sm:$0xff]  }
 0x2af   :  { %v9351_v60 = vld [vmem:[#allocation8 + $0xf84] ss:$36 sps:$4 sm:$0xff]  }
 0x2b0   :  { %6530 = vmatpush1.bf16.msra.mxu0 %v9274_v57  ;;  %v9346_v57 = vld [vmem:[#allocation8 + $0xb00] ss:$36 sps:$4 sm:$0xff]  }
 0x2b1   :  { %6571 = vmatpush1.bf16.msra.mxu1 %v9277_v58  ;;  %6531 = vmatprep.subr.bf16.mxu0 %v9282_v52  ;;  %v9349_v58 = vld [vmem:[#allocation8 + $0xf80] ss:$36 sps:$4 sm:$0xff]  }
 0x2b2   :  { %6572 = vmatprep.subr.bf16.mxu1 %v9285_v59  ;;  %v9354_v52 = vld [vmem:[#allocation8 + $0xabc] ss:$36 sps:$4 sm:$0xff]  }
 0x2b3   :  { %v9357_v59 = vld [vmem:[#allocation8 + $0xf3c] ss:$36 sps:$4 sm:$0xff]  }
 0x2b4   :  { %6532 = vmatpush1.bf16.msra.mxu0 %v9280_v16  ;;  %v9352_v16 = vld [vmem:[#allocation8 + $0xab8] ss:$36 sps:$4 sm:$0xff]  }
 0x2b5   :  { %6573 = vmatpush1.bf16.msra.mxu1 %v9283_v61  ;;  %6533 = vmatprep.subr.bf16.mxu0 %v9288_v21  ;;  %v9355_v61 = vld [vmem:[#allocation8 + $0xf38] ss:$36 sps:$4 sm:$0xff]  }
 0x2b6   :  { %6574 = vmatprep.subr.bf16.mxu1 %v9291_v62  ;;  %v9360_v21 = vld [vmem:[#allocation8 + $0xa74] ss:$36 sps:$4 sm:$0xff]  }
 0x2b7   :  { %v9363_v62 = vld [vmem:[#allocation8 + $0xef4] ss:$36 sps:$4 sm:$0xff]  }
 0x2b8   :  { %6534 = vmatpush1.bf16.msra.mxu0 %v9286_v18  ;;  %v9358_v18 = vld [vmem:[#allocation8 + $0xa70] ss:$36 sps:$4 sm:$0xff]  }
 0x2b9   :  { %6575 = vmatpush1.bf16.msra.mxu1 %v9289_v63  ;;  %6535 = vmatprep.subr.bf16.mxu0 %v9294_v1  ;;  %v9361_v63 = vld [vmem:[#allocation8 + $0xef0] ss:$36 sps:$4 sm:$0xff]  }
 0x2ba   :  { %6576 = vmatprep.subr.bf16.mxu1 %v9297_v24  ;;  %v9366_v1 = vld [vmem:[#allocation8 + $0xa2c] ss:$36 sps:$4 sm:$0xff]  }
 0x2bb   :  { %v9369_v24 = vld [vmem:[#allocation8 + $0xeac] ss:$36 sps:$4 sm:$0xff]  }
 0x2bc   :  { %6536 = vmatpush1.bf16.msra.mxu0 %v9292_v4  ;;  %v9364_v4 = vld [vmem:[#allocation8 + $0xa28] ss:$36 sps:$4 sm:$0xff]  }
 0x2bd   :  { %6577 = vmatpush1.bf16.msra.mxu1 %v9295_v9  ;;  %6537 = vmatprep.subr.bf16.mxu0 %v9300_v46  ;;  %v9367_v9 = vld [vmem:[#allocation8 + $0xea8] ss:$36 sps:$4 sm:$0xff]  }
 0x2be   :  { %6578 = vmatprep.subr.bf16.mxu1 %v9303_v13  ;;  %v9372_v46 = vld [vmem:[#allocation8 + $0x9e4] ss:$36 sps:$4 sm:$0xff]  }
 0x2bf   :  { %v9375_v13 = vld [vmem:[#allocation8 + $0xe64] ss:$36 sps:$4 sm:$0xff]  }
 0x2c0   :  { %6538 = vmatpush2.bf16.msra.mxu0 %v9298_v25  ;;  %v9370_v25 = vld [vmem:[#allocation8 + $0x9e0] ss:$36 sps:$4 sm:$0xff]  }
 0x2c1   :  { %6579 = vmatpush2.bf16.msra.mxu1 %v9301_v26  ;;  %6539 = vmatprep.subr.bf16.mxu0 %v9306_v27  ;;  %v9373_v26 = vld [vmem:[#allocation8 + $0xe60] ss:$36 sps:$4 sm:$0xff]  }
 0x2c2   :  { %6580 = vmatprep.subr.bf16.mxu1 %v9309_v5  ;;  %v9378_v27 = vld [vmem:[#allocation8 + $0x99c] ss:$36 sps:$4 sm:$0xff]  }
 0x2c3   :  { %v9381_v5 = vld [vmem:[#allocation8 + $0xe1c] ss:$36 sps:$4 sm:$0xff]  }
 0x2c4   :  { %6540 = vmatpush2.bf16.msra.mxu0 %v9304_v6  ;;  %v9376_v6 = vld [vmem:[#allocation8 + $0x998] ss:$36 sps:$4 sm:$0xff]  }
 0x2c5   :  { %6581 = vmatpush2.bf16.msra.mxu1 %v9307_v7  ;;  %6541 = vmatprep.subr.bf16.mxu0 %v9312_v28  ;;  %v9379_v7 = vld [vmem:[#allocation8 + $0xe18] ss:$36 sps:$4 sm:$0xff]  }
 0x2c6   :  { %6582 = vmatprep.subr.bf16.mxu1 %v9315_v29  ;;  %v9384_v28 = vld [vmem:[#allocation8 + $0x954] ss:$36 sps:$4 sm:$0xff]  }
 0x2c7   :  { %v9387_v29 = vld [vmem:[#allocation8 + $0xdd4] ss:$36 sps:$4 sm:$0xff]  }
 0x2c8   :  { %6542 = vmatpush2.bf16.msra.mxu0 %v9310_v30  ;;  %v9382_v30 = vld [vmem:[#allocation8 + $0x950] ss:$36 sps:$4 sm:$0xff]  }
 0x2c9   :  { %6583 = vmatpush2.bf16.msra.mxu1 %v9313_v31  ;;  %6543 = vmatprep.subr.bf16.mxu0 %v9318_v32  ;;  %v9385_v31 = vld [vmem:[#allocation8 + $0xdd0] ss:$36 sps:$4 sm:$0xff]  }
 0x2ca   :  { %6584 = vmatprep.subr.bf16.mxu1 %v9321_v33  ;;  %v9390_v32 = vld [vmem:[#allocation8 + $0x90c] ss:$36 sps:$4 sm:$0xff]  }
 0x2cb   :  { %v9393_v33 = vld [vmem:[#allocation8 + $0xd8c] ss:$36 sps:$4 sm:$0xff]  }
 0x2cc   :  { %6544 = vmatpush2.bf16.msra.mxu0 %v9316_v34  ;;  %v9388_v34 = vld [vmem:[#allocation8 + $0x908] ss:$36 sps:$4 sm:$0xff]  }
 0x2cd   :  { %6585 = vmatpush2.bf16.msra.mxu1 %v9319_v35  ;;  %6545 = vmatprep.subr.bf16.mxu0 %v9324_v36  ;;  %v9391_v35 = vld [vmem:[#allocation8 + $0xd88] ss:$36 sps:$4 sm:$0xff]  }
 0x2ce   :  { %6586 = vmatprep.subr.bf16.mxu1 %v9327_v37  ;;  %v9396_v36 = vld [vmem:[#allocation8 + $0xd44] ss:$36 sps:$4 sm:$0xff]  }
 0x2cf   :  { %v9399_v37 = vld [vmem:[#allocation8 + $0x11c4] ss:$36 sps:$4 sm:$0xff]  }
 0x2d0   :  { %6546 = vmatpush2.bf16.msra.mxu0 %v9322_v38  ;;  %v9394_v38 = vld [vmem:[#allocation8 + $0xd40] ss:$36 sps:$4 sm:$0xff]  }
 0x2d1   :  { %6587 = vmatpush2.bf16.msra.mxu1 %v9325_v42  ;;  %6547 = vmatprep.subr.bf16.mxu0 %v9330_v45  ;;  %v9397_v42 = vld [vmem:[#allocation8 + $0x11c0] ss:$36 sps:$4 sm:$0xff]  }
 0x2d2   :  { %6588 = vmatprep.subr.bf16.mxu1 %v9333_v22  ;;  %v9402_v45 = vld [vmem:[#allocation8 + $0xcfc] ss:$36 sps:$4 sm:$0xff]  }
 0x2d3   :  { %v9405_v22 = vld [vmem:[#allocation8 + $0x117c] ss:$36 sps:$4 sm:$0xff]  }
 0x2d4   :  { %6548 = vmatpush2.bf16.msra.mxu0 %v9328_v2  ;;  %v9400_v2 = vld [vmem:[#allocation8 + $0xcf8] ss:$36 sps:$4 sm:$0xff]  }
 0x2d5   :  { %6589 = vmatpush2.bf16.msra.mxu1 %v9331_v47  ;;  %6549 = vmatprep.subr.bf16.mxu0 %v9336_v48  ;;  %v9403_v47 = vld [vmem:[#allocation8 + $0x1178] ss:$36 sps:$4 sm:$0xff]  }
 0x2d6   :  { %6590 = vmatprep.subr.bf16.mxu1 %v9339_v43  ;;  %v9408_v48 = vld [vmem:[#allocation8 + $0xcb4] ss:$36 sps:$4 sm:$0xff]  }
 0x2d7   :  { %v9411_v43 = vld [vmem:[#allocation8 + $0x1134] ss:$36 sps:$4 sm:$0xff]  }
 0x2d8   :  { %6550 = vmatpush2.bf16.msra.mxu0 %v9334_v53  ;;  %v9406_v53 = vld [vmem:[#allocation8 + $0xcb0] ss:$36 sps:$4 sm:$0xff]  }
 0x2d9   :  { %6591 = vmatpush2.bf16.msra.mxu1 %v9337_v55  ;;  %6551 = vmatprep.subr.bf16.mxu0 %v9342_v0  ;;  %v9409_v55 = vld [vmem:[#allocation8 + $0x1130] ss:$36 sps:$4 sm:$0xff]  }
 0x2da   :  { %6592 = vmatprep.subr.bf16.mxu1 %v9345_v3  ;;  %v9414_v0 = vld [vmem:[#allocation8 + $0xc6c] ss:$36 sps:$4 sm:$0xff]  }
 0x2db   :  { %v9417_v3 = vld [vmem:[#allocation8 + $0x10ec] ss:$36 sps:$4 sm:$0xff]  }
 0x2dc   :  { %6552 = vmatpush2.bf16.msra.mxu0 %v9340_v8  ;;  %v9412_v8 = vld [vmem:[#allocation8 + $0xc68] ss:$36 sps:$4 sm:$0xff]  }
 0x2dd   :  { %6593 = vmatpush2.bf16.msra.mxu1 %v9343_v23  ;;  %6603 = vmatprep.subr.bf16.mxu0 %v9348_v12  ;;  %v9415_v23 = vld [vmem:[#allocation8 + $0x10e8] ss:$36 sps:$4 sm:$0xff]  }
 0x2de   :  { %6644 = vmatprep.subr.bf16.mxu1 %v9351_v60  ;;  %v9420_v12 = vld [vmem:[#allocation8 + $0xc24] ss:$36 sps:$4 sm:$0xff]  }
 0x2df   :  { %6554 = vmatmul.mubr.bf16.vlgmr.msra.gmra.mxu0 %v10539_v49  ;;  %v9423_v60 = vld [vmem:[#allocation8 + $0x10a4] ss:$36 sps:$4 sm:$0xff]  }
 0x2e0   :  { %6595 = vmatmul.mubr.bf16.vlgmr.msra.gmra.mxu1 %v10543_v56  ;;  %6604 = vmatpush1.bf16.msra.mxu0 %v9346_v57  ;;  %v9418_v57 = vld [vmem:[#allocation8 + $0xc20] ss:$36 sps:$4 sm:$0xff]  }
 0x2e1   :  { %6635 = vmatprep.mubr.bf16.mxu0 %v10559_v17  ;;  %6645 = vmatpush1.bf16.msra.mxu1 %v9349_v58  ;;  %v9421_v58 = vld [vmem:[#allocation8 + $0x10a0] ss:$36 sps:$4 sm:$0xff]  }
 0x2e2   :  { %6676 = vmatprep.mubr.bf16.mxu1 %v10561_v14  ;;  %6605 = vmatprep.subr.bf16.mxu0 %v9354_v52  ;;  %v9426_v52 = vld [vmem:[#allocation8 + $0xbdc] ss:$36 sps:$4 sm:$0xff]  }
 0x2e3   :  { %6646 = vmatprep.subr.bf16.mxu1 %v9357_v59  ;;  %v9429_v59 = vld [vmem:[#allocation8 + $0x105c] ss:$36 sps:$4 sm:$0xff]  }
 0x2e4   :  { %6606 = vmatpush1.bf16.msra.mxu0 %v9352_v16  ;;  %v9424_v16 = vld [vmem:[#allocation8 + $0xbd8] ss:$36 sps:$4 sm:$0xff]  }
 0x2e5   :  { %6647 = vmatpush1.bf16.msra.mxu1 %v9355_v61  ;;  %6607 = vmatprep.subr.bf16.mxu0 %v9360_v21  ;;  %v9427_v61 = vld [vmem:[#allocation8 + $0x1058] ss:$36 sps:$4 sm:$0xff]  }
 0x2e6   :  { %6648 = vmatprep.subr.bf16.mxu1 %v9363_v62  ;;  %v9432_v21 = vld [vmem:[#allocation8 + $0xb94] ss:$36 sps:$4 sm:$0xff]  }
 0x2e7   :  { %v9435_v62 = vld [vmem:[#allocation8 + $0x1014] ss:$36 sps:$4 sm:$0xff]  }
 0x2e8   :  { %6608 = vmatpush1.bf16.msra.mxu0 %v9358_v18  ;;  %v9430_v18 = vld [vmem:[#allocation8 + $0xb90] ss:$36 sps:$4 sm:$0xff]  }
 0x2e9   :  { %6649 = vmatpush1.bf16.msra.mxu1 %v9361_v63  ;;  %6609 = vmatprep.subr.bf16.mxu0 %v9366_v1  ;;  %v9433_v63 = vld [vmem:[#allocation8 + $0x1010] ss:$36 sps:$4 sm:$0xff]  }
 0x2ea   :  { %6650 = vmatprep.subr.bf16.mxu1 %v9369_v24  ;;  %v9438_v1 = vld [vmem:[#allocation8 + $0xb4c] ss:$36 sps:$4 sm:$0xff]  }
 0x2eb   :  { %v9441_v24 = vld [vmem:[#allocation8 + $0xfcc] ss:$36 sps:$4 sm:$0xff]  }
 0x2ec   :  { %6610 = vmatpush1.bf16.msra.mxu0 %v9364_v4  ;;  %v9436_v4 = vld [vmem:[#allocation8 + $0xb48] ss:$36 sps:$4 sm:$0xff]  }
 0x2ed   :  { %6651 = vmatpush1.bf16.msra.mxu1 %v9367_v9  ;;  %6611 = vmatprep.subr.bf16.mxu0 %v9372_v46  ;;  %v9439_v9 = vld [vmem:[#allocation8 + $0xfc8] ss:$36 sps:$4 sm:$0xff]  }
 0x2ee   :  { %6652 = vmatprep.subr.bf16.mxu1 %v9375_v13  ;;  %v9444_v46 = vld [vmem:[#allocation8 + $0x20c] ss:$36 sps:$4 sm:$0xff]   ;;  %v10579_v13 = vld [vmem:[#allocation10] sm:$0xff] }
 0x2f0   :  { %6612 = vmatpush1.bf16.msra.mxu0 %v9370_v25  ;;  %v9447_v25 = vld [vmem:[#allocation8 + $0x68c] ss:$36 sps:$4 sm:$0xff]  }
 0x2f1   :  { %6653 = vmatpush1.bf16.msra.mxu1 %v9373_v26  ;;  %6613 = vmatprep.subr.bf16.mxu0 %v9378_v27  ;;  %v9442_v26 = vld [vmem:[#allocation8 + $0x208] ss:$36 sps:$4 sm:$0xff]   ;;  %v3371_v27 = vrot.slane %v10579_v13, %v10452_v10 }
 0x2f2   :  { %6654 = vmatprep.subr.bf16.mxu1 %v9381_v5  ;;  %v9445_v5 = vld [vmem:[#allocation8 + $0x688] ss:$36 sps:$4 sm:$0xff]  }
 0x2f4   :  { %6614 = vmatpush1.bf16.msra.mxu0 %v9376_v6  ;;  %v3375_v6 = vrot.slane %v10579_v13, %v10458_v19 }
 0x2f5   :  { %6655 = vmatpush1.bf16.msra.mxu1 %v9379_v7  ;;  %6615 = vmatprep.subr.bf16.mxu0 %v9384_v28  ;;  %v9450_v7 = vld [vmem:[#allocation8 + $0x1c4] ss:$36 sps:$4 sm:$0xff]  }
 0x2f6   :  { %6656 = vmatprep.subr.bf16.mxu1 %v9387_v29  ;;  %v9453_v29 = vld [vmem:[#allocation8 + $0x644] ss:$36 sps:$4 sm:$0xff]  }
 0x2f8   :  { %6616 = vmatpush1.bf16.msra.mxu0 %v9382_v30 }
 0x2f9   :  { %6657 = vmatpush1.bf16.msra.mxu1 %v9385_v31  ;;  %6617 = vmatprep.subr.bf16.mxu0 %v9390_v32  ;;  %v9448_v32 = vld [vmem:[#allocation8 + $0x1c0] ss:$36 sps:$4 sm:$0xff]  }
 0x2fa   :  { %6658 = vmatprep.subr.bf16.mxu1 %v9393_v33 }
 0x2fc   :  { %6618 = vmatpush1.bf16.msra.mxu0 %v9388_v34  ;;  %v9451_v34 = vld [vmem:[#allocation8 + $0x640] ss:$36 sps:$4 sm:$0xff]  }
 0x2fd   :  { %6659 = vmatpush1.bf16.msra.mxu1 %v9391_v35  ;;  %6619 = vmatprep.subr.bf16.mxu0 %v9396_v36  ;;  %v9456_v35 = vld [vmem:[#allocation8 + $0x17c] ss:$36 sps:$4 sm:$0xff]  }
 0x2fe   :  { %6660 = vmatprep.subr.bf16.mxu1 %v9399_v37 }
 0x300   :  { %6620 = vmatpush2.bf16.msra.mxu0 %v9394_v38 }
 0x301   :  { %6661 = vmatpush2.bf16.msra.mxu1 %v9397_v42  ;;  %6621 = vmatprep.subr.bf16.mxu0 %v9402_v45  ;;  %v9459_v42 = vld [vmem:[#allocation8 + $0x5fc] ss:$36 sps:$4 sm:$0xff]  }
 0x302   :  { %6662 = vmatprep.subr.bf16.mxu1 %v9405_v22 }
 0x304   :  { %6622 = vmatpush2.bf16.msra.mxu0 %v9400_v2 }
 0x305   :  { %6663 = vmatpush2.bf16.msra.mxu1 %v9403_v47  ;;  %6623 = vmatprep.subr.bf16.mxu0 %v9408_v48  ;;  %v9454_v47 = vld [vmem:[#allocation8 + $0x178] ss:$36 sps:$4 sm:$0xff]  }
 0x306   :  { %6664 = vmatprep.subr.bf16.mxu1 %v9411_v43  ;;  %v9457_v43 = vld [vmem:[#allocation8 + $0x5f8] ss:$36 sps:$4 sm:$0xff]  }
 0x308   :  { %6624 = vmatpush2.bf16.msra.mxu0 %v9406_v53  ;;  %v9462_v53 = vld [vmem:[#allocation8 + $0x134] ss:$36 sps:$4 sm:$0xff]  }
 0x309   :  { %6665 = vmatpush2.bf16.msra.mxu1 %v9409_v55  ;;  %6625 = vmatprep.subr.bf16.mxu0 %v9414_v0  ;;  %v9465_v0 = vld [vmem:[#allocation8 + $0x5b4] ss:$36 sps:$4 sm:$0xff]  }
 0x30a   :  { %6666 = vmatprep.subr.bf16.mxu1 %v9417_v3  ;;  %v9460_v3 = vld [vmem:[#allocation8 + $0x130] ss:$36 sps:$4 sm:$0xff]  }
 0x30c   :  { %6626 = vmatpush2.bf16.msra.mxu0 %v9412_v8  ;;  %v9463_v8 = vld [vmem:[#allocation8 + $0x5b0] ss:$36 sps:$4 sm:$0xff]  }
 0x30d   :  { %6667 = vmatpush2.bf16.msra.mxu1 %v9415_v23  ;;  %6627 = vmatprep.subr.bf16.mxu0 %v9420_v12  ;;  %v9468_v23 = vld [vmem:[#allocation8 + $0xec] ss:$36 sps:$4 sm:$0xff]  }
 0x30e   :  { %6668 = vmatprep.subr.bf16.mxu1 %v9423_v60  ;;  %v9471_v12 = vld [vmem:[#allocation8 + $0x56c] ss:$36 sps:$4 sm:$0xff]  }
 0x30f   :  { %v9466_v60 = vld [vmem:[#allocation8 + $0xe8] ss:$36 sps:$4 sm:$0xff]  }
 0x310   :  { %6628 = vmatpush2.bf16.msra.mxu0 %v9418_v57  ;;  %v9469_v57 = vld [vmem:[#allocation8 + $0x568] ss:$36 sps:$4 sm:$0xff]  }
 0x311   :  { %6669 = vmatpush2.bf16.msra.mxu1 %v9421_v58  ;;  %6629 = vmatprep.subr.bf16.mxu0 %v9426_v52  ;;  %v9474_v58 = vld [vmem:[#allocation8 + $0xa4] ss:$36 sps:$4 sm:$0xff]  }
 0x312   :  { %6670 = vmatprep.subr.bf16.mxu1 %v9429_v59  ;;  %v9477_v52 = vld [vmem:[#allocation8 + $0x524] ss:$36 sps:$4 sm:$0xff]  }
 0x313   :  { %v9472_v59 = vld [vmem:[#allocation8 + $0xa0] ss:$36 sps:$4 sm:$0xff]  }
 0x314   :  { %6630 = vmatpush2.bf16.msra.mxu0 %v9424_v16  ;;  %v9475_v16 = vld [vmem:[#allocation8 + $0x520] ss:$36 sps:$4 sm:$0xff]  }
 0x315   :  { %6671 = vmatpush2.bf16.msra.mxu1 %v9427_v61  ;;  %6631 = vmatprep.subr.bf16.mxu0 %v9432_v21  ;;  %v9480_v61 = vld [vmem:[#allocation8 + $0x5c] ss:$36 sps:$4 sm:$0xff]  }
 0x316   :  { %6672 = vmatprep.subr.bf16.mxu1 %v9435_v62  ;;  %v9483_v21 = vld [vmem:[#allocation8 + $0x4dc] ss:$36 sps:$4 sm:$0xff]  }
 0x317   :  { %v9478_v62 = vld [vmem:[#allocation8 + $0x58] ss:$36 sps:$4 sm:$0xff]  }
 0x318   :  { %6632 = vmatpush2.bf16.msra.mxu0 %v9430_v18  ;;  %v9481_v18 = vld [vmem:[#allocation8 + $0x4d8] ss:$36 sps:$4 sm:$0xff]  }
 0x319   :  { %6673 = vmatpush2.bf16.msra.mxu1 %v9433_v63  ;;  %6633 = vmatprep.subr.bf16.mxu0 %v9438_v1  ;;  %v9486_v63 = vld [vmem:[#allocation8 + $0x14] ss:$36 sps:$4 sm:$0xff]  }
 0x31a   :  { %6674 = vmatprep.subr.bf16.mxu1 %v9441_v24  ;;  %v9489_v1 = vld [vmem:[#allocation8 + $0x494] ss:$36 sps:$4 sm:$0xff]  }
 0x31b   :  { %v9484_v24 = vld [vmem:[#allocation8 + $0x10] ss:$36 sps:$4 sm:$0xff]  }
 0x31c   :  { %6634 = vmatpush2.bf16.msra.mxu0 %v9436_v4  ;;  %v9487_v4 = vld [vmem:[#allocation8 + $0x490] ss:$36 sps:$4 sm:$0xff]  }
 0x31d   :  { %6675 = vmatpush2.bf16.msra.mxu1 %v9439_v9  ;;  %6685 = vmatprep.subr.bf16.mxu0 %v9444_v46  ;;  %v9492_v9 = vld [vmem:[#allocation8 + $0x44c] ss:$36 sps:$4 sm:$0xff]  }
 0x31e   :  { %6726 = vmatprep.subr.bf16.mxu1 %v9447_v25  ;;  %v9495_v46 = vld [vmem:[#allocation8 + $0x8cc] ss:$36 sps:$4 sm:$0xff]  }
 0x31f   :  { %6636 = vmatmul.mubr.bf16.vlgmr.msra.gmra.mxu0 %v10567_v39  ;;  %v6391_v28 = vpop.f32.mrf.mxu0  ;;  %v6432_v31 = vpop.f32.mrf.mxu1  ;;  %v9490_v25 = vld [vmem:[#allocation8 + $0x448] ss:$36 sps:$4 sm:$0xff]  }
 0x320   :  { %6677 = vmatmul.mubr.bf16.vlgmr.msra.gmra.mxu1 %v10569_v44  ;;  %v6392_v30 = vadd.f32 %v6391_v28, %v3371_v27  ;;  %6686 = vmatpush1.bf16.msra.mxu0 %v9442_v26  ;;  %v9493_v26 = vld [vmem:[#allocation8 + $0x8c8] ss:$36 sps:$4 sm:$0xff]   ;;  %v9504_v28 = vld [vmem:[#allocation8 + $0x3bc] ss:$36 sps:$4 sm:$0xff]  }
 0x321   :  { %6717 = vmatprep.mubr.bf16.mxu0 %v10537_v11  ;;  %6727 = vmatpush1.bf16.msra.mxu1 %v9445_v5  ;;  %v6393_v33 = vpop.f32.mrf.mxu0  ;;  %v6434_v38 = vpop.f32.mrf.mxu1  ;;  %v9498_v27 = vld [vmem:[#allocation8 + $0x404] ss:$36 sps:$4 sm:$0xff]  }
 0x322   :  { %v10588_v36 = vadd.f32 %v6432_v31, %v6392_v30  ;;  %6758 = vmatprep.mubr.bf16.mxu1 %v10541_v50  ;;  %v6394_v37 = vadd.f32 %v6393_v33, %v3375_v6  ;;  %6687 = vmatprep.subr.bf16.mxu0 %v9450_v7  ;;  %v9501_v5 = vld [vmem:[#allocation8 + $0x884] ss:$36 sps:$4 sm:$0xff]   ;;  %v9502_v30 = vld [vmem:[#allocation8 + $0x3b8] ss:$36 sps:$4 sm:$0xff]  }
 0x323   :  { %6728 = vmatprep.subr.bf16.mxu1 %v9453_v29  ;;  %v6395_v45 = vpop.f32.mrf.mxu0  ;;  %v6436_v2 = vpop.f32.mrf.mxu1  ;;  %v9496_v6 = vld [vmem:[#allocation8 + $0x400] ss:$36 sps:$4 sm:$0xff]   ;;  %v9505_v31 = vld [vmem:[#allocation8 + $0x838] ss:$36 sps:$4 sm:$0xff]  }
 0x324   :  { %v10591_v22 = vadd.f32 %v6434_v38, %v6394_v37  ;;  %6688 = vmatpush1.bf16.msra.mxu0 %v9448_v32  ;;  %v9499_v7 = vld [vmem:[#allocation8 + $0x880] ss:$36 sps:$4 sm:$0xff]   ;;  %v9510_v32 = vld [vmem:[#allocation8 + $0x374] ss:$36 sps:$4 sm:$0xff]   ;;  %v9516_v37 = vld [vmem:[#allocation8 + $0x32c] ss:$36 sps:$4 sm:$0xff]  }
 0x325   :  { %6729 = vmatpush1.bf16.msra.mxu1 %v9451_v34  ;;  %v6396_v48 = vpop.f32.mrf.mxu0  ;;  %6689 = vmatprep.subr.bf16.mxu0 %v9456_v35  ;;  %v6437_v55 = vpop.f32.mrf.mxu1  ;;  %v9507_v29 = vld [vmem:[#allocation8 + $0x83c] ss:$36 sps:$4 sm:$0xff]   ;;  %v9513_v33 = vld [vmem:[#allocation8 + $0x7f4] ss:$36 sps:$4 sm:$0xff]   ;;  %v9519_v38 = vld [vmem:[#allocation8 + $0x7ac] ss:$36 sps:$4 sm:$0xff]  }
 0x326   :  { %6730 = vmatprep.subr.bf16.mxu1 %v9459_v42  ;;  %v9508_v34 = vld [vmem:[#allocation8 + $0x370] ss:$36 sps:$4 sm:$0xff]   ;;  %v9514_v42 = vld [vmem:[#allocation8 + $0x328] ss:$36 sps:$4 sm:$0xff]   ;;  %v9520_v48 = vld [vmem:[#allocation8 + $0x2e0] ss:$36 sps:$4 sm:$0xff]  }
 0x327   :  { %v9511_v35 = vld [vmem:[#allocation8 + $0x7f0] ss:$36 sps:$4 sm:$0xff]   ;;  %v9517_v45 = vld [vmem:[#allocation8 + $0x7a8] ss:$36 sps:$4 sm:$0xff]   ;;  %v9531_v55 = vld [vmem:[#allocation8 + $0x71c] ss:$36 sps:$4 sm:$0xff]  }
 0x328   :  { %6690 = vmatpush1.bf16.msra.mxu0 %v9454_v47  ;;  %v9522_v2 = vld [vmem:[#allocation8 + $0x2e4] ss:$36 sps:$4 sm:$0xff]  }
 0x329   :  { %6731 = vmatpush1.bf16.msra.mxu1 %v9457_v43  ;;  %6691 = vmatprep.subr.bf16.mxu0 %v9462_v53  ;;  %v9525_v47 = vld [vmem:[#allocation8 + $0x764] ss:$36 sps:$4 sm:$0xff]   ;;  %v9528_v53 = vld [vmem:[#allocation8 + $0x29c] ss:$36 sps:$4 sm:$0xff]  }
 0x32a   :  { %6732 = vmatprep.subr.bf16.mxu1 %v9465_v0  ;;  %v9523_v43 = vld [vmem:[#allocation8 + $0x760] ss:$36 sps:$4 sm:$0xff]   ;;  %v9526_v0 = vld [vmem:[#allocation8 + $0x298] ss:$36 sps:$4 sm:$0xff]  }
 0x32c   :  { %6692 = vmatpush1.bf16.msra.mxu0 %v9460_v3  ;;  %v9529_v3 = vld [vmem:[#allocation8 + $0x718] ss:$36 sps:$4 sm:$0xff]  }
 0x32d   :  { %6733 = vmatpush1.bf16.msra.mxu1 %v9463_v8  ;;  %6693 = vmatprep.subr.bf16.mxu0 %v9468_v23  ;;  %v9534_v8 = vld [vmem:[#allocation8 + $0x254] ss:$36 sps:$4 sm:$0xff]  }
 0x32e   :  { %6734 = vmatprep.subr.bf16.mxu1 %v9471_v12  ;;  %v9537_v23 = vld [vmem:[#allocation8 + $0x6d4] ss:$36 sps:$4 sm:$0xff]  }
 0x32f   :  { %v9532_v12 = vld [vmem:[#allocation8 + $0x250] ss:$36 sps:$4 sm:$0xff]  }
 0x330   :  { %6694 = vmatpush1.bf16.msra.mxu0 %v9466_v60  ;;  %v9535_v60 = vld [vmem:[#allocation8 + $0x6d0] ss:$36 sps:$4 sm:$0xff]  }
 0x331   :  { %6735 = vmatpush1.bf16.msra.mxu1 %v9469_v57  ;;  %6695 = vmatprep.subr.bf16.mxu0 %v9474_v58  ;;  %v9540_v57 = vld [vmem:[#allocation8 + $0xb0c] ss:$36 sps:$4 sm:$0xff]  }
 0x332   :  { %6736 = vmatprep.subr.bf16.mxu1 %v9477_v52  ;;  %v9543_v58 = vld [vmem:[#allocation8 + $0xf8c] ss:$36 sps:$4 sm:$0xff]  }
 0x333   :  { %v9538_v52 = vld [vmem:[#allocation8 + $0xb08] ss:$36 sps:$4 sm:$0xff]  }
 0x334   :  { %6696 = vmatpush1.bf16.msra.mxu0 %v9472_v59  ;;  %v9541_v59 = vld [vmem:[#allocation8 + $0xf88] ss:$36 sps:$4 sm:$0xff]  }
 0x335   :  { %6737 = vmatpush1.bf16.msra.mxu1 %v9475_v16  ;;  %6697 = vmatprep.subr.bf16.mxu0 %v9480_v61  ;;  %v9546_v16 = vld [vmem:[#allocation8 + $0xac4] ss:$36 sps:$4 sm:$0xff]  }
 0x336   :  { %6738 = vmatprep.subr.bf16.mxu1 %v9483_v21  ;;  %v9549_v21 = vld [vmem:[#allocation8 + $0xf44] ss:$36 sps:$4 sm:$0xff]  }
 0x338   :  { %6698 = vmatpush1.bf16.msra.mxu0 %v9478_v62 }
 0x339   :  { %6739 = vmatpush1.bf16.msra.mxu1 %v9481_v18  ;;  %6699 = vmatprep.subr.bf16.mxu0 %v9486_v63  ;;  %v9544_v63 = vld [vmem:[#allocation8 + $0xac0] ss:$36 sps:$4 sm:$0xff]  }
 0x33a   :  { %6740 = vmatprep.subr.bf16.mxu1 %v9489_v1 }
 0x33c   :  { %6700 = vmatpush1.bf16.msra.mxu0 %v9484_v24  ;;  %v9547_v24 = vld [vmem:[#allocation8 + $0xf40] ss:$36 sps:$4 sm:$0xff]  }
 0x33d   :  { %6741 = vmatpush1.bf16.msra.mxu1 %v9487_v4  ;;  %6701 = vmatprep.subr.bf16.mxu0 %v9492_v9  ;;  %v9552_v4 = vld [vmem:[#allocation8 + $0xa7c] ss:$36 sps:$4 sm:$0xff]  }
 0x33e   :  { %6742 = vmatprep.subr.bf16.mxu1 %v9495_v46 }
 0x340   :  { %6702 = vmatpush2.bf16.msra.mxu0 %v9490_v25 }
 0x341   :  { %6743 = vmatpush2.bf16.msra.mxu1 %v9493_v26  ;;  %6703 = vmatprep.subr.bf16.mxu0 %v9498_v27 }
 0x342   :  { %6744 = vmatprep.subr.bf16.mxu1 %v9501_v5 }
 0x344   :  { %6704 = vmatpush2.bf16.msra.mxu0 %v9496_v6  ;;  %v9550_v6 = vld [vmem:[#allocation8 + $0xa78] ss:$36 sps:$4 sm:$0xff]  }
 0x345   :  { %6745 = vmatpush2.bf16.msra.mxu1 %v9499_v7  ;;  %6705 = vmatprep.subr.bf16.mxu0 %v9504_v28  ;;  %v9553_v28 = vld [vmem:[#allocation8 + $0xef8] ss:$36 sps:$4 sm:$0xff]  }
 0x346   :  { %6746 = vmatprep.subr.bf16.mxu1 %v9507_v29  ;;  %v9558_v29 = vld [vmem:[#allocation8 + $0xa34] ss:$36 sps:$4 sm:$0xff]  }
 0x348   :  { %6706 = vmatpush2.bf16.msra.mxu0 %v9502_v30 }
 0x349   :  { %6747 = vmatpush2.bf16.msra.mxu1 %v9505_v31  ;;  %6707 = vmatprep.subr.bf16.mxu0 %v9510_v32  ;;  %v9561_v31 = vld [vmem:[#allocation8 + $0xeb4] ss:$36 sps:$4 sm:$0xff]  }
 0x34a   :  { %6748 = vmatprep.subr.bf16.mxu1 %v9513_v33  ;;  %v9559_v32 = vld [vmem:[#allocation8 + $0xeb0] ss:$36 sps:$4 sm:$0xff]  }
 0x34b   :  { %v9564_v33 = vld [vmem:[#allocation8 + $0x9ec] ss:$36 sps:$4 sm:$0xff]  }
 0x34c   :  { %6708 = vmatpush2.bf16.msra.mxu0 %v9508_v34  ;;  %v9567_v34 = vld [vmem:[#allocation8 + $0xe6c] ss:$36 sps:$4 sm:$0xff]  }
 0x34d   :  { %6749 = vmatpush2.bf16.msra.mxu1 %v9511_v35  ;;  %6709 = vmatprep.subr.bf16.mxu0 %v9516_v37  ;;  %v9562_v35 = vld [vmem:[#allocation8 + $0x9e8] ss:$36 sps:$4 sm:$0xff]  }
 0x34e   :  { %6750 = vmatprep.subr.bf16.mxu1 %v9519_v38  ;;  %v9565_v37 = vld [vmem:[#allocation8 + $0xe68] ss:$36 sps:$4 sm:$0xff]  }
 0x34f   :  { %v9570_v38 = vld [vmem:[#allocation8 + $0x9a4] ss:$36 sps:$4 sm:$0xff]  }
 0x350   :  { %6710 = vmatpush2.bf16.msra.mxu0 %v9514_v42  ;;  %v9573_v42 = vld [vmem:[#allocation8 + $0xe24] ss:$36 sps:$4 sm:$0xff]  }
 0x351   :  { %6751 = vmatpush2.bf16.msra.mxu1 %v9517_v45  ;;  %6711 = vmatprep.subr.bf16.mxu0 %v9522_v2  ;;  %v9568_v45 = vld [vmem:[#allocation8 + $0x9a0] ss:$36 sps:$4 sm:$0xff]  }
 0x352   :  { %6752 = vmatprep.subr.bf16.mxu1 %v9525_v47  ;;  %v9571_v2 = vld [vmem:[#allocation8 + $0xe20] ss:$36 sps:$4 sm:$0xff]  }
 0x353   :  { %v9576_v47 = vld [vmem:[#allocation8 + $0x95c] ss:$36 sps:$4 sm:$0xff]  }
 0x354   :  { %6712 = vmatpush2.bf16.msra.mxu0 %v9520_v48  ;;  %v9579_v48 = vld [vmem:[#allocation8 + $0xddc] ss:$36 sps:$4 sm:$0xff]  }
 0x355   :  { %6753 = vmatpush2.bf16.msra.mxu1 %v9523_v43  ;;  %6713 = vmatprep.subr.bf16.mxu0 %v9528_v53  ;;  %v9574_v43 = vld [vmem:[#allocation8 + $0x958] ss:$36 sps:$4 sm:$0xff]  }
 0x356   :  { %6754 = vmatprep.subr.bf16.mxu1 %v9531_v55  ;;  %v9577_v53 = vld [vmem:[#allocation8 + $0xdd8] ss:$36 sps:$4 sm:$0xff]  }
 0x357   :  { %v9582_v55 = vld [vmem:[#allocation8 + $0x914] ss:$36 sps:$4 sm:$0xff]  }
 0x358   :  { %6714 = vmatpush2.bf16.msra.mxu0 %v9526_v0  ;;  %v9585_v0 = vld [vmem:[#allocation8 + $0xd94] ss:$36 sps:$4 sm:$0xff]  }
 0x359   :  { %6755 = vmatpush2.bf16.msra.mxu1 %v9529_v3  ;;  %6715 = vmatprep.subr.bf16.mxu0 %v9534_v8  ;;  %v9580_v3 = vld [vmem:[#allocation8 + $0x910] ss:$36 sps:$4 sm:$0xff]  }
 0x35a   :  { %6756 = vmatprep.subr.bf16.mxu1 %v9537_v23  ;;  %v9583_v8 = vld [vmem:[#allocation8 + $0xd90] ss:$36 sps:$4 sm:$0xff]  }
 0x35b   :  { %v9588_v23 = vld [vmem:[#allocation8 + $0xd4c] ss:$36 sps:$4 sm:$0xff]  }
 0x35c   :  { %6716 = vmatpush2.bf16.msra.mxu0 %v9532_v12  ;;  %v9591_v12 = vld [vmem:[#allocation8 + $0x11cc] ss:$36 sps:$4 sm:$0xff]  }
 0x35d   :  { %6757 = vmatpush2.bf16.msra.mxu1 %v9535_v60  ;;  %6767 = vmatprep.subr.bf16.mxu0 %v9540_v57  ;;  %v9586_v60 = vld [vmem:[#allocation8 + $0xd48] ss:$36 sps:$4 sm:$0xff]  }
 0x35e   :  { %6808 = vmatprep.subr.bf16.mxu1 %v9543_v58  ;;  %v9589_v57 = vld [vmem:[#allocation8 + $0x11c8] ss:$36 sps:$4 sm:$0xff]  }
 0x35f   :  { %v6473_v61 = vpop.f32.mrf.mxu0  ;;  %6718 = vmatmul.mubr.bf16.vlgmr.msra.gmra.mxu0 %v10539_v49  ;;  %v6514_v18 = vpop.f32.mrf.mxu1  ;;  %v9594_v58 = vld [vmem:[#allocation8 + $0xd04] ss:$36 sps:$4 sm:$0xff]  }
 0x360   :  { %v6474_v62 = vadd.f32 %v6473_v61, %v10588_v36  ;;  %6759 = vmatmul.mubr.bf16.vlgmr.msra.gmra.mxu1 %v10543_v56  ;;  %6768 = vmatpush1.bf16.msra.mxu0 %v9538_v52  ;;  %v9555_v36 = vld [vmem:[#allocation8 + $0xefc] ss:$36 sps:$4 sm:$0xff]   ;;  %v9597_v52 = vld [vmem:[#allocation8 + $0x1184] ss:$36 sps:$4 sm:$0xff]  }
 0x361   :  { %6799 = vmatprep.mubr.bf16.mxu0 %v10559_v17  ;;  %6809 = vmatpush1.bf16.msra.mxu1 %v9541_v59  ;;  %v6475_v1 = vpop.f32.mrf.mxu0  ;;  %v6516_v25 = vpop.f32.mrf.mxu1  ;;  %v9592_v59 = vld [vmem:[#allocation8 + $0xd00] ss:$36 sps:$4 sm:$0xff]  }
 0x362   :  { %v10597_v9 = vadd.f32 %v6514_v18, %v6474_v62  ;;  %6840 = vmatprep.mubr.bf16.mxu1 %v10561_v14  ;;  %v6476_v46 = vadd.f32 %v6475_v1, %v10591_v22  ;;  %6769 = vmatprep.subr.bf16.mxu0 %v9546_v16  ;;  %v9556_v22 = vld [vmem:[#allocation8 + $0xa30] ss:$36 sps:$4 sm:$0xff]   ;;  %v9595_v16 = vld [vmem:[#allocation8 + $0x1180] ss:$36 sps:$4 sm:$0xff]   ;;  %v9598_v62 = vld [vmem:[#allocation8 + $0xcb8] ss:$36 sps:$4 sm:$0xff]  }
 0x363   :  { %v6477_v26 = vpop.f32.mrf.mxu0  ;;  %6810 = vmatprep.subr.bf16.mxu1 %v9549_v21  ;;  %v6518_v5 = vpop.f32.mrf.mxu1  ;;  %v9600_v61 = vld [vmem:[#allocation8 + $0xcbc] ss:$36 sps:$4 sm:$0xff]   ;;  %v9609_v1 = vld [vmem:[#allocation8 + $0x10f4] ss:$36 sps:$4 sm:$0xff]  }
 0x364   :  { %v10601_v27 = vadd.f32 %v6516_v25, %v6476_v46  ;;  %6770 = vmatpush1.bf16.msra.mxu0 %v9544_v63  ;;  %v9603_v21 = vld [vmem:[#allocation8 + $0x113c] ss:$36 sps:$4 sm:$0xff]   ;;  %v9606_v63 = vld [vmem:[#allocation8 + $0xc74] ss:$36 sps:$4 sm:$0xff]   ;;  %v9612_v46 = vld [vmem:[#allocation8 + $0xc2c] ss:$36 sps:$4 sm:$0xff]  }
 0x365   :  { %6811 = vmatpush1.bf16.msra.mxu1 %v9547_v24  ;;  %v6478_v7 = vpop.f32.mrf.mxu0  ;;  %6771 = vmatprep.subr.bf16.mxu0 %v9552_v4  ;;  %v6519_v30 = vpop.f32.mrf.mxu1  ;;  %v9601_v18 = vld [vmem:[#allocation8 + $0x1138] ss:$36 sps:$4 sm:$0xff]   ;;  %v9604_v24 = vld [vmem:[#allocation8 + $0xc70] ss:$36 sps:$4 sm:$0xff]   ;;  %v9613_v26 = vld [vmem:[#allocation8 + $0x10a8] ss:$36 sps:$4 sm:$0xff]  }
 0x366   :  { %6812 = vmatprep.subr.bf16.mxu1 %v9555_v36  ;;  %v9607_v4 = vld [vmem:[#allocation8 + $0x10f0] ss:$36 sps:$4 sm:$0xff]   ;;  %v9610_v36 = vld [vmem:[#allocation8 + $0xc28] ss:$36 sps:$4 sm:$0xff]   ;;  %v9616_v7 = vld [vmem:[#allocation8 + $0xbe0] ss:$36 sps:$4 sm:$0xff]  }
 0x367   :  { %v9615_v25 = vld [vmem:[#allocation8 + $0x10ac] ss:$36 sps:$4 sm:$0xff]   ;;  %v9618_v5 = vld [vmem:[#allocation8 + $0xbe4] ss:$36 sps:$4 sm:$0xff]   ;;  %v9627_v30 = vld [vmem:[#allocation8 + $0x101c] ss:$36 sps:$4 sm:$0xff]  }
 0x368   :  { %6772 = vmatpush1.bf16.msra.mxu0 %v9550_v6  ;;  %v9621_v6 = vld [vmem:[#allocation8 + $0x1064] ss:$36 sps:$4 sm:$0xff]  }
 0x369   :  { %6813 = vmatpush1.bf16.msra.mxu1 %v9553_v28  ;;  %6773 = vmatprep.subr.bf16.mxu0 %v9558_v29  ;;  %v9619_v28 = vld [vmem:[#allocation8 + $0x1060] ss:$36 sps:$4 sm:$0xff]  }
 0x36a   :  { %6814 = vmatprep.subr.bf16.mxu1 %v9561_v31  ;;  %v9624_v29 = vld [vmem:[#allocation8 + $0xb9c] ss:$36 sps:$4 sm:$0xff]  }
 0x36b   :  { %v9622_v31 = vld [vmem:[#allocation8 + $0xb98] ss:$36 sps:$4 sm:$0xff]  }
 0x36c   :  { %6774 = vmatpush1.bf16.msra.mxu0 %v9556_v22  ;;  %v9625_v22 = vld [vmem:[#allocation8 + $0x1018] ss:$36 sps:$4 sm:$0xff]  }
 0x36d   :  { %6815 = vmatpush1.bf16.msra.mxu1 %v9559_v32  ;;  %6775 = vmatprep.subr.bf16.mxu0 %v9564_v33  ;;  %v9630_v32 = vld [vmem:[#allocation8 + $0xb54] ss:$36 sps:$4 sm:$0xff]  }
 0x36e   :  { %6816 = vmatprep.subr.bf16.mxu1 %v9567_v34  ;;  %v9633_v33 = vld [vmem:[#allocation8 + $0xfd4] ss:$36 sps:$4 sm:$0xff]  }
 0x36f   :  { %v9628_v34 = vld [vmem:[#allocation8 + $0xb50] ss:$36 sps:$4 sm:$0xff]  }
 0x370   :  { %6776 = vmatpush1.bf16.msra.mxu0 %v9562_v35  ;;  %v9631_v35 = vld [vmem:[#allocation8 + $0xfd0] ss:$36 sps:$4 sm:$0xff]  }
 0x371   :  { %6817 = vmatpush1.bf16.msra.mxu1 %v9565_v37  ;;  %6777 = vmatprep.subr.bf16.mxu0 %v9570_v38  ;;  %v9636_v37 = vld [vmem:[#allocation8 + $0x214] ss:$36 sps:$4 sm:$0xff]  }
 0x372   :  { %6818 = vmatprep.subr.bf16.mxu1 %v9573_v42  ;;  %v9639_v38 = vld [vmem:[#allocation8 + $0x694] ss:$36 sps:$4 sm:$0xff]   ;;  %v3379_v42 = vrot.slane %v10579_v13, %v10455_v15 }
 0x374   :  { %6778 = vmatpush1.bf16.msra.mxu0 %v9568_v45  ;;  %v9634_v45 = vld [vmem:[#allocation8 + $0x210] ss:$36 sps:$4 sm:$0xff]  }
 0x375   :  { %6819 = vmatpush1.bf16.msra.mxu1 %v9571_v2  ;;  %6779 = vmatprep.subr.bf16.mxu0 %v9576_v47  ;;  %v9637_v2 = vld [vmem:[#allocation8 + $0x690] ss:$36 sps:$4 sm:$0xff]   ;;  %v3383_v47 = vrot.slane %v10579_v13, %v10461_v20 }
 0x376   :  { %6820 = vmatprep.subr.bf16.mxu1 %v9579_v48  ;;  %v9642_v48 = vld [vmem:[#allocation8 + $0x1cc] ss:$36 sps:$4 sm:$0xff]  }
 0x378   :  { %6780 = vmatpush1.bf16.msra.mxu0 %v9574_v43 }
 0x379   :  { %6821 = vmatpush1.bf16.msra.mxu1 %v9577_v53  ;;  %6781 = vmatprep.subr.bf16.mxu0 %v9582_v55  ;;  %v9645_v53 = vld [vmem:[#allocation8 + $0x64c] ss:$36 sps:$4 sm:$0xff]  }
 0x37a   :  { %6822 = vmatprep.subr.bf16.mxu1 %v9585_v0 }
 0x37c   :  { %6782 = vmatpush1.bf16.msra.mxu0 %v9580_v3  ;;  %v9640_v3 = vld [vmem:[#allocation8 + $0x1c8] ss:$36 sps:$4 sm:$0xff]  }
 0x37d   :  { %6823 = vmatpush1.bf16.msra.mxu1 %v9583_v8  ;;  %6783 = vmatprep.subr.bf16.mxu0 %v9588_v23  ;;  %v9643_v8 = vld [vmem:[#allocation8 + $0x648] ss:$36 sps:$4 sm:$0xff]  }
 0x37e   :  { %6824 = vmatprep.subr.bf16.mxu1 %v9591_v12  ;;  %v9648_v23 = vld [vmem:[#allocation8 + $0x184] ss:$36 sps:$4 sm:$0xff]  }
 0x380   :  { %6784 = vmatpush2.bf16.msra.mxu0 %v9586_v60  ;;  %v9651_v60 = vld [vmem:[#allocation8 + $0x604] ss:$36 sps:$4 sm:$0xff]  }
 0x381   :  { %6825 = vmatpush2.bf16.msra.mxu1 %v9589_v57  ;;  %6785 = vmatprep.subr.bf16.mxu0 %v9594_v58 }
 0x382   :  { %6826 = vmatprep.subr.bf16.mxu1 %v9597_v52 }
 0x384   :  { %6786 = vmatpush2.bf16.msra.mxu0 %v9592_v59  ;;  %v9646_v59 = vld [vmem:[#allocation8 + $0x180] ss:$36 sps:$4 sm:$0xff]  }
 0x385   :  { %6827 = vmatpush2.bf16.msra.mxu1 %v9595_v16  ;;  %6787 = vmatprep.subr.bf16.mxu0 %v9600_v61  ;;  %v9649_v61 = vld [vmem:[#allocation8 + $0x600] ss:$36 sps:$4 sm:$0xff]  }
 0x386   :  { %6828 = vmatprep.subr.bf16.mxu1 %v9603_v21  ;;  %v9654_v21 = vld [vmem:[#allocation8 + $0x13c] ss:$36 sps:$4 sm:$0xff]  }
 0x388   :  { %6788 = vmatpush2.bf16.msra.mxu0 %v9598_v62 }
 0x389   :  { %6829 = vmatpush2.bf16.msra.mxu1 %v9601_v18  ;;  %6789 = vmatprep.subr.bf16.mxu0 %v9606_v63  ;;  %v9657_v18 = vld [vmem:[#allocation8 + $0x5bc] ss:$36 sps:$4 sm:$0xff]  }
 0x38a   :  { %6830 = vmatprep.subr.bf16.mxu1 %v9609_v1  ;;  %v9652_v63 = vld [vmem:[#allocation8 + $0x138] ss:$36 sps:$4 sm:$0xff]  }
 0x38b   :  { %v9655_v1 = vld [vmem:[#allocation8 + $0x5b8] ss:$36 sps:$4 sm:$0xff]  }
 0x38c   :  { %6790 = vmatpush2.bf16.msra.mxu0 %v9604_v24  ;;  %v9660_v24 = vld [vmem:[#allocation8 + $0xf4] ss:$36 sps:$4 sm:$0xff]  }
 0x38d   :  { %6831 = vmatpush2.bf16.msra.mxu1 %v9607_v4  ;;  %6791 = vmatprep.subr.bf16.mxu0 %v9612_v46  ;;  %v9663_v4 = vld [vmem:[#allocation8 + $0x574] ss:$36 sps:$4 sm:$0xff]  }
 0x38e   :  { %6832 = vmatprep.subr.bf16.mxu1 %v9615_v25  ;;  %v9658_v46 = vld [vmem:[#allocation8 + $0xf0] ss:$36 sps:$4 sm:$0xff]  }
 0x38f   :  { %v9661_v25 = vld [vmem:[#allocation8 + $0x570] ss:$36 sps:$4 sm:$0xff]  }
 0x390   :  { %6792 = vmatpush2.bf16.msra.mxu0 %v9610_v36  ;;  %v9666_v36 = vld [vmem:[#allocation8 + $0xac] ss:$36 sps:$4 sm:$0xff]  }
 0x391   :  { %6833 = vmatpush2.bf16.msra.mxu1 %v9613_v26  ;;  %6793 = vmatprep.subr.bf16.mxu0 %v9618_v5  ;;  %v9669_v26 = vld [vmem:[#allocation8 + $0x52c] ss:$36 sps:$4 sm:$0xff]  }
 0x392   :  { %6834 = vmatprep.subr.bf16.mxu1 %v9621_v6  ;;  %v9664_v5 = vld [vmem:[#allocation8 + $0xa8] ss:$36 sps:$4 sm:$0xff]  }
 0x393   :  { %v9667_v6 = vld [vmem:[#allocation8 + $0x528] ss:$36 sps:$4 sm:$0xff]  }
 0x394   :  { %6794 = vmatpush2.bf16.msra.mxu0 %v9616_v7  ;;  %v9672_v7 = vld [vmem:[#allocation8 + $0x64] ss:$36 sps:$4 sm:$0xff]  }
 0x395   :  { %6835 = vmatpush2.bf16.msra.mxu1 %v9619_v28  ;;  %6795 = vmatprep.subr.bf16.mxu0 %v9624_v29  ;;  %v9675_v28 = vld [vmem:[#allocation8 + $0x4e4] ss:$36 sps:$4 sm:$0xff]  }
 0x396   :  { %6836 = vmatprep.subr.bf16.mxu1 %v9627_v30  ;;  %v9670_v29 = vld [vmem:[#allocation8 + $0x60] ss:$36 sps:$4 sm:$0xff]  }
 0x397   :  { %v9673_v30 = vld [vmem:[#allocation8 + $0x4e0] ss:$36 sps:$4 sm:$0xff]  }
 0x398   :  { %6796 = vmatpush2.bf16.msra.mxu0 %v9622_v31  ;;  %v9678_v31 = vld [vmem:[#allocation8 + $0x1c] ss:$36 sps:$4 sm:$0xff]  }
 0x399   :  { %6837 = vmatpush2.bf16.msra.mxu1 %v9625_v22  ;;  %6797 = vmatprep.subr.bf16.mxu0 %v9630_v32  ;;  %v9681_v22 = vld [vmem:[#allocation8 + $0x49c] ss:$36 sps:$4 sm:$0xff]  }
 0x39a   :  { %6838 = vmatprep.subr.bf16.mxu1 %v9633_v33  ;;  %v9676_v32 = vld [vmem:[#allocation8 + $0x18] ss:$36 sps:$4 sm:$0xff]  }
 0x39b   :  { %v9679_v33 = vld [vmem:[#allocation8 + $0x498] ss:$36 sps:$4 sm:$0xff]  }
 0x39c   :  { %6798 = vmatpush2.bf16.msra.mxu0 %v9628_v34  ;;  %v9684_v34 = vld [vmem:[#allocation8 + $0x454] ss:$36 sps:$4 sm:$0xff]  }
 0x39d   :  { %6839 = vmatpush2.bf16.msra.mxu1 %v9631_v35  ;;  %6849 = vmatprep.subr.bf16.mxu0 %v9636_v37  ;;  %v9687_v35 = vld [vmem:[#allocation8 + $0x8d4] ss:$36 sps:$4 sm:$0xff]  }
 0x39e   :  { %6890 = vmatprep.subr.bf16.mxu1 %v9639_v38  ;;  %v9682_v37 = vld [vmem:[#allocation8 + $0x450] ss:$36 sps:$4 sm:$0xff]  }
 0x39f   :  { %v6555_v43 = vpop.f32.mrf.mxu0  ;;  %6800 = vmatmul.mubr.bf16.vlgmr.msra.gmra.mxu0 %v10567_v39  ;;  %v9685_v38 = vld [vmem:[#allocation8 + $0x8d0] ss:$36 sps:$4 sm:$0xff]  }
 0x3a0   :  { %v6556_v55 = vadd.f32 %v6555_v43, %v3379_v42  ;;  %v6596_v0 = vpop.f32.mrf.mxu1  ;;  %6841 = vmatmul.mubr.bf16.vlgmr.msra.gmra.mxu1 %v10569_v44  ;;  %6850 = vmatpush1.bf16.msra.mxu0 %v9634_v45  ;;  %v9690_v42 = vld [vmem:[#allocation8 + $0x40c] ss:$36 sps:$4 sm:$0xff]   ;;  %v9699_v43 = vld [vmem:[#allocation8 + $0x844] ss:$36 sps:$4 sm:$0xff]  }
 0x3a1   :  { %6881 = vmatprep.mubr.bf16.mxu0 %v10537_v11  ;;  %6891 = vmatpush1.bf16.msra.mxu1 %v9637_v2  ;;  %v6557_v15 = vpop.f32.mrf.mxu0  ;;  %v9693_v45 = vld [vmem:[#allocation8 + $0x88c] ss:$36 sps:$4 sm:$0xff]  }
 0x3a2   :  { %v10610_v12 = vadd.f32 %v6596_v0, %v6556_v55  ;;  %6922 = vmatprep.mubr.bf16.mxu1 %v10541_v50  ;;  %v6558_v20 = vadd.f32 %v6557_v15, %v3383_v47  ;;  %v6598_v13 = vpop.f32.mrf.mxu1  ;;  %6851 = vmatprep.subr.bf16.mxu0 %v9642_v48  ;;  %v9688_v2 = vld [vmem:[#allocation8 + $0x408] ss:$36 sps:$4 sm:$0xff]   ;;  %v9697_v55 = vld [vmem:[#allocation8 + $0x840] ss:$36 sps:$4 sm:$0xff]   ;;  %v9700_v15 = vld [vmem:[#allocation8 + $0x378] ss:$36 sps:$4 sm:$0xff]  }
 0x3a3   :  { %v6559_v57 = vpop.f32.mrf.mxu0  ;;  %6892 = vmatprep.subr.bf16.mxu1 %v9645_v53  ;;  %v9691_v47 = vld [vmem:[#allocation8 + $0x888] ss:$36 sps:$4 sm:$0xff]   ;;  %v9694_v53 = vld [vmem:[#allocation8 + $0x3c0] ss:$36 sps:$4 sm:$0xff]  }
 0x3a4   :  { %v10613_v58 = vadd.f32 %v6598_v13, %v6558_v20  ;;  %v6600_v52 = vpop.f32.mrf.mxu1  ;;  %6852 = vmatpush1.bf16.msra.mxu0 %v9640_v3  ;;  %v9696_v48 = vld [vmem:[#allocation8 + $0x3c4] ss:$36 sps:$4 sm:$0xff]   ;;  %v9702_v0 = vld [vmem:[#allocation8 + $0x37c] ss:$36 sps:$4 sm:$0xff]   ;;  %v9711_v20 = vld [vmem:[#allocation8 + $0x7b4] ss:$36 sps:$4 sm:$0xff]  }
 0x3a5   :  { %6893 = vmatpush1.bf16.msra.mxu1 %v9643_v8  ;;  %v6560_v16 = vpop.f32.mrf.mxu0  ;;  %6853 = vmatprep.subr.bf16.mxu0 %v9648_v23  ;;  %v9705_v3 = vld [vmem:[#allocation8 + $0x7fc] ss:$36 sps:$4 sm:$0xff]   ;;  %v9708_v23 = vld [vmem:[#allocation8 + $0x334] ss:$36 sps:$4 sm:$0xff]   ;;  %v9714_v57 = vld [vmem:[#allocation8 + $0x2ec] ss:$36 sps:$4 sm:$0xff]  }
 0x3a6   :  { %v6601_v62 = vpop.f32.mrf.mxu1  ;;  %6894 = vmatprep.subr.bf16.mxu1 %v9651_v60  ;;  %v9703_v8 = vld [vmem:[#allocation8 + $0x7f8] ss:$36 sps:$4 sm:$0xff]   ;;  %v9706_v13 = vld [vmem:[#allocation8 + $0x330] ss:$36 sps:$4 sm:$0xff]   ;;  %v9715_v16 = vld [vmem:[#allocation8 + $0x768] ss:$36 sps:$4 sm:$0xff]  }
 0x3a7   :  { %v9709_v60 = vld [vmem:[#allocation8 + $0x7b0] ss:$36 sps:$4 sm:$0xff]   ;;  %v9718_v62 = vld [vmem:[#allocation8 + $0x2a0] ss:$36 sps:$4 sm:$0xff]  }
 0x3a8   :  { %6854 = vmatpush1.bf16.msra.mxu0 %v9646_v59  ;;  %v9717_v52 = vld [vmem:[#allocation8 + $0x76c] ss:$36 sps:$4 sm:$0xff]  }
 0x3a9   :  { %6895 = vmatpush1.bf16.msra.mxu1 %v9649_v61  ;;  %6855 = vmatprep.subr.bf16.mxu0 %v9654_v21  ;;  %v9712_v59 = vld [vmem:[#allocation8 + $0x2e8] ss:$36 sps:$4 sm:$0xff]  }
 0x3aa   :  { %6896 = vmatprep.subr.bf16.mxu1 %v9657_v18  ;;  %v9720_v61 = vld [vmem:[#allocation8 + $0x2a4] ss:$36 sps:$4 sm:$0xff]  }
 0x3ab   :  { %v9723_v21 = vld [vmem:[#allocation8 + $0x724] ss:$36 sps:$4 sm:$0xff]  }
 0x3ac   :  { %6856 = vmatpush1.bf16.msra.mxu0 %v9652_v63  ;;  %v9721_v18 = vld [vmem:[#allocation8 + $0x720] ss:$36 sps:$4 sm:$0xff]  }
 0x3ad   :  { %6897 = vmatpush1.bf16.msra.mxu1 %v9655_v1  ;;  %6857 = vmatprep.subr.bf16.mxu0 %v9660_v24  ;;  %v9726_v63 = vld [vmem:[#allocation8 + $0x25c] ss:$36 sps:$4 sm:$0xff]  }
 0x3ae   :  { %6898 = vmatprep.subr.bf16.mxu1 %v9663_v4  ;;  %v9729_v1 = vld [vmem:[#allocation8 + $0x6dc] ss:$36 sps:$4 sm:$0xff]  }
 0x3af   :  { %v9724_v24 = vld [vmem:[#allocation8 + $0x258] ss:$36 sps:$4 sm:$0xff]  }
 0x3b0   :  { %6858 = vmatpush1.bf16.msra.mxu0 %v9658_v46  ;;  %v9727_v4 = vld [vmem:[#allocation8 + $0x6d8] ss:$36 sps:$4 sm:$0xff]  }
 0x3b1   :  { %6899 = vmatpush1.bf16.msra.mxu1 %v9661_v25  ;;  %6859 = vmatprep.subr.bf16.mxu0 %v9666_v36  ;;  %v9732_v46 = vld [vmem:[#allocation8 + $0xb14] ss:$36 sps:$4 sm:$0xff]  }
 0x3b2   :  { %6900 = vmatprep.subr.bf16.mxu1 %v9669_v26  ;;  %v9735_v25 = vld [vmem:[#allocation8 + $0xf94] ss:$36 sps:$4 sm:$0xff]  }
 0x3b3   :  { %v9730_v36 = vld [vmem:[#allocation8 + $0xb10] ss:$36 sps:$4 sm:$0xff]  }
 0x3b4   :  { %6860 = vmatpush1.bf16.msra.mxu0 %v9664_v5  ;;  %v9733_v26 = vld [vmem:[#allocation8 + $0xf90] ss:$36 sps:$4 sm:$0xff]  }
 0x3b5   :  { %6901 = vmatpush1.bf16.msra.mxu1 %v9667_v6  ;;  %6861 = vmatprep.subr.bf16.mxu0 %v9672_v7  ;;  %v9738_v5 = vld [vmem:[#allocation8 + $0xacc] ss:$36 sps:$4 sm:$0xff]  }
 0x3b6   :  { %6902 = vmatprep.subr.bf16.mxu1 %v9675_v28  ;;  %v9741_v7 = vld [vmem:[#allocation8 + $0xf4c] ss:$36 sps:$4 sm:$0xff]  }
 0x3b8   :  { %6862 = vmatpush1.bf16.msra.mxu0 %v9670_v29 }
 0x3b9   :  { %6903 = vmatpush1.bf16.msra.mxu1 %v9673_v30  ;;  %6863 = vmatprep.subr.bf16.mxu0 %v9678_v31  ;;  %v9736_v30 = vld [vmem:[#allocation8 + $0xac8] ss:$36 sps:$4 sm:$0xff]  }
 0x3ba   :  { %6904 = vmatprep.subr.bf16.mxu1 %v9681_v22  ;;  %v9739_v22 = vld [vmem:[#allocation8 + $0xf48] ss:$36 sps:$4 sm:$0xff]  }
 0x3bc   :  { %6864 = vmatpush1.bf16.msra.mxu0 %v9676_v32  ;;  %v9744_v32 = vld [vmem:[#allocation8 + $0xa84] ss:$36 sps:$4 sm:$0xff]  }
 0x3bd   :  { %6905 = vmatpush1.bf16.msra.mxu1 %v9679_v33  ;;  %6865 = vmatprep.subr.bf16.mxu0 %v9684_v34 }
 0x3be   :  { %6906 = vmatprep.subr.bf16.mxu1 %v9687_v35 }
 0x3c0   :  { %6866 = vmatpush2.bf16.msra.mxu0 %v9682_v37 }
 0x3c1   :  { %6907 = vmatpush2.bf16.msra.mxu1 %v9685_v38  ;;  %6867 = vmatprep.subr.bf16.mxu0 %v9690_v42 }
 0x3c2   :  { %6908 = vmatprep.subr.bf16.mxu1 %v9693_v45  ;;  %v9742_v45 = vld [vmem:[#allocation8 + $0xa80] ss:$36 sps:$4 sm:$0xff]  }
 0x3c4   :  { %6868 = vmatpush2.bf16.msra.mxu0 %v9688_v2 }
 0x3c5   :  { %6909 = vmatpush2.bf16.msra.mxu1 %v9691_v47  ;;  %6869 = vmatprep.subr.bf16.mxu0 %v9696_v48  ;;  %v9745_v47 = vld [vmem:[#allocation8 + $0xf00] ss:$36 sps:$4 sm:$0xff]  }
 0x3c6   :  { %6910 = vmatprep.subr.bf16.mxu1 %v9699_v43  ;;  %v9750_v48 = vld [vmem:[#allocation8 + $0xa3c] ss:$36 sps:$4 sm:$0xff]   ;;  %v7173_v43 = vmax.f32 %v10597_v9, 0.0  ;;  %v9762_v9 = vld [vmem:[#allocation8 + $0x9ac] ss:$36 sps:$4 sm:$0xff]  }
 0x3c8   :  { %6870 = vmatpush2.bf16.msra.mxu0 %v9694_v53 }
 0x3c9   :  { %6911 = vmatpush2.bf16.msra.mxu1 %v9697_v55  ;;  %6871 = vmatprep.subr.bf16.mxu0 %v9702_v0 }
 0x3ca   :  { %6912 = vmatprep.subr.bf16.mxu1 %v9705_v3  ;;  %v9748_v3 = vld [vmem:[#allocation8 + $0xa38] ss:$36 sps:$4 sm:$0xff]  }
 0x3cc   :  { %6872 = vmatpush2.bf16.msra.mxu0 %v9700_v15  ;;  %v9751_v15 = vld [vmem:[#allocation8 + $0xeb8] ss:$36 sps:$4 sm:$0xff]  }
 0x3cd   :  { %6913 = vmatpush2.bf16.msra.mxu1 %v9703_v8  ;;  %6873 = vmatprep.subr.bf16.mxu0 %v9708_v23  ;;  %v9756_v8 = vld [vmem:[#allocation8 + $0x9f4] ss:$36 sps:$4 sm:$0xff]  }
 0x3ce   :  { %6914 = vmatprep.subr.bf16.mxu1 %v9711_v20  ;;  %v9759_v23 = vld [vmem:[#allocation8 + $0xe74] ss:$36 sps:$4 sm:$0xff]  }
 0x3cf   :  { %v9754_v20 = vld [vmem:[#allocation8 + $0x9f0] ss:$36 sps:$4 sm:$0xff]  }
 0x3d0   :  { %6874 = vmatpush2.bf16.msra.mxu0 %v9706_v13  ;;  %v9757_v13 = vld [vmem:[#allocation8 + $0xe70] ss:$36 sps:$4 sm:$0xff]  }
 0x3d1   :  { %6915 = vmatpush2.bf16.msra.mxu1 %v9709_v60  ;;  %6875 = vmatprep.subr.bf16.mxu0 %v9714_v57  ;;  %v9765_v60 = vld [vmem:[#allocation8 + $0xe2c] ss:$36 sps:$4 sm:$0xff]  }
 0x3d2   :  { %6916 = vmatprep.subr.bf16.mxu1 %v9717_v52  ;;  %v9760_v57 = vld [vmem:[#allocation8 + $0x9a8] ss:$36 sps:$4 sm:$0xff]  }
 0x3d3   :  { %v9763_v52 = vld [vmem:[#allocation8 + $0xe28] ss:$36 sps:$4 sm:$0xff]  }
 0x3d4   :  { %6876 = vmatpush2.bf16.msra.mxu0 %v9712_v59  ;;  %v9768_v59 = vld [vmem:[#allocation8 + $0x964] ss:$36 sps:$4 sm:$0xff]  }
 0x3d5   :  { %6917 = vmatpush2.bf16.msra.mxu1 %v9715_v16  ;;  %6877 = vmatprep.subr.bf16.mxu0 %v9720_v61  ;;  %v9771_v16 = vld [vmem:[#allocation8 + $0xde4] ss:$36 sps:$4 sm:$0xff]  }
 0x3d6   :  { %6918 = vmatprep.subr.bf16.mxu1 %v9723_v21  ;;  %v9766_v61 = vld [vmem:[#allocation8 + $0x960] ss:$36 sps:$4 sm:$0xff]  }
 0x3d7   :  { %v9769_v21 = vld [vmem:[#allocation8 + $0xde0] ss:$36 sps:$4 sm:$0xff]  }
 0x3d8   :  { %6878 = vmatpush2.bf16.msra.mxu0 %v9718_v62  ;;  %v9774_v62 = vld [vmem:[#allocation8 + $0x91c] ss:$36 sps:$4 sm:$0xff]  }
 0x3d9   :  { %6919 = vmatpush2.bf16.msra.mxu1 %v9721_v18  ;;  %6879 = vmatprep.subr.bf16.mxu0 %v9726_v63  ;;  %v9777_v18 = vld [vmem:[#allocation8 + $0xd9c] ss:$36 sps:$4 sm:$0xff]  }
 0x3da   :  { %6920 = vmatprep.subr.bf16.mxu1 %v9729_v1  ;;  %v9772_v63 = vld [vmem:[#allocation8 + $0x918] ss:$36 sps:$4 sm:$0xff]  }
 0x3db   :  { %v9775_v1 = vld [vmem:[#allocation8 + $0xd98] ss:$36 sps:$4 sm:$0xff]  }
 0x3dc   :  { %6880 = vmatpush2.bf16.msra.mxu0 %v9724_v24  ;;  %v9780_v24 = vld [vmem:[#allocation8 + $0xd54] ss:$36 sps:$4 sm:$0xff]  }
 0x3dd   :  { %6921 = vmatpush2.bf16.msra.mxu1 %v9727_v4  ;;  %6931 = vmatprep.subr.bf16.mxu0 %v9732_v46  ;;  %v9783_v4 = vld [vmem:[#allocation8 + $0x11d4] ss:$36 sps:$4 sm:$0xff]  }
 0x3de   :  { %6972 = vmatprep.subr.bf16.mxu1 %v9735_v25  ;;  %v9778_v46 = vld [vmem:[#allocation8 + $0xd50] ss:$36 sps:$4 sm:$0xff]  }
 0x3df   :  { %v6637_v6 = vpop.f32.mrf.mxu0  ;;  %6882 = vmatmul.mubr.bf16.vlgmr.msra.gmra.mxu0 %v10539_v49  ;;  %v9781_v25 = vld [vmem:[#allocation8 + $0x11d0] ss:$36 sps:$4 sm:$0xff]  }
 0x3e0   :  { %v6638_v28 = vadd.f32 %v6637_v6, %v10610_v12  ;;  %v6678_v29 = vpop.f32.mrf.mxu1  ;;  %6923 = vmatmul.mubr.bf16.vlgmr.msra.gmra.mxu1 %v10543_v56  ;;  %6932 = vmatpush1.bf16.msra.mxu0 %v9730_v36  ;;  %v9747_v12 = vld [vmem:[#allocation8 + $0xf04] ss:$36 sps:$4 sm:$0xff]   ;;  %v9786_v36 = vld [vmem:[#allocation8 + $0xd0c] ss:$36 sps:$4 sm:$0xff]  }
 0x3e1   :  { %6963 = vmatprep.mubr.bf16.mxu0 %v10559_v17  ;;  %6973 = vmatpush1.bf16.msra.mxu1 %v9733_v26  ;;  %v6639_v31 = vpop.f32.mrf.mxu0  ;;  %v9789_v26 = vld [vmem:[#allocation8 + $0x118c] ss:$36 sps:$4 sm:$0xff]  }
 0x3e2   :  { %v10619_v33 = vadd.f32 %v6678_v29, %v6638_v28  ;;  %7004 = vmatprep.mubr.bf16.mxu1 %v10561_v14  ;;  %v6640_v34 = vadd.f32 %v6639_v31, %v10613_v58  ;;  %v6680_v35 = vpop.f32.mrf.mxu1  ;;  %6933 = vmatprep.subr.bf16.mxu0 %v9738_v5  ;;  %v9753_v58 = vld [vmem:[#allocation8 + $0xebc] ss:$36 sps:$4 sm:$0xff]   ;;  %v9784_v5 = vld [vmem:[#allocation8 + $0xd08] ss:$36 sps:$4 sm:$0xff]  }
 0x3e3   :  { %v6641_v37 = vpop.f32.mrf.mxu0  ;;  %6974 = vmatprep.subr.bf16.mxu1 %v9741_v7  ;;  %v9787_v6 = vld [vmem:[#allocation8 + $0x1188] ss:$36 sps:$4 sm:$0xff]   ;;  %v9790_v29 = vld [vmem:[#allocation8 + $0xcc0] ss:$36 sps:$4 sm:$0xff]  }
 0x3e4   :  { %v6681_v38 = vadd.f32 %v6680_v35, %v6640_v34  ;;  %v6682_v42 = vpop.f32.mrf.mxu1  ;;  %6934 = vmatpush1.bf16.msra.mxu0 %v9736_v30  ;;  %v9792_v7 = vld [vmem:[#allocation8 + $0xcc4] ss:$36 sps:$4 sm:$0xff]   ;;  %v9798_v31 = vld [vmem:[#allocation8 + $0xc7c] ss:$36 sps:$4 sm:$0xff]   ;;  %v9804_v35 = vld [vmem:[#allocation8 + $0xc34] ss:$36 sps:$4 sm:$0xff]  }
 0x3e5   :  { %6975 = vmatpush1.bf16.msra.mxu1 %v9739_v22  ;;  %v6642_v2 = vpop.f32.mrf.mxu0  ;;  %6935 = vmatprep.subr.bf16.mxu0 %v9744_v32  ;;  %v9795_v28 = vld [vmem:[#allocation8 + $0x1144] ss:$36 sps:$4 sm:$0xff]   ;;  %v9801_v22 = vld [vmem:[#allocation8 + $0x10fc] ss:$36 sps:$4 sm:$0xff]   ;;  %v9802_v37 = vld [vmem:[#allocation8 + $0xc30] ss:$36 sps:$4 sm:$0xff]  }
 0x3e6   :  { %v7176_v53 = vmax.f32 %v6681_v38, 0.0  ;;  %v6683_v55 = vpop.f32.mrf.mxu1  ;;  %6976 = vmatprep.subr.bf16.mxu1 %v9747_v12  ;;  %v9793_v30 = vld [vmem:[#allocation8 + $0x1140] ss:$36 sps:$4 sm:$0xff]   ;;  %v9796_v32 = vld [vmem:[#allocation8 + $0xc78] ss:$36 sps:$4 sm:$0xff]  }
 0x3e7   :  { %v9799_v34 = vld [vmem:[#allocation8 + $0x10f8] ss:$36 sps:$4 sm:$0xff]   ;;  %v9805_v38 = vld [vmem:[#allocation8 + $0x10b0] ss:$36 sps:$4 sm:$0xff]   ;;  %v9808_v2 = vld [vmem:[#allocation8 + $0xbe8] ss:$36 sps:$4 sm:$0xff]  }
 0x3e8   :  { %v10624_v0 = vmax.f32 %v7173_v43, %v7176_v53  ;;  %6936 = vmatpush1.bf16.msra.mxu0 %v9742_v45  ;;  %v9807_v12 = vld [vmem:[#allocation8 + $0x10b4] ss:$36 sps:$4 sm:$0xff]   ;;  %v9810_v42 = vld [vmem:[#allocation8 + $0xbec] ss:$36 sps:$4 sm:$0xff]   ;;  %v9819_v43 = vld [vmem:[#allocation8 + $0x1024] ss:$36 sps:$4 sm:$0xff]  }
 0x3e9   :  { %6977 = vmatpush1.bf16.msra.mxu1 %v9745_v47  ;;  %6937 = vmatprep.subr.bf16.mxu0 %v9750_v48  ;;  %v9813_v45 = vld [vmem:[#allocation8 + $0x106c] ss:$36 sps:$4 sm:$0xff]   ;;  %v9816_v48 = vld [vmem:[#allocation8 + $0xba4] ss:$36 sps:$4 sm:$0xff]  }
 0x3ea   :  { %6978 = vmatprep.subr.bf16.mxu1 %v9753_v58  ;;  %v9811_v47 = vld [vmem:[#allocation8 + $0x1068] ss:$36 sps:$4 sm:$0xff]   ;;  %v9814_v53 = vld [vmem:[#allocation8 + $0xba0] ss:$36 sps:$4 sm:$0xff]  }
 0x3eb   :  { %v9817_v55 = vld [vmem:[#allocation8 + $0x1020] ss:$36 sps:$4 sm:$0xff]  }
 0x3ec   :  { %6938 = vmatpush1.bf16.msra.mxu0 %v9748_v3  ;;  %v9822_v58 = vld [vmem:[#allocation8 + $0xb5c] ss:$36 sps:$4 sm:$0xff]  }
 0x3ed   :  { %6979 = vmatpush1.bf16.msra.mxu1 %v9751_v15  ;;  %6939 = vmatprep.subr.bf16.mxu0 %v9756_v8  ;;  %v9825_v3 = vld [vmem:[#allocation8 + $0xfdc] ss:$36 sps:$4 sm:$0xff]  }
 0x3ee   :  { %6980 = vmatprep.subr.bf16.mxu1 %v9759_v23  ;;  %v9820_v15 = vld [vmem:[#allocation8 + $0xb58] ss:$36 sps:$4 sm:$0xff]  }
 0x3ef   :  { %v9823_v8 = vld [vmem:[#allocation8 + $0xfd8] ss:$36 sps:$4 sm:$0xff]  }
 0x3f0   :  { %6940 = vmatpush1.bf16.msra.mxu0 %v9754_v20  ;;  %v9826_v23 = vld [vmem:[#allocation8 + $0x458] ss:$36 sps:$4 sm:$0xff]  }
 0x3f1   :  { %6981 = vmatpush1.bf16.msra.mxu1 %v9757_v13  ;;  %6941 = vmatprep.subr.bf16.mxu0 %v9762_v9  ;;  %v9827_v20 = vld [vmem:[#allocation8 + $0x8d8] ss:$36 sps:$4 sm:$0xff]   ;;  %v10626_v13 = vld [vmem:[#allocation10] sm:$0xff] }
 0x3f2   :  { %6982 = vmatprep.subr.bf16.mxu1 %v9765_v60  ;;  %v3387_v9 = vrot.slane %v10626_v13, %v10426_v51  ;;  %v9828_v60 = vld [vmem:[#allocation8 + $0x218] ss:$36 sps:$4 sm:$0xff]  }
 0x3f4   :  { %6942 = vmatpush1.bf16.msra.mxu0 %v9760_v57  ;;  %v9829_v57 = vld [vmem:[#allocation8 + $0x698] ss:$36 sps:$4 sm:$0xff]  }
 0x3f5   :  { %6983 = vmatpush1.bf16.msra.mxu1 %v9763_v52  ;;  %6943 = vmatprep.subr.bf16.mxu0 %v9768_v59  ;;  %v3391_v52 = vrot.slane %v10626_v13, %v10494_v40  ;;  %v9830_v59 = vld [vmem:[#allocation8 + $0x410] ss:$36 sps:$4 sm:$0xff]  }
 0x3f6   :  { %6984 = vmatprep.subr.bf16.mxu1 %v9771_v16 }
 0x3f8   :  { %6944 = vmatpush1.bf16.msra.mxu0 %v9766_v61  ;;  %v9831_v61 = vld [vmem:[#allocation8 + $0x890] ss:$36 sps:$4 sm:$0xff]  }
 0x3f9   :  { %6985 = vmatpush1.bf16.msra.mxu1 %v9769_v21  ;;  %6945 = vmatprep.subr.bf16.mxu0 %v9774_v62 }
 0x3fa   :  { %6986 = vmatprep.subr.bf16.mxu1 %v9777_v18  ;;  %v9832_v18 = vld [vmem:[#allocation8 + $0x1d0] ss:$36 sps:$4 sm:$0xff]  }
 0x3fc   :  { %6946 = vmatpush1.bf16.msra.mxu0 %v9772_v63  ;;  %v9833_v63 = vld [vmem:[#allocation8 + $0x650] ss:$36 sps:$4 sm:$0xff]  }
 0x3fd   :  { %6987 = vmatpush1.bf16.msra.mxu1 %v9775_v1  ;;  %6947 = vmatprep.subr.bf16.mxu0 %v9780_v24  ;;  %v9834_v1 = vld [vmem:[#allocation8 + $0x3c8] ss:$36 sps:$4 sm:$0xff]  }
 0x3fe   :  { %6988 = vmatprep.subr.bf16.mxu1 %v9783_v4 }
 0x400   :  { %6948 = vmatpush2.bf16.msra.mxu0 %v9778_v46  ;;  %v9835_v46 = vld [vmem:[#allocation8 + $0x848] ss:$36 sps:$4 sm:$0xff]  }
 0x401   :  { %6989 = vmatpush2.bf16.msra.mxu1 %v9781_v25  ;;  %6949 = vmatprep.subr.bf16.mxu0 %v9786_v36 }
 0x402   :  { %6990 = vmatprep.subr.bf16.mxu1 %v9789_v26 }
 0x404   :  { %6950 = vmatpush2.bf16.msra.mxu0 %v9784_v5  ;;  %v9836_v5 = vld [vmem:[#allocation8 + $0x188] ss:$36 sps:$4 sm:$0xff]  }
 0x405   :  { %6991 = vmatpush2.bf16.msra.mxu1 %v9787_v6  ;;  %6951 = vmatprep.subr.bf16.mxu0 %v9792_v7  ;;  %v9837_v6 = vld [vmem:[#allocation8 + $0x608] ss:$36 sps:$4 sm:$0xff]   ;;  %v9838_v7 = vld [vmem:[#allocation8 + $0x380] ss:$36 sps:$4 sm:$0xff]  }
 0x406   :  { %6992 = vmatprep.subr.bf16.mxu1 %v9795_v28 }
 0x408   :  { %6952 = vmatpush2.bf16.msra.mxu0 %v9790_v29  ;;  %v9839_v29 = vld [vmem:[#allocation8 + $0x800] ss:$36 sps:$4 sm:$0xff]  }
 0x409   :  { %6993 = vmatpush2.bf16.msra.mxu1 %v9793_v30  ;;  %6953 = vmatprep.subr.bf16.mxu0 %v9798_v31  ;;  %v9841_v30 = vld [vmem:[#allocation8 + $0x5c0] ss:$36 sps:$4 sm:$0xff]   ;;  %v9842_v31 = vld [vmem:[#allocation8 + $0x338] ss:$36 sps:$4 sm:$0xff]  }
 0x40a   :  { %6994 = vmatprep.subr.bf16.mxu1 %v9801_v22  ;;  %v9843_v22 = vld [vmem:[#allocation8 + $0x7b8] ss:$36 sps:$4 sm:$0xff]  }
 0x40c   :  { %6954 = vmatpush2.bf16.msra.mxu0 %v9796_v32  ;;  %v9844_v32 = vld [vmem:[#allocation8 + $0xf8] ss:$36 sps:$4 sm:$0xff]  }
 0x40d   :  { %6995 = vmatpush2.bf16.msra.mxu1 %v9799_v34  ;;  %6955 = vmatprep.subr.bf16.mxu0 %v9804_v35  ;;  %v9845_v34 = vld [vmem:[#allocation8 + $0x578] ss:$36 sps:$4 sm:$0xff]   ;;  %v9846_v35 = vld [vmem:[#allocation8 + $0x2f0] ss:$36 sps:$4 sm:$0xff]  }
 0x40e   :  { %6996 = vmatprep.subr.bf16.mxu1 %v9807_v12  ;;  %v9847_v12 = vld [vmem:[#allocation8 + $0x770] ss:$36 sps:$4 sm:$0xff]  }
 0x410   :  { %6956 = vmatpush2.bf16.msra.mxu0 %v9802_v37  ;;  %v9848_v37 = vld [vmem:[#allocation8 + $0xb0] ss:$36 sps:$4 sm:$0xff]  }
 0x411   :  { %6997 = vmatpush2.bf16.msra.mxu1 %v9805_v38  ;;  %6957 = vmatprep.subr.bf16.mxu0 %v9810_v42  ;;  %v9849_v38 = vld [vmem:[#allocation8 + $0x530] ss:$36 sps:$4 sm:$0xff]   ;;  %v9850_v42 = vld [vmem:[#allocation8 + $0x2a8] ss:$36 sps:$4 sm:$0xff]  }
 0x412   :  { %6998 = vmatprep.subr.bf16.mxu1 %v9813_v45  ;;  %v9851_v45 = vld [vmem:[#allocation8 + $0x728] ss:$36 sps:$4 sm:$0xff]  }
 0x414   :  { %6958 = vmatpush2.bf16.msra.mxu0 %v9808_v2  ;;  %v9852_v2 = vld [vmem:[#allocation8 + $0x68] ss:$36 sps:$4 sm:$0xff]  }
 0x415   :  { %6999 = vmatpush2.bf16.msra.mxu1 %v9811_v47  ;;  %6959 = vmatprep.subr.bf16.mxu0 %v9816_v48  ;;  %v9853_v47 = vld [vmem:[#allocation8 + $0x4e8] ss:$36 sps:$4 sm:$0xff]   ;;  %v9854_v48 = vld [vmem:[#allocation8 + $0x260] ss:$36 sps:$4 sm:$0xff]  }
 0x416   :  { %7000 = vmatprep.subr.bf16.mxu1 %v9819_v43  ;;  %v9855_v43 = vld [vmem:[#allocation8 + $0x6e0] ss:$36 sps:$4 sm:$0xff]  }
 0x418   :  { %6960 = vmatpush2.bf16.msra.mxu0 %v9814_v53  ;;  %v9856_v53 = vld [vmem:[#allocation8 + $0x20] ss:$36 sps:$4 sm:$0xff]  }
 0x419   :  { %7001 = vmatpush2.bf16.msra.mxu1 %v9817_v55  ;;  %6961 = vmatprep.subr.bf16.mxu0 %v9822_v58  ;;  %v9857_v55 = vld [vmem:[#allocation8 + $0x4a0] ss:$36 sps:$4 sm:$0xff]   ;;  %v9858_v58 = vld [vmem:[#allocation8 + $0xd58] ss:$36 sps:$4 sm:$0xff]  }
 0x41a   :  { %7002 = vmatprep.subr.bf16.mxu1 %v9825_v3  ;;  %v9859_v3 = vld [vmem:[#allocation8 + $0x11d8] ss:$36 sps:$4 sm:$0xff]  }
 0x41c   :  { %6962 = vmatpush2.bf16.msra.mxu0 %v9820_v15  ;;  %v9860_v15 = vld [vmem:[#allocation8 + $0xb18] ss:$36 sps:$4 sm:$0xff]  }
 0x41d   :  { %7003 = vmatpush2.bf16.msra.mxu1 %v9823_v8  ;;  %8872 = vmatprep.subr.bf16.mxu0 %v9826_v23  ;;  %v9861_v8 = vld [vmem:[#allocation8 + $0xf98] ss:$36 sps:$4 sm:$0xff]   ;;  %v9862_v23 = vld [vmem:[#allocation8 + $0xd10] ss:$36 sps:$4 sm:$0xff]  }
 0x41e   :  { %8894 = vmatprep.subr.bf16.mxu1 %v9827_v20  ;;  %v9863_v20 = vld [vmem:[#allocation8 + $0x1190] ss:$36 sps:$4 sm:$0xff]  }
 0x41f   :  { %v6719_v16 = vpop.f32.mrf.mxu0  ;;  %6964 = vmatmul.mubr.bf16.vlgmr.msra.gmra.mxu0 %v10567_v39 }
 0x420   :  { %v6720_v21 = vadd.f32 %v6719_v16, %v3387_v9  ;;  %v6760_v62 = vpop.f32.mrf.mxu1  ;;  %7005 = vmatmul.mubr.bf16.vlgmr.msra.gmra.mxu1 %v10569_v44  ;;  %8873 = vmatpush3.bf16.msra.mxu0 %v9828_v60  ;;  %v9864_v9 = vld [vmem:[#allocation8 + $0xad0] ss:$36 sps:$4 sm:$0xff]   ;;  %v9870_v16 = vld [vmem:[#allocation8 + $0xc80] ss:$36 sps:$4 sm:$0xff]  }
 0x421   :  { %7045 = vmatprep.mubr.bf16.mxu0 %v10537_v11  ;;  %8895 = vmatpush3.bf16.msra.mxu1 %v9829_v57  ;;  %v6721_v51 = vpop.f32.mrf.mxu0  ;;  %v9865_v60 = vld [vmem:[#allocation8 + $0xf50] ss:$36 sps:$4 sm:$0xff]   ;;  %v9866_v57 = vld [vmem:[#allocation8 + $0xcc8] ss:$36 sps:$4 sm:$0xff]  }
 0x422   :  { %v10635_v24 = vadd.f32 %v6760_v62, %v6720_v21  ;;  %7085 = vmatprep.mubr.bf16.mxu1 %v10541_v50  ;;  %v6722_v40 = vadd.f32 %v6721_v51, %v3391_v52  ;;  %v6762_v4 = vpop.f32.mrf.mxu1  ;;  %8874 = vmatprep.subr.bf16.mxu0 %v9830_v59  ;;  %v9840_v50 = vld [vmem:[#allocation8 + $0x140] ss:$36 sps:$4 sm:$0xff]   ;;  %v9867_v52 = vld [vmem:[#allocation8 + $0x1148] ss:$36 sps:$4 sm:$0xff]   ;;  %v9874_v21 = vld [vmem:[#allocation8 + $0xc38] ss:$36 sps:$4 sm:$0xff]  }
 0x423   :  { %v6723_v25 = vpop.f32.mrf.mxu0  ;;  %8896 = vmatprep.subr.bf16.mxu1 %v9831_v61  ;;  %v9868_v59 = vld [vmem:[#allocation8 + $0xa88] ss:$36 sps:$4 sm:$0xff]   ;;  %v9872_v61 = vld [vmem:[#allocation8 + $0xa40] ss:$36 sps:$4 sm:$0xff]   ;;  %v9875_v62 = vld [vmem:[#allocation8 + $0x10b8] ss:$36 sps:$4 sm:$0xff]  }
 0x424   :  { %v10638_v36 = vadd.f32 %v6762_v4, %v6722_v40  ;;  %v6764_v26 = vpop.f32.mrf.mxu1  ;;  %8875 = vmatpush3.bf16.msra.mxu0 %v9832_v18  ;;  %v9877_v18 = vld [vmem:[#allocation8 + $0xe78] ss:$36 sps:$4 sm:$0xff]   ;;  %v9878_v51 = vld [vmem:[#allocation8 + $0xbf0] ss:$36 sps:$4 sm:$0xff]   ;;  %v9882_v4 = vld [vmem:[#allocation8 + $0xba8] ss:$36 sps:$4 sm:$0xff]  }
 0x425   :  { %8897 = vmatpush3.bf16.msra.mxu1 %v9833_v63  ;;  %v6724_v11 = vpop.f32.mrf.mxu0  ;;  %8876 = vmatprep.subr.bf16.mxu0 %v9834_v1  ;;  %v9879_v63 = vld [vmem:[#allocation8 + $0x1070] ss:$36 sps:$4 sm:$0xff]   ;;  %v9884_v25 = vld [vmem:[#allocation8 + $0x968] ss:$36 sps:$4 sm:$0xff]  }
 0x426   :  { %v6765_v28 = vpop.f32.mrf.mxu1  ;;  %8898 = vmatprep.subr.bf16.mxu1 %v9835_v46  ;;  %v9880_v1 = vld [vmem:[#allocation8 + $0x9b0] ss:$36 sps:$4 sm:$0xff]   ;;  %v9883_v46 = vld [vmem:[#allocation8 + $0x1028] ss:$36 sps:$4 sm:$0xff]   ;;  %v9887_v11 = vld [vmem:[#allocation8 + $0xfe0] ss:$36 sps:$4 sm:$0xff]  }
 0x427   :  { %v9881_v40 = vld [vmem:[#allocation8 + $0xe30] ss:$36 sps:$4 sm:$0xff]   ;;  %v9885_v26 = vld [vmem:[#allocation8 + $0xde8] ss:$36 sps:$4 sm:$0xff]  }
 0x428   :  { %8877 = vmatpush3.bf16.msra.mxu0 %v9836_v5  ;;  %v9886_v5 = vld [vmem:[#allocation8 + $0xb60] ss:$36 sps:$4 sm:$0xff]  }
 0x429   :  { %8899 = vmatpush3.bf16.msra.mxu1 %v9837_v6  ;;  %8878 = vmatprep.subr.bf16.mxu0 %v9838_v7  ;;  %v9888_v6 = vld [vmem:[#allocation8 + $0x920] ss:$36 sps:$4 sm:$0xff]  }
 0x42a   :  { %8900 = vmatprep.subr.bf16.mxu1 %v9839_v29  ;;  %v9889_v7 = vld [vmem:[#allocation8 + $0xda0] ss:$36 sps:$4 sm:$0xff]  }
 0x42b   :  { %v9892_v28 = vld [vmem:[#allocation11 + $0x74] ss:$8 sps:$4 sm:$0xff]   ;;  %v9890_v29 = vld [vmem:[#allocation11 + $0x70] ss:$8 sps:$4 sm:$0xff]  }
 0x42c   :  { %8879 = vmatpush3.bf16.msra.mxu0 %v9840_v50  ;;  %v9895_v50 = vld [vmem:[#allocation11 + $0x64] ss:$8 sps:$4 sm:$0xff]  }
 0x42d   :  { %8901 = vmatpush3.bf16.msra.mxu1 %v9841_v30  ;;  %8880 = vmatprep.subr.bf16.mxu0 %v9842_v31 }
 0x42e   :  { %8902 = vmatprep.subr.bf16.mxu1 %v9843_v22 }
 0x430   :  { %8881 = vmatpush3.bf16.msra.mxu0 %v9844_v32  ;;  %v9893_v32 = vld [vmem:[#allocation11 + $0x60] ss:$8 sps:$4 sm:$0xff]  }
 0x431   :  { %8903 = vmatpush3.bf16.msra.mxu1 %v9845_v34  ;;  %8882 = vmatprep.subr.bf16.mxu0 %v9846_v35  ;;  %v9898_v35 = vld [vmem:[#allocation11 + $0x54] ss:$8 sps:$4 sm:$0xff]  }
 0x432   :  { %8904 = vmatprep.subr.bf16.mxu1 %v9847_v12 }
 0x434   :  { %8883 = vmatpush3.bf16.msra.mxu0 %v9848_v37 }
 0x435   :  { %8905 = vmatpush3.bf16.msra.mxu1 %v9849_v38  ;;  %8884 = vmatprep.subr.bf16.mxu0 %v9850_v42 }
 0x436   :  { %8906 = vmatprep.subr.bf16.mxu1 %v9851_v45  ;;  %v7174_v45 = vmax.f32 %v10601_v27, 0.0  ;;  %v9904_v27 = vld [vmem:[#allocation11 + $0x34] ss:$8 sps:$4 sm:$0xff]  }
 0x438   :  { %8885 = vmatpush3.bf16.msra.mxu0 %v9852_v2 }
 0x439   :  { %8907 = vmatpush3.bf16.msra.mxu1 %v9853_v47  ;;  %8886 = vmatprep.subr.bf16.mxu0 %v9854_v48 }
 0x43a   :  { %8908 = vmatprep.subr.bf16.mxu1 %v9855_v43  ;;  %v7175_v43 = vmax.f32 %v10619_v33, 0.0  ;;  %v9908_v33 = vld [vmem:[#allocation11 + $0x10] ss:$8 sps:$4 sm:$0xff]  }
 0x43c   :  { %8887 = vmatpush3.bf16.msra.mxu0 %v9856_v53 }
 0x43d   :  { %8909 = vmatpush3.bf16.msra.mxu1 %v9857_v55  ;;  %8916 = vmatprep.subr.bf16.mxu0 %v9858_v58 }
 0x43e   :  { %8938 = vmatprep.subr.bf16.mxu1 %v9859_v3 }
 0x43f   :  { %7046 = vmatmul.mubr.bf16.vlgmr.msra.gmra.mxu0 %v10539_v49  ;;  %v9869_v49 = vld [vmem:[#allocation8 + $0xf08] ss:$36 sps:$4 sm:$0xff]  }
 0x440   :  { %7086 = vmatmul.mubr.bf16.vlgmr.msra.gmra.mxu1 %v10543_v56  ;;  %8917 = vmatpush3.bf16.msra.mxu0 %v9860_v15  ;;  %v9871_v56 = vld [vmem:[#allocation8 + $0x1100] ss:$36 sps:$4 sm:$0xff]  }
 0x441   :  { %7125 = vmatprep.mubr.bf16.mxu0 %v10559_v17  ;;  %8939 = vmatpush3.bf16.msra.mxu1 %v9861_v8  ;;  %v9873_v17 = vld [vmem:[#allocation8 + $0xec0] ss:$36 sps:$4 sm:$0xff]   ;;  %v9907_v8 = vld [vmem:[#allocation11 + $0x24] ss:$8 sps:$4 sm:$0xff]  }
 0x442   :  { %7165 = vmatprep.mubr.bf16.mxu1 %v10561_v14  ;;  %8918 = vmatprep.subr.bf16.mxu0 %v9862_v23  ;;  %v9876_v14 = vld [vmem:[#allocation8 + $0x9f8] ss:$36 sps:$4 sm:$0xff]   ;;  %v9905_v23 = vld [vmem:[#allocation11 + $0x20] ss:$8 sps:$4 sm:$0xff]  }
 0x443   :  { %8940 = vmatprep.subr.bf16.mxu1 %v9863_v20  ;;  %v9902_v15 = vld [vmem:[#allocation11 + $0x30] ss:$8 sps:$4 sm:$0xff]   ;;  %v9910_v20 = vld [vmem:[#allocation11 + $0x14] ss:$8 sps:$4 sm:$0xff]  }
 0x444   :  { %8919 = vmatpush3.bf16.msra.mxu0 %v9864_v9  ;;  %v9913_v9 = vld [vmem:[#allocation11 + $0x4] ss:$8 sps:$4 sm:$0xff]  }
 0x445   :  { %8941 = vmatpush3.bf16.msra.mxu1 %v9865_v60  ;;  %8920 = vmatprep.subr.bf16.mxu0 %v9866_v57  ;;  %v9911_v60 = vld [vmem:[#allocation11] ss:$8 sps:$4 sm:$0xff]   ;;  %v9916_v57 = vld [vmem:[#allocation11 + $0xf4] ss:$8 sps:$4 sm:$0xff]  }
 0x446   :  { %8942 = vmatprep.subr.bf16.mxu1 %v9867_v52  ;;  %v9914_v52 = vld [vmem:[#allocation11 + $0xf0] ss:$8 sps:$4 sm:$0xff]  }
 0x448   :  { %8921 = vmatpush3.bf16.msra.mxu0 %v9868_v59  ;;  %v9919_v59 = vld [vmem:[#allocation11 + $0xe4] ss:$8 sps:$4 sm:$0xff]  }
 0x449   :  { %8943 = vmatpush3.bf16.msra.mxu1 %v9869_v49  ;;  %8922 = vmatprep.subr.bf16.mxu0 %v9870_v16  ;;  %v9917_v49 = vld [vmem:[#allocation11 + $0xe0] ss:$8 sps:$4 sm:$0xff]   ;;  %v9922_v16 = vld [vmem:[#allocation11 + $0xd4] ss:$8 sps:$4 sm:$0xff]  }
 0x44a   :  { %8944 = vmatprep.subr.bf16.mxu1 %v9871_v56  ;;  %v9920_v56 = vld [vmem:[#allocation11 + $0xd0] ss:$8 sps:$4 sm:$0xff]  }
 0x44c   :  { %8923 = vmatpush3.bf16.msra.mxu0 %v9872_v61  ;;  %v9925_v61 = vld [vmem:[#allocation11 + $0xc4] ss:$8 sps:$4 sm:$0xff]  }
 0x44d   :  { %8945 = vmatpush3.bf16.msra.mxu1 %v9873_v17  ;;  %8924 = vmatprep.subr.bf16.mxu0 %v9874_v21  ;;  %v9938_v17 = vld [vmem:[#allocation11 + $0x170] ss:$8 sps:$4 sm:$0xff]   ;;  %v9940_v21 = vld [vmem:[#allocation11 + $0x174] ss:$8 sps:$4 sm:$0xff]  }
 0x44e   :  { %8946 = vmatprep.subr.bf16.mxu1 %v9875_v62  ;;  %v9943_v62 = vld [vmem:[#allocation11 + $0x164] ss:$8 sps:$4 sm:$0xff]  }
 0x450   :  { %8925 = vmatpush3.bf16.msra.mxu0 %v9876_v14  ;;  %v9923_v14 = vld [vmem:[#allocation11 + $0xc0] ss:$8 sps:$4 sm:$0xff]  }
 0x451   :  { %8947 = vmatpush3.bf16.msra.mxu1 %v9877_v18  ;;  %8926 = vmatprep.subr.bf16.mxu0 %v9878_v51  ;;  %v9928_v18 = vld [vmem:[#allocation11 + $0xb4] ss:$8 sps:$4 sm:$0xff]   ;;  %v9941_v51 = vld [vmem:[#allocation11 + $0x160] ss:$8 sps:$4 sm:$0xff]  }
 0x452   :  { %8948 = vmatprep.subr.bf16.mxu1 %v9879_v63  ;;  %v9946_v63 = vld [vmem:[#allocation11 + $0x154] ss:$8 sps:$4 sm:$0xff]  }
 0x454   :  { %8927 = vmatpush3.bf16.msra.mxu0 %v9880_v1  ;;  %v9926_v1 = vld [vmem:[#allocation11 + $0xb0] ss:$8 sps:$4 sm:$0xff]  }
 0x455   :  { %8949 = vmatpush3.bf16.msra.mxu1 %v9881_v40  ;;  %8928 = vmatprep.subr.bf16.mxu0 %v9882_v4  ;;  %v9931_v40 = vld [vmem:[#allocation11 + $0xa4] ss:$8 sps:$4 sm:$0xff]   ;;  %v9944_v4 = vld [vmem:[#allocation11 + $0x150] ss:$8 sps:$4 sm:$0xff]  }
 0x456   :  { %8950 = vmatprep.subr.bf16.mxu1 %v9883_v46  ;;  %v9949_v46 = vld [vmem:[#allocation11 + $0x144] ss:$8 sps:$4 sm:$0xff]  }
 0x458   :  { %8929 = vmatpush3.bf16.msra.mxu0 %v9884_v25  ;;  %v9929_v25 = vld [vmem:[#allocation11 + $0xa0] ss:$8 sps:$4 sm:$0xff]  }
 0x459   :  { %8951 = vmatpush3.bf16.msra.mxu1 %v9885_v26  ;;  %8930 = vmatprep.subr.bf16.mxu0 %v9886_v5  ;;  %v9934_v26 = vld [vmem:[#allocation11 + $0x94] ss:$8 sps:$4 sm:$0xff]   ;;  %v9947_v5 = vld [vmem:[#allocation11 + $0x140] ss:$8 sps:$4 sm:$0xff]  }
 0x45a   :  { %8952 = vmatprep.subr.bf16.mxu1 %v9887_v11  ;;  %v9952_v11 = vld [vmem:[#allocation11 + $0x134] ss:$8 sps:$4 sm:$0xff]  }
 0x45c   :  { %8931 = vmatpush3.bf16.msra.mxu0 %v9888_v6  ;;  %v9932_v6 = vld [vmem:[#allocation11 + $0x90] ss:$8 sps:$4 sm:$0xff]  }
 0x45d   :  { %8953 = vmatpush3.bf16.msra.mxu1 %v9889_v7  ;;  %7491 = vmatprep.subr.bf16.mxu0 %v9892_v28  ;;  %v9937_v7 = vld [vmem:[#allocation11 + $0x84] ss:$8 sps:$4 sm:$0xff]   ;;  %v9950_v28 = vld [vmem:[#allocation11 + $0x130] ss:$8 sps:$4 sm:$0xff]  }
 0x45e   :  { %7532 = vmatprep.subr.bf16.mxu1 %v9940_v21 }
 0x45f   :  { %v6801_v30 = vpop.f32.mrf.mxu0  ;;  %7126 = vmatmul.mubr.bf16.vlgmr.msra.gmra.mxu0 %v10567_v39 }
 0x460   :  { %v6802_v31 = vadd.f32 %v6801_v30, %v10635_v24  ;;  %v6842_v22 = vpop.f32.mrf.mxu1  ;;  %7166 = vmatmul.mubr.bf16.vlgmr.msra.gmra.mxu1 %v10569_v44  ;;  %7492 = vmatpush1.bf16.msra.mxu0 %v9890_v29  ;;  %v9896_v24 = vld [vmem:[#allocation11 + $0x50] ss:$8 sps:$4 sm:$0xff]   ;;  %v9901_v44 = vld [vmem:[#allocation11 + $0x44] ss:$8 sps:$4 sm:$0xff]   ;;  %v9935_v29 = vld [vmem:[#allocation11 + $0x80] ss:$8 sps:$4 sm:$0xff]  }
 0x461   :  { %v6803_v34 = vpop.f32.mrf.mxu0  ;;  %7493 = vmatprep.subr.bf16.mxu0 %v9895_v50  ;;  %7533 = vmatpush1.bf16.msra.mxu1 %v9938_v17 }
 0x462   :  { %v6843_v12 = vadd.f32 %v6842_v22, %v6802_v31  ;;  %v6804_v37 = vadd.f32 %v6803_v34, %v10638_v36  ;;  %v6844_v38 = vpop.f32.mrf.mxu1  ;;  %v9899_v36 = vld [vmem:[#allocation11 + $0x40] ss:$8 sps:$4 sm:$0xff]   ;;  %7534 = vmatprep.subr.bf16.mxu1 %v9943_v62 }
 0x463   :  { %v6805_v42 = vpop.f32.mrf.mxu0 }
 0x464   :  { %v7177_v2 = vmax.f32 %v6843_v12, 0.0  ;;  %v6845_v47 = vadd.f32 %v6844_v38, %v6804_v37  ;;  %v6846_v39 = vpop.f32.mrf.mxu1  ;;  %7494 = vmatpush1.bf16.msra.mxu0 %v9893_v32  ;;  %v9955_v32 = vld [vmem:[#allocation11 + $0x124] ss:$8 sps:$4 sm:$0xff]   ;;  %v9958_v42 = vld [vmem:[#allocation11 + $0x114] ss:$8 sps:$4 sm:$0xff]  }
 0x465   :  { %v6806_v48 = vpop.f32.mrf.mxu0  ;;  %7495 = vmatprep.subr.bf16.mxu0 %v9898_v35  ;;  %7535 = vmatpush1.bf16.msra.mxu1 %v9941_v51  ;;  %v9953_v35 = vld [vmem:[#allocation11 + $0x120] ss:$8 sps:$4 sm:$0xff]   ;;  %v10260_v39 = vmov 0  }
 0x466   :  { %v10650_v53 = vmax.f32 %v7174_v45, %v7177_v2  ;;  %v7178_v55 = vmax.f32 %v6845_v47, 0.0  ;;  %v6847_v58 = vpop.f32.mrf.mxu1  ;;  %7536 = vmatprep.subr.bf16.mxu1 %v9946_v63  ;;  %v9956_v45 = vld [vmem:[#allocation11 + $0x110] ss:$8 sps:$4 sm:$0xff]   ;;  %v9961_v2 = vld [vmem:[#allocation11 + $0x104] ss:$8 sps:$4 sm:$0xff]   ;;  %7564 = vmatprep.mubr.bf16.mxu1 %v10260_v39  ;;  %v3399_v48 = vrot.slane %v10626_v13, %v10497_v41 }
 0x467   :  { %v9959_v47 = vld [vmem:[#allocation11 + $0x100] ss:$8 sps:$4 sm:$0xff]  }
 0x468   :  { %v10652_v3 = vmax.f32 %v7175_v43, %v7178_v55  ;;  %7496 = vmatpush1.bf16.msra.mxu0 %v9896_v24  ;;  %v3395_v24 = vrot.slane %v10626_v13, %v10431_v54  ;;  %v9970_v39 = vld [vmem:[#allocation14 + $0x58] sm:$0xff]  }
 0x469   :  { %7497 = vmatprep.subr.bf16.mxu0 %v9901_v44  ;;  %7537 = vmatpush1.bf16.msra.mxu1 %v9944_v4 }
 0x46a   :  { %7538 = vmatprep.subr.bf16.mxu1 %v9949_v46 }
 0x46c   :  { %7498 = vmatpush1.bf16.msra.mxu0 %v9899_v36 }
 0x46d   :  { %7499 = vmatprep.subr.bf16.mxu0 %v9904_v27  ;;  %7539 = vmatpush1.bf16.msra.mxu1 %v9947_v5 }
 0x46e   :  { %7540 = vmatprep.subr.bf16.mxu1 %v9952_v11 }
 0x470   :  { %7500 = vmatpush1.bf16.msra.mxu0 %v9902_v15 }
 0x471   :  { %7501 = vmatprep.subr.bf16.mxu0 %v9907_v8  ;;  %7541 = vmatpush1.bf16.msra.mxu1 %v9950_v28 }
 0x472   :  { %7542 = vmatprep.subr.bf16.mxu1 %v9955_v32 }
 0x474   :  { %7502 = vmatpush1.bf16.msra.mxu0 %v9905_v23 }
 0x475   :  { %7503 = vmatprep.subr.bf16.mxu0 %v9910_v20  ;;  %7543 = vmatpush1.bf16.msra.mxu1 %v9953_v35  ;;  %v9962_v35 = vld [vmem:[#allocation14 + $0x78] sm:$0xff]  }
 0x476   :  { %7544 = vmatprep.subr.bf16.mxu1 %v9958_v42  ;;  %v9966_v42 = vld [vmem:[#allocation14 + $0x68] sm:$0xff]  }
 0x478   :  { %7504 = vmatpush1.bf16.msra.mxu0 %v9908_v33 }
 0x479   :  { %7505 = vmatprep.subr.bf16.mxu0 %v9913_v9  ;;  %7545 = vmatpush1.bf16.msra.mxu1 %v9956_v45  ;;  %v9967_v45 = vld [vmem:[#allocation14 + $0x28] sm:$0xff]  }
 0x47a   :  { %7546 = vmatprep.subr.bf16.mxu1 %v9961_v2  ;;  %v9968_v2 = vld [vmem:[#allocation14 + $0x60] sm:$0xff]  }
 0x47c   :  { %7506 = vmatpush1.bf16.msra.mxu0 %v9911_v60 }
 0x47d   :  { %7507 = vmatprep.subr.bf16.mxu0 %v9916_v57  ;;  %7547 = vmatpush1.bf16.msra.mxu1 %v9959_v47  ;;  %v9969_v47 = vld [vmem:[#allocation14 + $0x20] sm:$0xff]  }
 0x47e   :  { %8960 = vmatprep.subr.bf16.mxu1 %v9962_v35 }
 0x480   :  { %7508 = vmatpush2.bf16.msra.mxu0 %v9914_v52 }
 0x481   :  { %7509 = vmatprep.subr.bf16.mxu0 %v9919_v59 }
 0x484   :  { %7510 = vmatpush2.bf16.msra.mxu0 %v9917_v49 }
 0x485   :  { %7511 = vmatprep.subr.bf16.mxu0 %v9922_v16 }
 0x488   :  { %7512 = vmatpush2.bf16.msra.mxu0 %v9920_v56 }
 0x489   :  { %7513 = vmatprep.subr.bf16.mxu0 %v9925_v61 }
 0x48c   :  { %7514 = vmatpush2.bf16.msra.mxu0 %v9923_v14 }
 0x48d   :  { %7515 = vmatprep.subr.bf16.mxu0 %v9928_v18 }
 0x490   :  { %7516 = vmatpush2.bf16.msra.mxu0 %v9926_v1 }
 0x491   :  { %7517 = vmatprep.subr.bf16.mxu0 %v9931_v40  ;;  %v8221_v40 = vld [vmem:[#allocation10 + $0x8] ss:$0 sm:$0xff] }
 0x494   :  { %7518 = vmatpush2.bf16.msra.mxu0 %v9929_v25 }
 0x495   :  { %7519 = vmatprep.subr.bf16.mxu0 %v9934_v26 }
 0x498   :  { %7520 = vmatpush2.bf16.msra.mxu0 %v9932_v6 }
 0x499   :  { %7521 = vmatprep.subr.bf16.mxu0 %v9937_v7 }
 0x49c   :  { %7522 = vmatpush2.bf16.msra.mxu0 %v9935_v29 }
 0x49f   :  { %v6883_v50 = vpop.f32.mrf.mxu0 }
 0x4a0   :  { %v6924_v30 = vpop.f32.mrf.mxu1  ;;  %v6884_v44 = vadd.f32 %v6883_v50, %v3395_v24  ;;  %v9972_v24 = vld [vmem:[#allocation14 + $0x50] sm:$0xff]  }
 0x4a1   :  { %v6885_v31 = vpop.f32.mrf.mxu0 }
 0x4a2   :  { %v6926_v22 = vpop.f32.mrf.mxu1  ;;  %v6886_v43 = vadd.f32 %v6885_v31, %v3399_v48  ;;  %v6925_v55 = vadd.f32 %v6924_v30, %v6884_v44  ;;  %v9973_v48 = vld [vmem:[#allocation14 + $0x10] sm:$0xff]   ;;  %v9974_v44 = vld [vmem:[#allocation14 + $0x48] sm:$0xff]  }
 0x4a3   :  { %v6887_v34 = vpop.f32.mrf.mxu0 }
 0x4a4   :  { %v6928_v12 = vpop.f32.mrf.mxu1  ;;  %v6927_v36 = vadd.f32 %v6926_v22, %v6886_v43  ;;  %v9975_v43 = vld [vmem:[#allocation14 + $0x8] sm:$0xff]  }
 0x4a5   :  { %v6888_v37 = vpop.f32.mrf.mxu0  ;;  %v9963_v12 = vld [vmem:[#allocation14 + $0x38] sm:$0xff]  }
 0x4a6   :  { %v6929_v38 = vpop.f32.mrf.mxu1  ;;  %v9964_v37 = vld [vmem:[#allocation14 + $0x70] sm:$0xff]  }
 0x4a7   :  { %v9965_v38 = vld [vmem:[#allocation14 + $0x30] sm:$0xff]  }
 0x4df   :  { %v6965_v58 = vpop.f32.mrf.mxu0 }
 0x4e0   :  { %v6966_v27 = vadd.f32 %v6965_v58, %v6925_v55  ;;  %v7006_v15 = vpop.f32.mrf.mxu1  ;;  %v9976_v55 = vld [vmem:[#allocation14 + $0x40] sm:$0xff]  }
 0x4e1   :  { %v6967_v8 = vpop.f32.mrf.mxu0  ;;  %v9977_v58 = vld [vmem:[#allocation14] sm:$0xff]  }
 0x4e2   :  { %v7007_v23 = vadd.f32 %v7006_v15, %v6966_v27  ;;  %v6968_v20 = vadd.f32 %v6967_v8, %v6927_v36  ;;  %v7008_v33 = vpop.f32.mrf.mxu1  ;;  %v9978_v36 = vld [vmem:[#allocation17 + $0x38] sm:$0xff]   ;;  %v10261_v27 = vmov 0.0   ;;  %v9979_v15 = vld [vmem:[#allocation17 + $0x30] sm:$0xff]   ;;  %v9980_v8 = vld [vmem:[#allocation17 + $0x28] sm:$0xff]  }
 0x4e3   :  { %v6969_v9 = vpop.f32.mrf.mxu0  ;;  %8991 = vmatprep.subr.bf16.mxu0 %v10261_v27 }
 0x4e4   :  { %v7179_v60 = vmax.f32 %v7007_v23, 0.0  ;;  %v7009_v57 = vadd.f32 %v7008_v33, %v6968_v20  ;;  %v7010_v52 = vpop.f32.mrf.mxu1  ;;  %v9981_v23 = vld [vmem:[#allocation17 + $0x20] sm:$0xff]   ;;  %v9982_v20 = vld [vmem:[#allocation17 + $0x18] sm:$0xff]   ;;  %v9983_v33 = vld [vmem:[#allocation17 + $0x10] sm:$0xff]  }
 0x4e5   :  { %v6970_v59 = vpop.f32.mrf.mxu0 }
 0x4e6   :  { %v7185_v54 = vmax.f32 %v10624_v0, %v7179_v60  ;;  %v7180_v49 = vmax.f32 %v7009_v57, 0.0  ;;  %v7011_v41 = vpop.f32.mrf.mxu1  ;;  %v7239_v59 = vld [vmem:[#allocation13] sm:$0x3] }
 0x4e8   :  { %v7186_v13 = vmax.f32 %v10650_v53, %v7180_v49  ;;  %v7188_v56 = vpack.c.bf16 %v7185_v54, %v7185_v54  ;;  %v7244_v54 = vrot.slane %v7239_v59, %v10452_v10  ;;  %v7248_v49 = vrot.slane %v7239_v59, %v10458_v19  ;;  %v9985_v10 = vld [vmem:[#allocation17] sm:$0xff]  }
 0x4ea   :  { %v7189_v16 = vpack.c.bf16 %v7186_v13, %v7186_v13 }
 0x4ec   :  { %7523 = vmatprep.mubr.bf16.mxu0 %v7189_v16 }
 0x4ed   :  { %7524 = vmatmul.mubr.bf16.vlgmr.msra.gmra.mxu0 %v7188_v56 }
 0x4ee   :  { %8992 = vmatpush3.bf16.msra.mxu0 %v9978_v36  ;;  %9007 = vmatprep.mubr.msk.bf16.mxu0 %vm10262_vm2, %v10261_v27 }
 0x4ef   :  { %8993 = vmatprep.subr.bf16.mxu0 %v10261_v27 }
 0x4f2   :  { %8994 = vmatpush3.bf16.msra.mxu0 %v9979_v15 }
 0x4f3   :  { %8995 = vmatprep.subr.bf16.mxu0 %v10261_v27 }
 0x4f6   :  { %8996 = vmatpush3.bf16.msra.mxu0 %v9980_v8 }
 0x4f7   :  { %8997 = vmatprep.subr.bf16.mxu0 %v10261_v27 }
 0x4fa   :  { %8998 = vmatpush3.bf16.msra.mxu0 %v9981_v23 }
 0x4fb   :  { %8999 = vmatprep.subr.bf16.mxu0 %v10261_v27 }
 0x4fe   :  { %9000 = vmatpush3.bf16.msra.mxu0 %v9982_v20 }
 0x4ff   :  { %v8888_v61 = vpop.f32.mrf.mxu0  ;;  %9001 = vmatprep.subr.bf16.mxu0 %v10261_v27 }
 0x500   :  { %v8910_v17 = vpop.f32.mrf.mxu1 }
 0x501   :  { %v8889_v21 = vpop.f32.mrf.mxu0 }
 0x502   :  { %v8911_v62 = vpop.f32.mrf.mxu1  ;;  %v8890_v1 = vadd.f32 %v8889_v21, %v8888_v61  ;;  %9002 = vmatpush3.bf16.msra.mxu0 %v9983_v33 }
 0x503   :  { %v8891_v14 = vpop.f32.mrf.mxu0  ;;  %v8912_v46 = vadd.f32 %v8911_v62, %v8910_v17  ;;  %9003 = vmatprep.subr.bf16.mxu0 %v10261_v27 }
 0x504   :  { %v8913_v18 = vpop.f32.mrf.mxu1  ;;  %v7048_v4 = vadd.f32 %v8890_v1, %v8221_v40  ;;  %v9984_v1 = vld [vmem:[#allocation17 + $0x8] sm:$0xff]   ;;  %v8846_v40 = vld [vmem:[#allocation16] ss:$0 sm:$0xff] }
 0x505   :  { %v8892_v51 = vpop.f32.mrf.mxu0 }
 0x506   :  { %v8914_v63 = vpop.f32.mrf.mxu1  ;;  %v7088_v53 = vadd.f32 %v8912_v46, %v7048_v4  ;;  %9004 = vmatpush3.bf16.msra.mxu0 %v9984_v1 }
 0x507   :  { %9005 = vmatprep.subr.bf16.mxu0 %v10261_v27 }
 0x50a   :  { %9006 = vmatpush3.bf16.msra.mxu0 %v9985_v10 }
 0x51f   :  { %v8932_v0 = vpop.f32.mrf.mxu0 }
 0x520   :  { %v8954_v25 = vpop.f32.mrf.mxu1 }
 0x521   :  { %v8933_v26 = vpop.f32.mrf.mxu0 }
 0x522   :  { %v8934_v5 = vadd.f32 %v8933_v26, %v8932_v0  ;;  %v8955_v11 = vpop.f32.mrf.mxu1 }
 0x523   :  { %v8935_v6 = vpop.f32.mrf.mxu0  ;;  %v8956_v28 = vadd.f32 %v8955_v11, %v8954_v25 }
 0x524   :  { %v7128_v7 = vadd.f32 %v8934_v5, %v7088_v53  ;;  %v8957_v29 = vpop.f32.mrf.mxu1  ;;  %v8863_v5 = vld [vmem:[#allocation19] ss:$0 sm:$0xff] }
 0x525   :  { %v8936_v50 = vpop.f32.mrf.mxu0 }
 0x526   :  { %v7168_v30 = vadd.f32 %v8956_v28, %v7128_v7  ;;  %v8958_v31 = vpop.f32.mrf.mxu1 }
 0x528   :  { %v7181_v22 = vmax.f32 %v7168_v30, 0.0 }
 0x52a   :  { %v7187_v32 = vmax.f32 %v10652_v3, %v7181_v22  ;;  %v9971_v3 = vld [vmem:[#allocation14 + $0x18] sm:$0xff]  }
 0x52c   :  { %v7190_v34 = vpack.c.bf16 %v7187_v32, %v7187_v32 }
 0x52e   :  { %7565 = vmatmul.mubr.bf16.vlgmr.msra.gmra.mxu1 %v7190_v34 }
 0x52f   :  { %8961 = vmatpush3.bf16.msra.mxu1 %v9963_v12 }
 0x530   :  { %8962 = vmatprep.subr.bf16.mxu1 %v9964_v37 }
 0x533   :  { %8963 = vmatpush3.bf16.msra.mxu1 %v9965_v38 }
 0x534   :  { %8964 = vmatprep.subr.bf16.mxu1 %v9966_v42 }
 0x537   :  { %8965 = vmatpush3.bf16.msra.mxu1 %v9967_v45 }
 0x538   :  { %8966 = vmatprep.subr.bf16.mxu1 %v9968_v2 }
 0x53b   :  { %8967 = vmatpush3.bf16.msra.mxu1 %v9969_v47 }
 0x53c   :  { %8968 = vmatprep.subr.bf16.mxu1 %v9970_v39 }
 0x53f   :  { %8969 = vmatpush3.bf16.msra.mxu1 %v9971_v3 }
 0x540   :  { %8970 = vmatprep.subr.bf16.mxu1 %v9972_v24 }
 0x543   :  { %8971 = vmatpush3.bf16.msra.mxu1 %v9973_v48 }
 0x544   :  { %8972 = vmatprep.subr.bf16.mxu1 %v9974_v44 }
 0x547   :  { %8973 = vmatpush3.bf16.msra.mxu1 %v9975_v43 }
 0x548   :  { %8974 = vmatprep.subr.bf16.mxu1 %v9976_v55 }
 0x54b   :  { %8975 = vmatpush3.bf16.msra.mxu1 %v9977_v58 }
 0x5ad   :  { %v7525_v9 = vpop.f32.mrf.mxu0 }
 0x5ae   :  { %v7526_v41 = vadd.f32 %v7525_v9, %v7244_v54 }
 0x5af   :  { %v7527_v60 = vpop.f32.mrf.mxu0 }
 0x5b0   :  { %v7528_v16 = vadd.f32 %v7527_v60, %v7248_v49 }
 0x5b1   :  { %v7529_v57 = vpop.f32.mrf.mxu0 }
 0x5b3   :  { %v7530_v52 = vpop.f32.mrf.mxu0 }
 0x5ee   :  { %v7566_v13 = vpop.f32.mrf.mxu1 }
 0x5ef   :  { %v7567_v56 = vadd.f32 %v7566_v13, %v7526_v41 }
 0x5f0   :  { %v7568_v61 = vpop.f32.mrf.mxu1 }
 0x5f1   :  { %v7569_v17 = vadd.f32 %v7568_v61, %v7528_v16  ;;  %v7573_v21 = vmax.f32 %v7567_v56, 0.0 }
 0x5f2   :  { %v7570_v62 = vpop.f32.mrf.mxu1 }
 0x5f3   :  { %v7574_v14 = vmax.f32 %v7569_v17, 0.0  ;;  %v7575_v63 = vpack.c.bf16 %v7573_v21, %v7573_v21 }
 0x5f4   :  { %v7571_v18 = vpop.f32.mrf.mxu1 }
 0x5f5   :  { %v7576_v51 = vpack.c.bf16 %v7574_v14, %v7574_v14 }
 0x5f7   :  { %7744 = vmatprep.mubr.bf16.mxu1 %v7576_v51 }
 0x5f8   :  { %7745 = vmatmul.mubr.bf16.vlgmr.msra.gmra.mxu1 %v7575_v63 }
 0x6b8   :  { %v8976_v19 = vpop.f32.mrf.mxu1 }
 0x6ba   :  { %v8977_v4 = vpop.f32.mrf.mxu1 }
 0x6bb   :  { %v8978_v0 = vadd.f32 %v8977_v4, %v8976_v19 }
 0x6bc   :  { %v8979_v46 = vpop.f32.mrf.mxu1 }
 0x6bd   :  { %v7747_v25 = vadd.f32 %v8978_v0, %v8846_v40 }
 0x6be   :  { %v8980_v26 = vpop.f32.mrf.mxu1 }
 0x6bf   :  { %v7752_v53 = vpack.c.bf16 %v7747_v25, %v7747_v25 }
 0x6c1   :  { %9008 = vmatmul.mubr.bf16.vlgmr.msra.gmra.mxu0 %v7752_v53 }
 0x781   :  { %v7858_v11 = vpop.f32.mrf.mxu0 }
 0x782   :  { %v7859_v6 = vadd.f32 %v8863_v5, %v7858_v11 }
 0x783   :  { %v9009_v7 = vpop.f32.mrf.mxu0 }
 0x784   :  { %7864 = vst [vmem:[#allocation20] sm:$0xff] %v7859_v6 }
 0x785   :  { %v7861_v28 = vpop.f32.mrf.mxu0 }
 0x786   :  { %10218 = shalt.err (!%p10215_p3)
}
 0x787   :  { %7874 = dma.vmem_to_hbm [thread:$0]  %s7872_s10, 128, %s10677_s11, [#allocation4]   ;;  %v9010_v29 = vpop.f32.mrf.mxu0 }
 0x788   :  { %10239 = dma.done.wait [#allocation4], 128  }
 0x789   :  { %10240 = vsyncadd [#allocation4], 4294967168 }
 0x78a   :  { %7878 = vsyncpa [#allocation3], 1 }
 0x78b   :  { %7879 = vsyncpa [#allocation6], 1 }
 0x78c   :  { %7880 = vsyncpa [#allocation9], 1 }
 0x78d   :  { %7881 = vsyncpa [#allocation12], 1 }
 0x78e   :  { %7882 = vsyncpa [#allocation15], 1 }
 0x78f   :  { %7883 = vsyncpa [#allocation18], 1 }
 0x790   :  { %7884 = vsyncpa [#allocation4], 1 }

</bundles_post_ra>
